<compile_context>
chip_gen: v7x
topology: tpu7x:2x2x1
jax: 0.10.0
libtpu: 0.0.40
codegen_flags: <defaults>
</compile_context>

<pallas_src>
import functools

import numpy as np

import jax
import jax.numpy as jnp
from jax.experimental import pallas as pl
from jax.experimental.pallas import tpu as pltpu

EPS = 1e-5                 # nn.BatchNorm2d default eps
CHANNELS = [4, 8, 16]      # channels_enc
KSIZE = (2, 2)             # kernel_size; stride defaults to kernel_size


# ------------------------------------------------------------------ fused Pallas kernel

def _bn_act(y, gamma, beta, avg, act):
    """Training-mode BatchNorm2d + activation on a (R, W) column-group layout.

    Columns are (group, position, channel)-major.  `avg` is the (W, W)
    group-averaging matrix kron(ones(GP,GP)/GP, eye(C)) that maps per-column
    stats to per-channel stats tiled back over every column of that channel.
    Stats are reduced over rows FIRST, so the avg matmul is only (1,W)x(W,W).
    """
    col_mean = jnp.mean(y, axis=0, keepdims=True)                        # (1, W)
    mean = jnp.dot(col_mean, avg, preferred_element_type=jnp.float32)    # per-channel
    d = y - mean
    col_msq = jnp.mean(d * d, axis=0, keepdims=True)                     # (1, W)
    var = jnp.dot(col_msq, avg, preferred_element_type=jnp.float32)      # biased var
    scale = jax.lax.rsqrt(var + EPS) * gamma                             # gamma folded
    out = d * scale + beta
    if act == "relu":
        return jnp.maximum(out, 0.0)
    return jax.nn.sigmoid(out)


def _unet_fused_kernel(x_ref,
                       w1_ref, g1_ref, b1_ref,           # encoder 1
                       w2_ref, g2_ref, b2_ref,           # encoder 2
                       wb_ref, bb_ref,                   # bottleneck
                       wd0_ref, gd0_ref, bd0_ref,        # decoder 0
                       wd1_ref, gd1_ref, bd1_ref,        # decoder 1 (merged deconv+skip)
                       a1_ref, a2_ref, ad1_ref,          # BN group-averaging matrices
                       o_ref, *, act_enc, act_dec):
    f32 = jnp.float32
    bf16 = jnp.bfloat16

    x0 = x_ref[...]                                                     # bf16 (R, G*64)
    a1 = a1_ref[...]

    # ---- encoder block 1: conv(4->8, k=s=2) + BN + relu (conv bias cancelled by BN)
    y1 = jnp.dot(x0, w1_ref[...], preferred_element_type=f32)           # (R, G*32)
    y1 = _bn_act(y1, g1_ref[...], b1_ref[...], a1, act_enc)             # f32, skip #1
    y1b = y1.astype(bf16)

    # ---- encoder block 2: conv(8->16, k=s=2) + BN + relu
    y2 = jnp.dot(y1b, w2_ref[...], preferred_element_type=f32)          # (R, G*16)
    y2 = _bn_act(y2, g2_ref[...], b2_ref[...], a2_ref[...], act_enc)

    # ---- bottleneck: 1x1 conv (bias kept; no BN / no activation)
    yb = jnp.dot(y2.astype(bf16), wb_ref[...],
                 preferred_element_type=f32) + bb_ref[...]               # (R, G*16)

    # ---- decoder block 0: deconv(16->8, k=s=2) + BN + relu (no skip)
    z0 = jnp.dot(yb.astype(bf16), wd0_ref[...], preferred_element_type=f32)  # (R, G*32)
    z0 = _bn_act(z0, gd0_ref[...], bd0_ref[...], a1, act_dec)

    # ---- decoder block 1: concat([z0, skip1], channel) -> deconv(16->4) + BN + relu.
    # Channel concat == lane-aligned column concat; deconv+skip weights are stacked
    # vertically on the host so this is ONE matmul instead of two.
    cat = jnp.concatenate([z0, y1], axis=-1).astype(bf16)               # (R, 2*G*32)
    z1 = jnp.dot(cat, wd1_ref[...], preferred_element_type=f32)         # (R, G*64)
    z1 = _bn_act(z1, gd1_ref[...], bd1_ref[...], ad1_ref[...], act_dec)

    o_ref[...] = z1


# ------------------------------------------------------------------ host-side packing

def _placement_p1():
    """P1[p, q, kh, kw] = 1 iff 4x4-patch position p == (2*qh+kh, 2*qw+kw)."""
    P = np.zeros((16, 4, 2, 2), dtype=np.float32)
    for qh in range(2):
        for qw in range(2):
            for kh in range(2):
                for kw in range(2):
                    p = (2 * qh + kh) * 4 + (2 * qw + kw)
                    P[p, qh * 2 + qw, kh, kw] = 1.0
    return P


_P1 = _placement_p1()


def _group_avg(n_pos, n_ch):
    """(n_pos*n_ch)^2 matrix: per-column stats -> per-channel stats tiled back."""
    return np.kron(np.ones((n_pos, n_pos), np.float32) / float(n_pos),
                   np.eye(n_ch, dtype=np.float32))


def unet2d_forward(x_nchw, params):
    """Forward pass of UNet2d([4,8,16], k=(2,2)).  Input/output layout: NCHW."""
    N, Cin, H, W = x_nchw.shape
    C1, C2 = CHANNELS[1], CHANNELS[2]        # 8, 16
    Cout = CHANNELS[0]                       # out_channels=None -> channels[0]
    assert Cin == CHANNELS[0] and H % 4 == 0 and W % 4 == 0, \
        "fused kernel requires C_in == channels[0] and H, W divisible by 4"
    H4, W4 = H // 4, W // 4
    M = N * H4 * W4                          # number of independent 4x4 patches

    # lane packing: pack G patches per kernel row so widths are >= 128 lanes
    G = 1
    for cand in (8, 4, 2):
        if M % cand == 0 and M // cand >= 8:
            G = cand
            break
    R = M // G

    # ---- pack input: NCHW -> (R, G*16*Cin), columns ordered (group, patch-pos, cin)
    x = jnp.transpose(x_nchw, (0, 2, 3, 1)).astype(jnp.float32)          # NHWC
    x = x.reshape(N, H4, 4, W4, 4, Cin)                                  # n,H4,ph,W4,pw,c
    x0 = jnp.transpose(x, (0, 1, 3, 2, 4, 5)).reshape(M, 16 * Cin)
    x0 = x0.reshape(R, G * 16 * Cin).astype(jnp.bfloat16)

    # ---- pack weights into per-patch matmul form, then block-diag over G groups
    P1 = jnp.asarray(_P1)

    def bdiag(w):                            # block-diagonal over the G packed patches
        return jnp.kron(jnp.eye(G, dtype=w.dtype), w) if G > 1 else w

    w1 = params["enc"][0]["w"]                                   # (C1, Cin, 2, 2)
    W1 = bdiag(jnp.einsum("pqhw,oihw->piqo", P1, w1).reshape(16 * Cin, 4 * C1))
    w2 = params["enc"][1]["w"]                                   # (C2, C1, 2, 2)
    W2 = bdiag(jnp.transpose(w2, (2, 3, 1, 0)).reshape(4 * C1, C2))
    WB = bdiag(jnp.transpose(params["bottleneck"]["w"][:, :, 0, 0], (1, 0)))
    wd0 = params["dec"][0]["w"]                                  # (C2, C1, 2, 2)
    WD0 = bdiag(jnp.transpose(wd0, (0, 2, 3, 1)).reshape(C2, 4 * C1))
    wd1 = params["dec"][1]["w"]                                  # (2*C1, Cout, 2, 2)
    WD1d = bdiag(jnp.einsum("pqhw,iohw->qipo", P1, wd1[:C1]).reshape(4 * C1, 16 * Cout))
    WD1s = bdiag(jnp.einsum("pqhw,iohw->qipo", P1, wd1[C1:]).reshape(4 * C1, 16 * Cout))
    WD1 = jnp.concatenate([WD1d, WD1s], axis=0)                  # (2*G*4*C1, G*16*Cout)

    bf16 = jnp.bfloat16
    W1, W2, WB, WD0, WD1 = (w.astype(bf16) for w in (W1, W2, WB, WD0, WD1))

    # ---- BatchNorm affine params / bottleneck bias (f32), tiled over (group, position)
    def rowrep(v, reps):
        return jnp.tile(v.astype(jnp.float32), reps).reshape(1, reps * v.shape[0])

    g1 = rowrep(params["enc"][0]["gamma"], 4 * G)
    b1 = rowrep(params["enc"][0]["beta"], 4 * G)
    g2 = rowrep(params["enc"][1]["gamma"], G)
    b2 = rowrep(params["enc"][1]["beta"], G)
    bb = rowrep(params["bottleneck"]["b"], G)
    gd0 = rowrep(params["dec"][0]["gamma"], 4 * G)
    bd0 = rowrep(params["dec"][0]["beta"], 4 * G)
    gd1 = rowrep(params["dec"][1]["gamma"], 16 * G)
    bd1 = rowrep(params["dec"][1]["beta"], 16 * G)

    # ---- group-averaging matrices (f32), only ever applied to (1, W) stat rows
    A1 = jnp.asarray(_group_avg(4 * G, C1))          # y1 / z0 : (G*32, G*32)
    A2 = jnp.asarray(_group_avg(G, C2))              # y2      : (G*16, G*16)
    AD1 = jnp.asarray(_group_avg(16 * G, Cout))      # z1      : (G*64, G*64)

    ins = [x0, W1, g1, b1, W2, g2, b2, WB, bb, WD0, gd0, bd0, WD1, gd1, bd1,
           A1, A2, AD1]

    out_w = G * 16 * Cout
    macs_per_patch = ((16 * Cin) * (4 * C1) + (4 * C1) * C2 + C2 * C2
                      + C2 * (4 * C1) + (8 * C1) * (16 * Cout))
    flops = 2 * M * macs_per_patch
    in_bytes = sum(int(np.prod(a.shape)) * a.dtype.itemsize for a in ins)
    out_bytes = R * out_w * 4
    act_bytes = R * (G * 64) * 4 * 12                # generous live-f32-temp estimate
    vmem_limit = int(min(60 * 2**20,
                         max(16 * 2**20,
                             2 * (in_bytes + out_bytes) + act_bytes + (2 << 20))))

    out = pl.pallas_call(
        functools.partial(_unet_fused_kernel, act_enc="relu", act_dec="relu"),
        out_shape=jax.ShapeDtypeStruct((R, out_w), jnp.float32),
        grid=(1,),
        in_specs=[pl.BlockSpec(a.shape, lambda i: (0, 0)) for a in ins],
        out_specs=pl.BlockSpec((R, out_w), lambda i: (0, 0)),
        compiler_params=pltpu.CompilerParams(
            dimension_semantics=("arbitrary",),
            vmem_limit_bytes=vmem_limit),
        cost_estimate=pl.CostEstimate(flops=flops, transcendentals=0,
                                      bytes_accessed=in_bytes + out_bytes),
    )(*ins)

    # ---- unpack: (R, G*16*Cout) -> (M, 16*Cout) -> NCHW
    y = out.reshape(M, 16 * Cout).reshape(N, H4, W4, 4, 4, Cout)
    y = jnp.transpose(y, (0, 5, 1, 3, 2, 4)).reshape(N, Cout, H, W)
    return y


# ------------------------------------------------------------------ params

def init_params(key):
    params = {"enc": [], "dec": []}
    Kh, Kw = KSIZE

    def nrm(k, shape, scale=0.1):
        return scale * jax.random.normal(k, shape, dtype=jnp.float32)

    keys = iter(jax.random.split(key, 64))

    # encoder blocks: (4->8), (8->16)
    for cin, cout in zip(CHANNELS[:-1], CHANNELS[1:]):
        params["enc"].append({
            "w": nrm(next(keys), (cout, cin, Kh, Kw)),
            "b": nrm(next(keys), (cout,)),      # cancelled exactly by training-mode BN
            "gamma": 1.0 + nrm(next(keys), (cout,)),
            "beta": nrm(next(keys), (cout,)),
        })

    # bottleneck 1x1 conv: 16 -> 16 (bias kept: no BN after it)
    cb = CHANNELS[-1]
    params["bottleneck"] = {
        "w": nrm(next(keys), (cb, cb, 1, 1)),
        "b": nrm(next(keys), (cb,)),
    }

    # decoder channels (out_channels=None): channels_dec = [16, 16, 8]
    channels_dec = CHANNELS[::-1]
    channels_dec = [c if i == 0 else 2 * c for i, c in enumerate(channels_dec)]
    for n in range(len(channels_dec) - 1):
        cin = channels_dec[n]
        cout = channels_dec[n + 1] // 2
        params["dec"].append({
            "w": nrm(next(keys), (cin, cout, Kh, Kw)),   # ConvTranspose2d layout
            "b": nrm(next(keys), (cout,)),               # cancelled by training-mode BN
            "gamma": 1.0 + nrm(next(keys), (cout,)),
            "beta": nrm(next(keys), (cout,)),
        })
    return params


if __name__ == "__main__":
    key = jax.random.PRNGKey(0)
    kx, kp = jax.random.split(key)
    x = jax.random.normal(kx, (2, 4, 16, 16), dtype=jnp.float32)   # NCHW, like PyTorch
    params = init_params(kp)

    fwd = jax.jit(unet2d_forward)
    out = jax.block_until_ready(fwd(x, params))
    assert out.shape == (2, 4, 16, 16), out.shape
    assert bool(jnp.all(jnp.isfinite(out)))
    print("KERNEL_OK")
</pallas_src>

<mosaic_0001>
module attributes {stable_mosaic.version = 11 : i64} {
  func.func @_unet_fused_kernel(%arg0: i32, %arg1: memref<8x256xbf16, #tpu.memory_space<vmem>>, %arg2: memref<256x128xbf16, #tpu.memory_space<vmem>>, %arg3: memref<1x128xf32, #tpu.memory_space<vmem>>, %arg4: memref<1x128xf32, #tpu.memory_space<vmem>>, %arg5: memref<128x64xbf16, #tpu.memory_space<vmem>>, %arg6: memref<1x64xf32, #tpu.memory_space<vmem>>, %arg7: memref<1x64xf32, #tpu.memory_space<vmem>>, %arg8: memref<64x64xbf16, #tpu.memory_space<vmem>>, %arg9: memref<1x64xf32, #tpu.memory_space<vmem>>, %arg10: memref<64x128xbf16, #tpu.memory_space<vmem>>, %arg11: memref<1x128xf32, #tpu.memory_space<vmem>>, %arg12: memref<1x128xf32, #tpu.memory_space<vmem>>, %arg13: memref<256x256xbf16, #tpu.memory_space<vmem>>, %arg14: memref<1x256xf32, #tpu.memory_space<vmem>>, %arg15: memref<1x256xf32, #tpu.memory_space<vmem>>, %arg16: memref<128x128xf32, #tpu.memory_space<vmem>>, %arg17: memref<64x64xf32, #tpu.memory_space<vmem>>, %arg18: memref<256x256xf32, #tpu.memory_space<vmem>>, %arg19: memref<8x256xf32, #tpu.memory_space<vmem>>) attributes {dimension_semantics = [#tpu.dimension_semantics<arbitrary>], iteration_bounds = array<i64: 1>, scalar_prefetch = 0 : i64, scratch_operands = 0 : i64, tpu.core_type = #tpu.core_type<tc>, window_params = [{pipeline_mode = #tpu.pipeline_mode<synchronous>, transform_indices = @transform_0, window_bounds = array<i64: 8, 256>}, {pipeline_mode = #tpu.pipeline_mode<synchronous>, transform_indices = @transform_1, window_bounds = array<i64: 256, 128>}, {pipeline_mode = #tpu.pipeline_mode<synchronous>, transform_indices = @transform_2, window_bounds = array<i64: 1, 128>}, {pipeline_mode = #tpu.pipeline_mode<synchronous>, transform_indices = @transform_3, window_bounds = array<i64: 1, 128>}, {pipeline_mode = #tpu.pipeline_mode<synchronous>, transform_indices = @transform_4, window_bounds = array<i64: 128, 64>}, {pipeline_mode = #tpu.pipeline_mode<synchronous>, transform_indices = @transform_5, window_bounds = array<i64: 1, 64>}, {pipeline_mode = #tpu.pipeline_mode<synchronous>, transform_indices = @transform_6, window_bounds = array<i64: 1, 64>}, {pipeline_mode = #tpu.pipeline_mode<synchronous>, transform_indices = @transform_7, window_bounds = array<i64: 64, 64>}, {pipeline_mode = #tpu.pipeline_mode<synchronous>, transform_indices = @transform_8, window_bounds = array<i64: 1, 64>}, {pipeline_mode = #tpu.pipeline_mode<synchronous>, transform_indices = @transform_9, window_bounds = array<i64: 64, 128>}, {pipeline_mode = #tpu.pipeline_mode<synchronous>, transform_indices = @transform_10, window_bounds = array<i64: 1, 128>}, {pipeline_mode = #tpu.pipeline_mode<synchronous>, transform_indices = @transform_11, window_bounds = array<i64: 1, 128>}, {pipeline_mode = #tpu.pipeline_mode<synchronous>, transform_indices = @transform_12, window_bounds = array<i64: 256, 256>}, {pipeline_mode = #tpu.pipeline_mode<synchronous>, transform_indices = @transform_13, window_bounds = array<i64: 1, 256>}, {pipeline_mode = #tpu.pipeline_mode<synchronous>, transform_indices = @transform_14, window_bounds = array<i64: 1, 256>}, {pipeline_mode = #tpu.pipeline_mode<synchronous>, transform_indices = @transform_15, window_bounds = array<i64: 128, 128>}, {pipeline_mode = #tpu.pipeline_mode<synchronous>, transform_indices = @transform_16, window_bounds = array<i64: 64, 64>}, {pipeline_mode = #tpu.pipeline_mode<synchronous>, transform_indices = @transform_17, window_bounds = array<i64: 256, 256>}, {pipeline_mode = #tpu.pipeline_mode<synchronous>, transform_indices = @transform_18, window_bounds = array<i64: 8, 256>}]} {
    %c0 = arith.constant 0 : index
    %c0_0 = arith.constant 0 : index
    %0 = vector.load %arg1[%c0, %c0_0] : memref<8x256xbf16, #tpu.memory_space<vmem>>, vector<8x256xbf16>
    %c0_1 = arith.constant 0 : index
    %c0_2 = arith.constant 0 : index
    %1 = vector.load %arg16[%c0_1, %c0_2] : memref<128x128xf32, #tpu.memory_space<vmem>>, vector<128x128xf32>
    %c0_3 = arith.constant 0 : index
    %c0_4 = arith.constant 0 : index
    %2 = vector.load %arg2[%c0_3, %c0_4] : memref<256x128xbf16, #tpu.memory_space<vmem>>, vector<256x128xbf16>
    %cst = arith.constant dense<0.000000e+00> : vector<8x128xf32>
    %3 = tpu.matmul %0, %2, %cst {dimension_numbers = #tpu.dot_dimension_numbers<[1], [0], [0], [1], [0, 0, 1, 1], [], []>} : vector<8x256xbf16>, vector<256x128xbf16>, vector<8x128xf32> -> vector<8x128xf32>
    %c0_5 = arith.constant 0 : index
    %c0_6 = arith.constant 0 : index
    %4 = vector.load %arg3[%c0_5, %c0_6] : memref<1x128xf32, #tpu.memory_space<vmem>>, vector<1x128xf32>
    %c0_7 = arith.constant 0 : index
    %c0_8 = arith.constant 0 : index
    %5 = vector.load %arg4[%c0_7, %c0_8] : memref<1x128xf32, #tpu.memory_space<vmem>>, vector<1x128xf32>
    %cst_9 = arith.constant dense<0.000000e+00> : vector<128xf32>
    %6 = vector.multi_reduction <add>, %3, %cst_9 [0] : vector<8x128xf32> to vector<128xf32>
    %7 = vector.shape_cast %6 : vector<128xf32> to vector<1x128xf32>
    %cst_10 = arith.constant 8.000000e+00 : f32
    %8 = vector.broadcast %cst_10 : f32 to vector<1x128xf32>
    %9 = arith.divf %7, %8 : vector<1x128xf32>
    %cst_11 = arith.constant dense<0.000000e+00> : vector<1x128xf32>
    %10 = tpu.matmul %9, %1, %cst_11 {dimension_numbers = #tpu.dot_dimension_numbers<[1], [0], [0], [1], [0, 0, 1, 1], [], []>} : vector<1x128xf32>, vector<128x128xf32>, vector<1x128xf32> -> vector<1x128xf32>
    %11 = vector.broadcast %10 : vector<1x128xf32> to vector<8x128xf32>
    %12 = arith.subf %3, %11 : vector<8x128xf32>
    %13 = arith.mulf %12, %12 : vector<8x128xf32>
    %cst_12 = arith.constant dense<0.000000e+00> : vector<128xf32>
    %14 = vector.multi_reduction <add>, %13, %cst_12 [0] : vector<8x128xf32> to vector<128xf32>
    %15 = vector.shape_cast %14 : vector<128xf32> to vector<1x128xf32>
    %cst_13 = arith.constant 8.000000e+00 : f32
    %16 = vector.broadcast %cst_13 : f32 to vector<1x128xf32>
    %17 = arith.divf %15, %16 : vector<1x128xf32>
    %cst_14 = arith.constant dense<0.000000e+00> : vector<1x128xf32>
    %18 = tpu.matmul %17, %1, %cst_14 {dimension_numbers = #tpu.dot_dimension_numbers<[1], [0], [0], [1], [0, 0, 1, 1], [], []>} : vector<1x128xf32>, vector<128x128xf32>, vector<1x128xf32> -> vector<1x128xf32>
    %cst_15 = arith.constant 9.99999974E-6 : f32
    %19 = vector.broadcast %cst_15 : f32 to vector<1x128xf32>
    %20 = arith.addf %18, %19 : vector<1x128xf32>
    %21 = math.rsqrt %20 : vector<1x128xf32>
    %22 = arith.mulf %21, %4 : vector<1x128xf32>
    %23 = vector.broadcast %22 : vector<1x128xf32> to vector<8x128xf32>
    %24 = arith.mulf %12, %23 : vector<8x128xf32>
    %25 = vector.broadcast %5 : vector<1x128xf32> to vector<8x128xf32>
    %26 = arith.addf %24, %25 : vector<8x128xf32>
    %cst_16 = arith.constant 0.000000e+00 : f32
    %27 = vector.broadcast %cst_16 : f32 to vector<8x128xf32>
    %28 = arith.maximumf %26, %27 : vector<8x128xf32>
    %29 = arith.truncf %28 : vector<8x128xf32> to vector<8x128xbf16>
    %c0_17 = arith.constant 0 : index
    %c0_18 = arith.constant 0 : index
    %30 = vector.load %arg5[%c0_17, %c0_18] : memref<128x64xbf16, #tpu.memory_space<vmem>>, vector<128x64xbf16>
    %cst_19 = arith.constant dense<0.000000e+00> : vector<8x64xf32>
    %31 = tpu.matmul %29, %30, %cst_19 {dimension_numbers = #tpu.dot_dimension_numbers<[1], [0], [0], [1], [0, 0, 1, 1], [], []>} : vector<8x128xbf16>, vector<128x64xbf16>, vector<8x64xf32> -> vector<8x64xf32>
    %c0_20 = arith.constant 0 : index
    %c0_21 = arith.constant 0 : index
    %32 = vector.load %arg6[%c0_20, %c0_21] : memref<1x64xf32, #tpu.memory_space<vmem>>, vector<1x64xf32>
    %c0_22 = arith.constant 0 : index
    %c0_23 = arith.constant 0 : index
    %33 = vector.load %arg7[%c0_22, %c0_23] : memref<1x64xf32, #tpu.memory_space<vmem>>, vector<1x64xf32>
    %c0_24 = arith.constant 0 : index
    %c0_25 = arith.constant 0 : index
    %34 = vector.load %arg17[%c0_24, %c0_25] : memref<64x64xf32, #tpu.memory_space<vmem>>, vector<64x64xf32>
    %cst_26 = arith.constant dense<0.000000e+00> : vector<64xf32>
    %35 = vector.multi_reduction <add>, %31, %cst_26 [0] : vector<8x64xf32> to vector<64xf32>
    %36 = vector.shape_cast %35 : vector<64xf32> to vector<1x64xf32>
    %cst_27 = arith.constant 8.000000e+00 : f32
    %37 = vector.broadcast %cst_27 : f32 to vector<1x64xf32>
    %38 = arith.divf %36, %37 : vector<1x64xf32>
    %cst_28 = arith.constant dense<0.000000e+00> : vector<1x64xf32>
    %39 = tpu.matmul %38, %34, %cst_28 {dimension_numbers = #tpu.dot_dimension_numbers<[1], [0], [0], [1], [0, 0, 1, 1], [], []>} : vector<1x64xf32>, vector<64x64xf32>, vector<1x64xf32> -> vector<1x64xf32>
    %40 = vector.broadcast %39 : vector<1x64xf32> to vector<8x64xf32>
    %41 = arith.subf %31, %40 : vector<8x64xf32>
    %42 = arith.mulf %41, %41 : vector<8x64xf32>
    %cst_29 = arith.constant dense<0.000000e+00> : vector<64xf32>
    %43 = vector.multi_reduction <add>, %42, %cst_29 [0] : vector<8x64xf32> to vector<64xf32>
    %44 = vector.shape_cast %43 : vector<64xf32> to vector<1x64xf32>
    %cst_30 = arith.constant 8.000000e+00 : f32
    %45 = vector.broadcast %cst_30 : f32 to vector<1x64xf32>
    %46 = arith.divf %44, %45 : vector<1x64xf32>
    %cst_31 = arith.constant dense<0.000000e+00> : vector<1x64xf32>
    %47 = tpu.matmul %46, %34, %cst_31 {dimension_numbers = #tpu.dot_dimension_numbers<[1], [0], [0], [1], [0, 0, 1, 1], [], []>} : vector<1x64xf32>, vector<64x64xf32>, vector<1x64xf32> -> vector<1x64xf32>
    %cst_32 = arith.constant 9.99999974E-6 : f32
    %48 = vector.broadcast %cst_32 : f32 to vector<1x64xf32>
    %49 = arith.addf %47, %48 : vector<1x64xf32>
    %50 = math.rsqrt %49 : vector<1x64xf32>
    %51 = arith.mulf %50, %32 : vector<1x64xf32>
    %52 = vector.broadcast %51 : vector<1x64xf32> to vector<8x64xf32>
    %53 = arith.mulf %41, %52 : vector<8x64xf32>
    %54 = vector.broadcast %33 : vector<1x64xf32> to vector<8x64xf32>
    %55 = arith.addf %53, %54 : vector<8x64xf32>
    %cst_33 = arith.constant 0.000000e+00 : f32
    %56 = vector.broadcast %cst_33 : f32 to vector<8x64xf32>
    %57 = arith.maximumf %55, %56 : vector<8x64xf32>
    %58 = arith.truncf %57 : vector<8x64xf32> to vector<8x64xbf16>
    %c0_34 = arith.constant 0 : index
    %c0_35 = arith.constant 0 : index
    %59 = vector.load %arg8[%c0_34, %c0_35] : memref<64x64xbf16, #tpu.memory_space<vmem>>, vector<64x64xbf16>
    %cst_36 = arith.constant dense<0.000000e+00> : vector<8x64xf32>
    %60 = tpu.matmul %58, %59, %cst_36 {dimension_numbers = #tpu.dot_dimension_numbers<[1], [0], [0], [1], [0, 0, 1, 1], [], []>} : vector<8x64xbf16>, vector<64x64xbf16>, vector<8x64xf32> -> vector<8x64xf32>
    %c0_37 = arith.constant 0 : index
    %c0_38 = arith.constant 0 : index
    %61 = vector.load %arg9[%c0_37, %c0_38] : memref<1x64xf32, #tpu.memory_space<vmem>>, vector<1x64xf32>
    %62 = vector.broadcast %61 : vector<1x64xf32> to vector<8x64xf32>
    %63 = arith.addf %60, %62 : vector<8x64xf32>
    %64 = arith.truncf %63 : vector<8x64xf32> to vector<8x64xbf16>
    %c0_39 = arith.constant 0 : index
    %c0_40 = arith.constant 0 : index
    %65 = vector.load %arg10[%c0_39, %c0_40] : memref<64x128xbf16, #tpu.memory_space<vmem>>, vector<64x128xbf16>
    %cst_41 = arith.constant dense<0.000000e+00> : vector<8x128xf32>
    %66 = tpu.matmul %64, %65, %cst_41 {dimension_numbers = #tpu.dot_dimension_numbers<[1], [0], [0], [1], [0, 0, 1, 1], [], []>} : vector<8x64xbf16>, vector<64x128xbf16>, vector<8x128xf32> -> vector<8x128xf32>
    %c0_42 = arith.constant 0 : index
    %c0_43 = arith.constant 0 : index
    %67 = vector.load %arg11[%c0_42, %c0_43] : memref<1x128xf32, #tpu.memory_space<vmem>>, vector<1x128xf32>
    %c0_44 = arith.constant 0 : index
    %c0_45 = arith.constant 0 : index
    %68 = vector.load %arg12[%c0_44, %c0_45] : memref<1x128xf32, #tpu.memory_space<vmem>>, vector<1x128xf32>
    %cst_46 = arith.constant dense<0.000000e+00> : vector<128xf32>
    %69 = vector.multi_reduction <add>, %66, %cst_46 [0] : vector<8x128xf32> to vector<128xf32>
    %70 = vector.shape_cast %69 : vector<128xf32> to vector<1x128xf32>
    %cst_47 = arith.constant 8.000000e+00 : f32
    %71 = vector.broadcast %cst_47 : f32 to vector<1x128xf32>
    %72 = arith.divf %70, %71 : vector<1x128xf32>
    %cst_48 = arith.constant dense<0.000000e+00> : vector<1x128xf32>
    %73 = tpu.matmul %72, %1, %cst_48 {dimension_numbers = #tpu.dot_dimension_numbers<[1], [0], [0], [1], [0, 0, 1, 1], [], []>} : vector<1x128xf32>, vector<128x128xf32>, vector<1x128xf32> -> vector<1x128xf32>
    %74 = vector.broadcast %73 : vector<1x128xf32> to vector<8x128xf32>
    %75 = arith.subf %66, %74 : vector<8x128xf32>
    %76 = arith.mulf %75, %75 : vector<8x128xf32>
    %cst_49 = arith.constant dense<0.000000e+00> : vector<128xf32>
    %77 = vector.multi_reduction <add>, %76, %cst_49 [0] : vector<8x128xf32> to vector<128xf32>
    %78 = vector.shape_cast %77 : vector<128xf32> to vector<1x128xf32>
    %cst_50 = arith.constant 8.000000e+00 : f32
    %79 = vector.broadcast %cst_50 : f32 to vector<1x128xf32>
    %80 = arith.divf %78, %79 : vector<1x128xf32>
    %cst_51 = arith.constant dense<0.000000e+00> : vector<1x128xf32>
    %81 = tpu.matmul %80, %1, %cst_51 {dimension_numbers = #tpu.dot_dimension_numbers<[1], [0], [0], [1], [0, 0, 1, 1], [], []>} : vector<1x128xf32>, vector<128x128xf32>, vector<1x128xf32> -> vector<1x128xf32>
    %cst_52 = arith.constant 9.99999974E-6 : f32
    %82 = vector.broadcast %cst_52 : f32 to vector<1x128xf32>
    %83 = arith.addf %81, %82 : vector<1x128xf32>
    %84 = math.rsqrt %83 : vector<1x128xf32>
    %85 = arith.mulf %84, %67 : vector<1x128xf32>
    %86 = vector.broadcast %85 : vector<1x128xf32> to vector<8x128xf32>
    %87 = arith.mulf %75, %86 : vector<8x128xf32>
    %88 = vector.broadcast %68 : vector<1x128xf32> to vector<8x128xf32>
    %89 = arith.addf %87, %88 : vector<8x128xf32>
    %cst_53 = arith.constant 0.000000e+00 : f32
    %90 = vector.broadcast %cst_53 : f32 to vector<8x128xf32>
    %91 = arith.maximumf %89, %90 : vector<8x128xf32>
    %92 = tpu.concatenate %91, %28 in 1 : vector<8x128xf32>, vector<8x128xf32> -> vector<8x256xf32>
    %93 = arith.truncf %92 : vector<8x256xf32> to vector<8x256xbf16>
    %c0_54 = arith.constant 0 : index
    %c0_55 = arith.constant 0 : index
    %94 = vector.load %arg13[%c0_54, %c0_55] : memref<256x256xbf16, #tpu.memory_space<vmem>>, vector<256x256xbf16>
    %cst_56 = arith.constant dense<0.000000e+00> : vector<8x256xf32>
    %95 = tpu.matmul %93, %94, %cst_56 {dimension_numbers = #tpu.dot_dimension_numbers<[1], [0], [0], [1], [0, 0, 1, 1], [], []>} : vector<8x256xbf16>, vector<256x256xbf16>, vector<8x256xf32> -> vector<8x256xf32>
    %c0_57 = arith.constant 0 : index
    %c0_58 = arith.constant 0 : index
    %96 = vector.load %arg14[%c0_57, %c0_58] : memref<1x256xf32, #tpu.memory_space<vmem>>, vector<1x256xf32>
    %c0_59 = arith.constant 0 : index
    %c0_60 = arith.constant 0 : index
    %97 = vector.load %arg15[%c0_59, %c0_60] : memref<1x256xf32, #tpu.memory_space<vmem>>, vector<1x256xf32>
    %c0_61 = arith.constant 0 : index
    %c0_62 = arith.constant 0 : index
    %98 = vector.load %arg18[%c0_61, %c0_62] : memref<256x256xf32, #tpu.memory_space<vmem>>, vector<256x256xf32>
    %cst_63 = arith.constant dense<0.000000e+00> : vector<256xf32>
    %99 = vector.multi_reduction <add>, %95, %cst_63 [0] : vector<8x256xf32> to vector<256xf32>
    %100 = vector.shape_cast %99 : vector<256xf32> to vector<1x256xf32>
    %cst_64 = arith.constant 8.000000e+00 : f32
    %101 = vector.broadcast %cst_64 : f32 to vector<1x256xf32>
    %102 = arith.divf %100, %101 : vector<1x256xf32>
    %cst_65 = arith.constant dense<0.000000e+00> : vector<1x256xf32>
    %103 = tpu.matmul %102, %98, %cst_65 {dimension_numbers = #tpu.dot_dimension_numbers<[1], [0], [0], [1], [0, 0, 1, 1], [], []>} : vector<1x256xf32>, vector<256x256xf32>, vector<1x256xf32> -> vector<1x256xf32>
    %104 = vector.broadcast %103 : vector<1x256xf32> to vector<8x256xf32>
    %105 = arith.subf %95, %104 : vector<8x256xf32>
    %106 = arith.mulf %105, %105 : vector<8x256xf32>
    %cst_66 = arith.constant dense<0.000000e+00> : vector<256xf32>
    %107 = vector.multi_reduction <add>, %106, %cst_66 [0] : vector<8x256xf32> to vector<256xf32>
    %108 = vector.shape_cast %107 : vector<256xf32> to vector<1x256xf32>
    %cst_67 = arith.constant 8.000000e+00 : f32
    %109 = vector.broadcast %cst_67 : f32 to vector<1x256xf32>
    %110 = arith.divf %108, %109 : vector<1x256xf32>
    %cst_68 = arith.constant dense<0.000000e+00> : vector<1x256xf32>
    %111 = tpu.matmul %110, %98, %cst_68 {dimension_numbers = #tpu.dot_dimension_numbers<[1], [0], [0], [1], [0, 0, 1, 1], [], []>} : vector<1x256xf32>, vector<256x256xf32>, vector<1x256xf32> -> vector<1x256xf32>
    %cst_69 = arith.constant 9.99999974E-6 : f32
    %112 = vector.broadcast %cst_69 : f32 to vector<1x256xf32>
    %113 = arith.addf %111, %112 : vector<1x256xf32>
    %114 = math.rsqrt %113 : vector<1x256xf32>
    %115 = arith.mulf %114, %96 : vector<1x256xf32>
    %116 = vector.broadcast %115 : vector<1x256xf32> to vector<8x256xf32>
    %117 = arith.mulf %105, %116 : vector<8x256xf32>
    %118 = vector.broadcast %97 : vector<1x256xf32> to vector<8x256xf32>
    %119 = arith.addf %117, %118 : vector<8x256xf32>
    %cst_70 = arith.constant 0.000000e+00 : f32
    %120 = vector.broadcast %cst_70 : f32 to vector<8x256xf32>
    %121 = arith.maximumf %119, %120 : vector<8x256xf32>
    %c0_71 = arith.constant 0 : index
    %c0_72 = arith.constant 0 : index
    %122 = vector.load %arg19[%c0_71, %c0_72] : memref<8x256xf32, #tpu.memory_space<vmem>>, vector<8x256xf32>
    tpu.vector_store %arg19[%c0_71, %c0_72], %121 {strides = array<i32>} : memref<8x256xf32, #tpu.memory_space<vmem>>, vector<8x256xf32>,
    return
  }
  func.func @transform_0(%arg0: i32) -> (i32, i32) {
    %c0_i32 = arith.constant 0 : i32
    %c0_i32_0 = arith.constant 0 : i32
    %c0_i32_1 = arith.constant 0 : i32
    return %c0_i32, %c0_i32_0 : i32, i32
  }
  func.func @transform_1(%arg0: i32) -> (i32, i32) {
    %c0_i32 = arith.constant 0 : i32
    %c0_i32_0 = arith.constant 0 : i32
    %c0_i32_1 = arith.constant 0 : i32
    return %c0_i32, %c0_i32_0 : i32, i32
  }
  func.func @transform_2(%arg0: i32) -> (i32, i32) {
    %c0_i32 = arith.constant 0 : i32
    %c0_i32_0 = arith.constant 0 : i32
    %c0_i32_1 = arith.constant 0 : i32
    return %c0_i32, %c0_i32_0 : i32, i32
  }
  func.func @transform_3(%arg0: i32) -> (i32, i32) {
    %c0_i32 = arith.constant 0 : i32
    %c0_i32_0 = arith.constant 0 : i32
    %c0_i32_1 = arith.constant 0 : i32
    return %c0_i32, %c0_i32_0 : i32, i32
  }
  func.func @transform_4(%arg0: i32) -> (i32, i32) {
    %c0_i32 = arith.constant 0 : i32
    %c0_i32_0 = arith.constant 0 : i32
    %c0_i32_1 = arith.constant 0 : i32
    return %c0_i32, %c0_i32_0 : i32, i32
  }
  func.func @transform_5(%arg0: i32) -> (i32, i32) {
    %c0_i32 = arith.constant 0 : i32
    %c0_i32_0 = arith.constant 0 : i32
    %c0_i32_1 = arith.constant 0 : i32
    return %c0_i32, %c0_i32_0 : i32, i32
  }
  func.func @transform_6(%arg0: i32) -> (i32, i32) {
    %c0_i32 = arith.constant 0 : i32
    %c0_i32_0 = arith.constant 0 : i32
    %c0_i32_1 = arith.constant 0 : i32
    return %c0_i32, %c0_i32_0 : i32, i32
  }
  func.func @transform_7(%arg0: i32) -> (i32, i32) {
    %c0_i32 = arith.constant 0 : i32
    %c0_i32_0 = arith.constant 0 : i32
    %c0_i32_1 = arith.constant 0 : i32
    return %c0_i32, %c0_i32_0 : i32, i32
  }
  func.func @transform_8(%arg0: i32) -> (i32, i32) {
    %c0_i32 = arith.constant 0 : i32
    %c0_i32_0 = arith.constant 0 : i32
    %c0_i32_1 = arith.constant 0 : i32
    return %c0_i32, %c0_i32_0 : i32, i32
  }
  func.func @transform_9(%arg0: i32) -> (i32, i32) {
    %c0_i32 = arith.constant 0 : i32
    %c0_i32_0 = arith.constant 0 : i32
    %c0_i32_1 = arith.constant 0 : i32
    return %c0_i32, %c0_i32_0 : i32, i32
  }
  func.func @transform_10(%arg0: i32) -> (i32, i32) {
    %c0_i32 = arith.constant 0 : i32
    %c0_i32_0 = arith.constant 0 : i32
    %c0_i32_1 = arith.constant 0 : i32
    return %c0_i32, %c0_i32_0 : i32, i32
  }
  func.func @transform_11(%arg0: i32) -> (i32, i32) {
    %c0_i32 = arith.constant 0 : i32
    %c0_i32_0 = arith.constant 0 : i32
    %c0_i32_1 = arith.constant 0 : i32
    return %c0_i32, %c0_i32_0 : i32, i32
  }
  func.func @transform_12(%arg0: i32) -> (i32, i32) {
    %c0_i32 = arith.constant 0 : i32
    %c0_i32_0 = arith.constant 0 : i32
    %c0_i32_1 = arith.constant 0 : i32
    return %c0_i32, %c0_i32_0 : i32, i32
  }
  func.func @transform_13(%arg0: i32) -> (i32, i32) {
    %c0_i32 = arith.constant 0 : i32
    %c0_i32_0 = arith.constant 0 : i32
    %c0_i32_1 = arith.constant 0 : i32
    return %c0_i32, %c0_i32_0 : i32, i32
  }
  func.func @transform_14(%arg0: i32) -> (i32, i32) {
    %c0_i32 = arith.constant 0 : i32
    %c0_i32_0 = arith.constant 0 : i32
    %c0_i32_1 = arith.constant 0 : i32
    return %c0_i32, %c0_i32_0 : i32, i32
  }
  func.func @transform_15(%arg0: i32) -> (i32, i32) {
    %c0_i32 = arith.constant 0 : i32
    %c0_i32_0 = arith.constant 0 : i32
    %c0_i32_1 = arith.constant 0 : i32
    return %c0_i32, %c0_i32_0 : i32, i32
  }
  func.func @transform_16(%arg0: i32) -> (i32, i32) {
    %c0_i32 = arith.constant 0 : i32
    %c0_i32_0 = arith.constant 0 : i32
    %c0_i32_1 = arith.constant 0 : i32
    return %c0_i32, %c0_i32_0 : i32, i32
  }
  func.func @transform_17(%arg0: i32) -> (i32, i32) {
    %c0_i32 = arith.constant 0 : i32
    %c0_i32_0 = arith.constant 0 : i32
    %c0_i32_1 = arith.constant 0 : i32
    return %c0_i32, %c0_i32_0 : i32, i32
  }
  func.func @transform_18(%arg0: i32) -> (i32, i32) {
    %c0_i32 = arith.constant 0 : i32
    %c0_i32_0 = arith.constant 0 : i32
    %c0_i32_1 = arith.constant 0 : i32
    return %c0_i32, %c0_i32_0 : i32, i32
  }
}

</mosaic_0001>

<bundles_post_ra>
// kernel: tile.69
= control target key start
LH: loop header
LB: loop body
LE: loop exit
PB: predicated region body
PF: predicated region fallthrough
CT: control target
= control target key end

     0   :  { %vm7_vm0 = vcmask 130048   ;;  %s37_s8 = smov 16   ;;  %s38_s9 = smov 32   ;;  %vm13_vm1 = vcmask 523648   ;;  %vm19_vm2 = vcmask 392448   ;;  %vm25_vm3 = vcmask 261248   ;;  %s55_s0 = inlined_call_operand.vmem [shape: f32[4,16], index: 0, kind: input, shape index: {}]   ;;  %s56_s1 = inlined_call_operand.vmem [shape: f32[1,64], index: 1, kind: output, shape index: {}]  }
   0x1   :  { %v4_v0 = vld [vmem:[%s55_s0] sm:$0xf]  ;;  %s36_s0 = smov 48  }
   0x2   :  { %5 = vst [vmem:[#allocation1] sm:$0xf] %v4_v0 }
   0x9   :  { %v10_v1 = vld [vmem:[#allocation1 + $0x3] sm:$0x1]   ;;  %v22_v2 = vld [vmem:[#allocation1 + $0x1] sm:$0x1]   ;;  %v6_v3 = vld [vmem:[#allocation1] sm:$0x1]  }
   0xa   :  { %11 = vrot.lane.b32.xlu0 %v10_v1, %s36_s0  ;;  %23 = vrot.lane.b32.xlu1 %v22_v2, %s37_s8  ;;  %v16_v4 = vld [vmem:[#allocation1 + $0x2] sm:$0x1]   ;;  %8 = vst.msk [vmem:[#allocation0] sm:$0x1] %vm7_vm0, %v6_v3  }
   0xe   :  { %17 = vrot.lane.b32.xlu0 %v16_v4, %s38_s9 }
  0x7c   :  { %v12_v5 = vpop.permute.xlu0 %11   ;;  %v24_v6 = vpop.permute.xlu1 %23  }
  0x7d   :  { %14 = vst.msk [vmem:[#allocation0] sm:$0x1] %vm13_vm1, %v12_v5  }
  0x80   :  { %v18_v7 = vpop.permute.xlu0 %17  }
  0x81   :  { %20 = vst.msk [vmem:[#allocation0] sm:$0x1] %vm19_vm2, %v18_v7  }
  0x82   :  { %26 = vst.msk [vmem:[#allocation0] sm:$0x1] %vm25_vm3, %v24_v6  }
  0x89   :  { %v30_v8 = vld [vmem:[#allocation0] sm:$0x1] }
  0x8a   :  { %32 = vst [vmem:[%s56_s1] sm:$0x1] %v30_v8 }

// kernel: tile.68
= control target key start
LH: loop header
LB: loop body
LE: loop exit
PB: predicated region body
PF: predicated region fallthrough
CT: control target
= control target key end

     0   :  { %s22_s0 = inlined_call_operand.vmem [shape: f32[16], index: 0, kind: input, shape index: {}]   ;;  %s23_s1 = inlined_call_operand.vmem [shape: f32[4,16], index: 1, kind: output, shape index: {}]  }
   0x1   :  { %v4_v0 = vld [vmem:[%s22_s0] ss:$0 sm:$0xff] }
   0x2   :  { %5 = vst [vmem:[%s23_s1] sm:$0xf] %v4_v0 }

// kernel: tile.79
= control target key start
LH: loop header
LB: loop body
LE: loop exit
PB: predicated region body
PF: predicated region fallthrough
CT: control target
= control target key end

     0   :  { %s131_s10 = smov 120   ;;  %s132_s11 = smov 104   ;;  %vm3_vm0 = vcmask 64512   ;;  %vm9_vm1 = vcmask 1048512   ;;  %vm15_vm2 = vcmask 982912   ;;  %vm21_vm3 = vcmask 917312   ;;  %s207_s0 = inlined_call_operand.vmem [shape: f32[16,8], index: 0, kind: input, shape index: {}]   ;;  %s208_s1 = inlined_call_operand.vmem [shape: f32[1,128], index: 1, kind: output, shape index: {}]  }
   0x1   :  { %v101_v0 = vld [vmem:[%s207_s0 + $0xf] sm:$0x1]   ;;  %v103_v1 = vld [vmem:[%s207_s0 + $0xd] sm:$0x1]   ;;  %v102_v2 = vld [vmem:[%s207_s0 + $0xe] sm:$0x1]  }
   0x2   :  { %7 = vrot.lane.b32.xlu0 %v101_v0, %s131_s10  ;;  %19 = vrot.lane.b32.xlu1 %v103_v1, %s132_s11  ;;  %v104_v3 = vld [vmem:[%s207_s0 + $0xc] sm:$0x1]   ;;  %s133_s16 = smov 112   ;;  %s134_s17 = smov 96   ;;  %v105_v4 = vld [vmem:[%s207_s0 + $0xb] sm:$0x1]  }
   0x3   :  { %v106_v5 = vld [vmem:[%s207_s0 + $0xa] sm:$0x1]   ;;  %v2_v6 = vld [vmem:[%s207_s0] sm:$0x1]   ;;  %s135_s24 = smov 88   ;;  %s136_s25 = smov 80  }
   0x4   :  { %4 = vst.msk [vmem:[#allocation0] sm:$0x1] %vm3_vm0, %v2_v6   ;;  %v107_v7 = vld [vmem:[%s207_s0 + $0x9] sm:$0x1]   ;;  %v108_v8 = vld [vmem:[%s207_s0 + $0x8] sm:$0x1]  }
   0x5   :  { %s137_s30 = smov 72   ;;  %s138_s2 = smov 64   ;;  %v109_v9 = vld [vmem:[%s207_s0 + $0x7] sm:$0x1]   ;;  %v110_v10 = vld [vmem:[%s207_s0 + $0x6] sm:$0x1]  }
   0x6   :  { %13 = vrot.lane.b32.xlu0 %v102_v2, %s133_s16  ;;  %25 = vrot.lane.b32.xlu1 %v104_v3, %s134_s17  ;;  %s139_s7 = smov 56   ;;  %s140_s8 = smov 48   ;;  %v111_v11 = vld [vmem:[%s207_s0 + $0x5] sm:$0x1]   ;;  %v112_v12 = vld [vmem:[%s207_s0 + $0x4] sm:$0x1]  }
   0x7   :  { %s141_s13 = smov 40   ;;  %s142_s14 = smov 32   ;;  %v113_v13 = vld [vmem:[%s207_s0 + $0x3] sm:$0x1]   ;;  %v114_v14 = vld [vmem:[%s207_s0 + $0x2] sm:$0x1]  }
   0x8   :  { %s143_s19 = smov 24   ;;  %s144_s20 = smov 16   ;;  %v115_v15 = vld [vmem:[%s207_s0 + $0x1] sm:$0x1]   ;;  %vm27_vm4 = vcmask 851712   ;;  %vm33_vm5 = vcmask 786112  }
   0x9   :  { %s145_s0 = smov 8   ;;  %vm39_vm6 = vcmask 720512   ;;  %vm45_vm7 = vcmask 654912   ;;  %vm51_vm8 = vcmask 589312   ;;  %vm57_vm9 = vcmask 523712  }
   0xa   :  { %31 = vrot.lane.b32.xlu0 %v105_v4, %s135_s24  ;;  %37 = vrot.lane.b32.xlu1 %v106_v5, %s136_s25  ;;  %vm63_vm10 = vcmask 458112   ;;  %vm69_vm11 = vcmask 392512   ;;  %vm75_vm12 = vcmask 326912   ;;  %vm81_vm13 = vcmask 261312  }
   0xb   :  { %vm87_vm14 = vcmask 195712   ;;  %vm93_vm15 = vcmask 130112  }
   0xe   :  { %43 = vrot.lane.b32.xlu0 %v107_v7, %s137_s30  ;;  %49 = vrot.lane.b32.xlu1 %v108_v8, %s138_s2 }
  0x12   :  { %55 = vrot.lane.b32.xlu0 %v109_v9, %s139_s7  ;;  %61 = vrot.lane.b32.xlu1 %v110_v10, %s140_s8 }
  0x16   :  { %67 = vrot.lane.b32.xlu0 %v111_v11, %s141_s13  ;;  %73 = vrot.lane.b32.xlu1 %v112_v12, %s142_s14 }
  0x1a   :  { %79 = vrot.lane.b32.xlu0 %v113_v13, %s143_s19  ;;  %85 = vrot.lane.b32.xlu1 %v114_v14, %s144_s20 }
  0x1e   :  { %91 = vrot.lane.b32.xlu0 %v115_v15, %s145_s0 }
  0x74   :  { %v8_v16 = vpop.permute.xlu0 %7   ;;  %v20_v17 = vpop.permute.xlu1 %19  }
  0x75   :  { %10 = vst.msk [vmem:[#allocation0] sm:$0x1] %vm9_vm1, %v8_v16  }
  0x78   :  { %v14_v18 = vpop.permute.xlu0 %13   ;;  %v26_v19 = vpop.permute.xlu1 %25  }
  0x79   :  { %16 = vst.msk [vmem:[#allocation0] sm:$0x1] %vm15_vm2, %v14_v18  }
  0x7a   :  { %22 = vst.msk [vmem:[#allocation0] sm:$0x1] %vm21_vm3, %v20_v17  }
  0x7b   :  { %28 = vst.msk [vmem:[#allocation0] sm:$0x1] %vm27_vm4, %v26_v19  }
  0x7c   :  { %v32_v20 = vpop.permute.xlu0 %31   ;;  %v38_v21 = vpop.permute.xlu1 %37  }
  0x7d   :  { %34 = vst.msk [vmem:[#allocation0] sm:$0x1] %vm33_vm5, %v32_v20  }
  0x7e   :  { %40 = vst.msk [vmem:[#allocation0] sm:$0x1] %vm39_vm6, %v38_v21  }
  0x80   :  { %v44_v22 = vpop.permute.xlu0 %43   ;;  %v50_v23 = vpop.permute.xlu1 %49  }
  0x81   :  { %46 = vst.msk [vmem:[#allocation0] sm:$0x1] %vm45_vm7, %v44_v22  }
  0x82   :  { %52 = vst.msk [vmem:[#allocation0] sm:$0x1] %vm51_vm8, %v50_v23  }
  0x84   :  { %v56_v24 = vpop.permute.xlu0 %55   ;;  %v62_v25 = vpop.permute.xlu1 %61  }
  0x85   :  { %58 = vst.msk [vmem:[#allocation0] sm:$0x1] %vm57_vm9, %v56_v24  }
  0x86   :  { %64 = vst.msk [vmem:[#allocation0] sm:$0x1] %vm63_vm10, %v62_v25  }
  0x88   :  { %v68_v26 = vpop.permute.xlu0 %67   ;;  %v74_v27 = vpop.permute.xlu1 %73  }
  0x89   :  { %70 = vst.msk [vmem:[#allocation0] sm:$0x1] %vm69_vm11, %v68_v26  }
  0x8a   :  { %76 = vst.msk [vmem:[#allocation0] sm:$0x1] %vm75_vm12, %v74_v27  }
  0x8c   :  { %v80_v28 = vpop.permute.xlu0 %79   ;;  %v86_v29 = vpop.permute.xlu1 %85  }
  0x8d   :  { %82 = vst.msk [vmem:[#allocation0] sm:$0x1] %vm81_vm13, %v80_v28  }
  0x8e   :  { %88 = vst.msk [vmem:[#allocation0] sm:$0x1] %vm87_vm14, %v86_v29  }
  0x90   :  { %v92_v30 = vpop.permute.xlu0 %91  }
  0x91   :  { %94 = vst.msk [vmem:[#allocation0] sm:$0x1] %vm93_vm15, %v92_v30  }
  0x98   :  { %v98_v31 = vld [vmem:[#allocation0] sm:$0x1] }
  0x99   :  { %100 = vst [vmem:[%s208_s1] sm:$0x1] %v98_v31 }

// kernel: tile.78
= control target key start
LH: loop header
LB: loop body
LE: loop exit
PB: predicated region body
PF: predicated region fallthrough
CT: control target
= control target key end

     0   :  { %s28_s0 = inlined_call_operand.vmem [shape: f32[8], index: 0, kind: input, shape index: {}]   ;;  %s29_s1 = inlined_call_operand.vmem [shape: f32[16,8], index: 1, kind: output, shape index: {}]  }
   0x1   :  { %v4_v0 = vld [vmem:[%s28_s0] ss:$0 sm:$0xff] }
   0x2   :  { %5 = vst [vmem:[%s29_s1] sm:$0xff] %v4_v0  ;;  %8 = vst [vmem:[%s29_s1 + $0x8] sm:$0xff] %v4_v0 }

// kernel: tile.88
= control target key start
LH: loop header
LB: loop body
LE: loop exit
PB: predicated region body
PF: predicated region fallthrough
CT: control target
= control target key end

     0   :  { %s64_s0 = inlined_call_operand.vmem [shape: f32[4], index: 0, kind: input, shape index: {}]   ;;  %s65_s1 = inlined_call_operand.vmem [shape: f32[64,4], index: 1, kind: output, shape index: {}]  }
   0x1   :  { %v4_v0 = vld [vmem:[%s64_s0] ss:$0 sm:$0xff] }
   0x2   :  { %5 = vst [vmem:[%s65_s1] sm:$0xff] %v4_v0  ;;  %20 = vst [vmem:[%s65_s1 + $0x8] sm:$0xff] %v4_v0 }
   0x3   :  { %21 = vst [vmem:[%s65_s1 + $0x10] sm:$0xff] %v4_v0  ;;  %22 = vst [vmem:[%s65_s1 + $0x18] sm:$0xff] %v4_v0 }
   0x4   :  { %23 = vst [vmem:[%s65_s1 + $0x20] sm:$0xff] %v4_v0  ;;  %24 = vst [vmem:[%s65_s1 + $0x28] sm:$0xff] %v4_v0 }
   0x5   :  { %25 = vst [vmem:[%s65_s1 + $0x30] sm:$0xff] %v4_v0  ;;  %26 = vst [vmem:[%s65_s1 + $0x38] sm:$0xff] %v4_v0 }

// kernel: tile.89
= control target key start
LH: loop header
LB: loop body
LE: loop exit
PB: predicated region body
PF: predicated region fallthrough
CT: control target
= control target key end

     0   :  { %vm5_vm0 = vcmask 1041409   ;;  %s425_s14 = smov 124   ;;  %s426_s21 = smov 116   ;;  %vm7_vm1 = vcmask 31744   ;;  %vm17_vm2 = vcmask 1048544   ;;  %vm27_vm3 = vcmask 1015744   ;;  %s696_s0 = inlined_call_operand.vmem [shape: f32[64,4], index: 0, kind: input, shape index: {}]   ;;  %s697_s1 = inlined_call_operand.vmem [shape: f32[1,256], index: 1, kind: output, shape index: {}]  }
   0x1   :  { %v331_v0 = vld [vmem:[%s696_s0 + $0x1f] sm:$0x1]   ;;  %v335_v3 = vld [vmem:[%s696_s0 + $0x1d] sm:$0x1]   ;;  %v333_v6 = vld [vmem:[%s696_s0 + $0x1e] sm:$0x1]  }
   0x2   :  { %v332_v1 = vld [vmem:[%s696_s0 + $0x3e] sm:$0x2]   ;;  %v336_v4 = vld [vmem:[%s696_s0 + $0x3c] sm:$0x2]   ;;  %v334_v7 = vld [vmem:[%s696_s0 + $0x3d] sm:$0x2]  }
   0x3   :  { %v14_v2 = vsel %vm5_vm0, %v332_v1, %v331_v0  ;;  %v34_v5 = vsel %vm5_vm0, %v336_v4, %v335_v3  ;;  %v337_v8 = vld [vmem:[%s696_s0 + $0x1c] sm:$0x1]   ;;  %v24_v9 = vsel %vm5_vm0, %v334_v7, %v333_v6  ;;  %v339_v12 = vld [vmem:[%s696_s0 + $0x1b] sm:$0x1]   ;;  %v341_v14 = vld [vmem:[%s696_s0 + $0x1a] sm:$0x1]  }
   0x4   :  { %15 = vrot.lane.b32.xlu0 %v14_v2, %s425_s14  ;;  %35 = vrot.lane.b32.xlu1 %v34_v5, %s426_s21  ;;  %v338_v10 = vld [vmem:[%s696_s0 + $0x3b] sm:$0x2]   ;;  %v340_v13 = vld [vmem:[%s696_s0 + $0x3a] sm:$0x2]   ;;  %s427_s3 = smov 120   ;;  %s428_s4 = smov 112  }
   0x5   :  { %v44_v11 = vsel %vm5_vm0, %v338_v10, %v337_v8  ;;  %v342_v15 = vld [vmem:[%s696_s0 + $0x39] sm:$0x2]   ;;  %v54_v16 = vsel %vm5_vm0, %v340_v13, %v339_v12  ;;  %v343_v18 = vld [vmem:[%s696_s0 + $0x19] sm:$0x1]   ;;  %v345_v20 = vld [vmem:[%s696_s0 + $0x18] sm:$0x1]  }
   0x6   :  { %v64_v17 = vsel %vm5_vm0, %v342_v15, %v341_v14  ;;  %v344_v19 = vld [vmem:[%s696_s0 + $0x38] sm:$0x2]   ;;  %v346_v21 = vld [vmem:[%s696_s0 + $0x37] sm:$0x2]   ;;  %s429_s13 = smov 108   ;;  %s430_s14 = smov 104  }
   0x7   :  { %v74_v22 = vsel %vm5_vm0, %v344_v19, %v343_v18  ;;  %v84_v23 = vsel %vm5_vm0, %v346_v21, %v345_v20  ;;  %v347_v24 = vld [vmem:[%s696_s0 + $0x17] sm:$0x1]   ;;  %v349_v26 = vld [vmem:[%s696_s0 + $0x16] sm:$0x1]   ;;  %s431_s23 = smov 100   ;;  %s432_s24 = smov 96  }
   0x8   :  { %25 = vrot.lane.b32.xlu0 %v24_v9, %s427_s3  ;;  %45 = vrot.lane.b32.xlu1 %v44_v11, %s428_s4  ;;  %v348_v25 = vld [vmem:[%s696_s0 + $0x36] sm:$0x2]   ;;  %v350_v27 = vld [vmem:[%s696_s0 + $0x35] sm:$0x2]   ;;  %s433_s4 = smov 92   ;;  %s434_s5 = smov 88  }
   0x9   :  { %v94_v28 = vsel %vm5_vm0, %v348_v25, %v347_v24  ;;  %v104_v29 = vsel %vm5_vm0, %v350_v27, %v349_v26  ;;  %v351_v30 = vld [vmem:[%s696_s0 + $0x15] sm:$0x1]   ;;  %v353_v32 = vld [vmem:[%s696_s0 + $0x14] sm:$0x1]   ;;  %v355_v36 = vld [vmem:[%s696_s0 + $0x13] sm:$0x1]  }
   0xa   :  { %v352_v31 = vld [vmem:[%s696_s0 + $0x34] sm:$0x2]   ;;  %v354_v33 = vld [vmem:[%s696_s0 + $0x33] sm:$0x2]   ;;  %v356_v37 = vld [vmem:[%s696_s0 + $0x32] sm:$0x2]  }
   0xb   :  { %v114_v34 = vsel %vm5_vm0, %v352_v31, %v351_v30  ;;  %v124_v35 = vsel %vm5_vm0, %v354_v33, %v353_v32  ;;  %v357_v38 = vld [vmem:[%s696_s0 + $0x12] sm:$0x1]   ;;  %s436_s15 = smov 80   ;;  %v134_v40 = vsel %vm5_vm0, %v356_v37, %v355_v36  ;;  %v359_v42 = vld [vmem:[%s696_s0 + $0x11] sm:$0x1]   ;;  %s438_s29 = smov 72  }
   0xc   :  { %55 = vrot.lane.b32.xlu0 %v54_v16, %s429_s13  ;;  %65 = vrot.lane.b32.xlu1 %v64_v17, %s430_s14  ;;  %v358_v39 = vld [vmem:[%s696_s0 + $0x31] sm:$0x2]   ;;  %s435_s14 = smov 84   ;;  %v360_v43 = vld [vmem:[%s696_s0 + $0x30] sm:$0x2]   ;;  %s439_s9 = smov 68  }
   0xd   :  { %v144_v41 = vsel %vm5_vm0, %v358_v39, %v357_v38  ;;  %v361_v44 = vld [vmem:[%s696_s0 + $0x10] sm:$0x1]   ;;  %v2_v46 = vld [vmem:[%s696_s0] sm:$0x1]   ;;  %v154_v48 = vsel %vm5_vm0, %v360_v43, %v359_v42  ;;  %v363_v51 = vld [vmem:[%s696_s0 + $0xf] sm:$0x1]  }
   0xe   :  { %v362_v45 = vld [vmem:[%s696_s0 + $0x2f] sm:$0x2]   ;;  %v330_v47 = vld [vmem:[%s696_s0 + $0x1f] sm:$0x2]   ;;  %v364_v52 = vld [vmem:[%s696_s0 + $0x2e] sm:$0x2]  }
   0xf   :  { %v6_v49 = vsel %vm5_vm0, %v330_v47, %v2_v46  ;;  %v164_v50 = vsel %vm5_vm0, %v362_v45, %v361_v44  ;;  %v365_v53 = vld [vmem:[%s696_s0 + $0xe] sm:$0x1]   ;;  %s440_s10 = smov 64   ;;  %v174_v55 = vsel %vm5_vm0, %v364_v52, %v363_v51  ;;  %v367_v57 = vld [vmem:[%s696_s0 + $0xd] sm:$0x1]   ;;  %s441_s19 = smov 60  }
  0x10   :  { %75 = vrot.lane.b32.xlu0 %v74_v22, %s431_s23  ;;  %85 = vrot.lane.b32.xlu1 %v84_v23, %s432_s24  ;;  %s437_s24 = smov 76   ;;  %8 = vst.msk [vmem:[#allocation0] ss:$8 sm:$0x3] %vm7_vm1, %v6_v49   ;;  %v366_v54 = vld [vmem:[%s696_s0 + $0x2d] sm:$0x2]  }
  0x11   :  { %v184_v56 = vsel %vm5_vm0, %v366_v54, %v365_v53  ;;  %v368_v58 = vld [vmem:[%s696_s0 + $0x2c] sm:$0x2]   ;;  %v369_v59 = vld [vmem:[%s696_s0 + $0xc] sm:$0x1]   ;;  %s442_s20 = smov 56   ;;  %s444_s30 = smov 48  }
  0x12   :  { %v370_v60 = vld [vmem:[%s696_s0 + $0x2b] sm:$0x2]   ;;  %v194_v61 = vsel %vm5_vm0, %v368_v58, %v367_v57  ;;  %v371_v63 = vld [vmem:[%s696_s0 + $0xb] sm:$0x1]   ;;  %v373_v1 = vld [vmem:[%s696_s0 + $0xa] sm:$0x1]  }
  0x13   :  { %v204_v62 = vsel %vm5_vm0, %v370_v60, %v369_v59  ;;  %v372_v0 = vld [vmem:[%s696_s0 + $0x2a] sm:$0x2]   ;;  %v374_v2 = vld [vmem:[%s696_s0 + $0x29] sm:$0x2]   ;;  %v375_v5 = vld [vmem:[%s696_s0 + $0x9] sm:$0x1]  }
  0x14   :  { %95 = vrot.lane.b32.xlu0 %v94_v28, %s433_s4  ;;  %105 = vrot.lane.b32.xlu1 %v104_v29, %s434_s5  ;;  %v214_v3 = vsel %vm5_vm0, %v372_v0, %v371_v63  ;;  %v224_v4 = vsel %vm5_vm0, %v374_v2, %v373_v1  ;;  %v376_v6 = vld [vmem:[%s696_s0 + $0x28] sm:$0x2]   ;;  %v377_v7 = vld [vmem:[%s696_s0 + $0x8] sm:$0x1]   ;;  %s446_s11 = smov 40   ;;  %s448_s21 = smov 32  }
  0x15   :  { %v378_v8 = vld [vmem:[%s696_s0 + $0x27] sm:$0x2]   ;;  %v234_v9 = vsel %vm5_vm0, %v376_v6, %v375_v5  ;;  %v379_v11 = vld [vmem:[%s696_s0 + $0x7] sm:$0x1]   ;;  %v381_v13 = vld [vmem:[%s696_s0 + $0x6] sm:$0x1]  }
  0x16   :  { %v244_v10 = vsel %vm5_vm0, %v378_v8, %v377_v7  ;;  %v380_v12 = vld [vmem:[%s696_s0 + $0x26] sm:$0x2]   ;;  %v382_v14 = vld [vmem:[%s696_s0 + $0x25] sm:$0x2]   ;;  %v383_v17 = vld [vmem:[%s696_s0 + $0x5] sm:$0x1]  }
  0x17   :  { %v254_v15 = vsel %vm5_vm0, %v380_v12, %v379_v11  ;;  %v264_v16 = vsel %vm5_vm0, %v382_v14, %v381_v13  ;;  %v384_v18 = vld [vmem:[%s696_s0 + $0x24] sm:$0x2]   ;;  %v385_v19 = vld [vmem:[%s696_s0 + $0x4] sm:$0x1]   ;;  %s450_s2 = smov 24   ;;  %s452_s12 = smov 16  }
  0x18   :  { %115 = vrot.lane.b32.xlu0 %v114_v34, %s435_s14  ;;  %125 = vrot.lane.b32.xlu1 %v124_v35, %s436_s15  ;;  %v386_v20 = vld [vmem:[%s696_s0 + $0x23] sm:$0x2]   ;;  %v274_v21 = vsel %vm5_vm0, %v384_v18, %v383_v17  ;;  %v387_v23 = vld [vmem:[%s696_s0 + $0x3] sm:$0x1]   ;;  %s454_s17 = smov 8   ;;  %s455_s18 = smov 4  }
  0x19   :  { %v284_v22 = vsel %vm5_vm0, %v386_v20, %v385_v19  ;;  %v388_v24 = vld [vmem:[%s696_s0 + $0x22] sm:$0x2]   ;;  %v389_v25 = vld [vmem:[%s696_s0 + $0x2] sm:$0x1]   ;;  %v391_v29 = vld [vmem:[%s696_s0 + $0x1] sm:$0x1]  }
  0x1a   :  { %v390_v26 = vld [vmem:[%s696_s0 + $0x21] sm:$0x2]   ;;  %v294_v27 = vsel %vm5_vm0, %v388_v24, %v387_v23  ;;  %v392_v30 = vld [vmem:[%s696_s0 + $0x20] sm:$0x2]   ;;  %s453_s0 = smov 12   ;;  %vm37_vm4 = vcmask 982944  }
  0x1b   :  { %v304_v28 = vsel %vm5_vm0, %v390_v26, %v389_v25  ;;  %v314_v31 = vsel %vm5_vm0, %v392_v30, %v391_v29  ;;  %vm47_vm5 = vcmask 950144   ;;  %vm57_vm6 = vcmask 917344  }
  0x1c   :  { %135 = vrot.lane.b32.xlu0 %v134_v40, %s437_s24  ;;  %145 = vrot.lane.b32.xlu1 %v144_v41, %s438_s29  ;;  %s443_s29 = smov 52   ;;  %vm67_vm7 = vcmask 884544   ;;  %vm77_vm8 = vcmask 851744   ;;  %vm87_vm9 = vcmask 818944   ;;  %vm97_vm10 = vcmask 786144  }
  0x1d   :  { %vm107_vm11 = vcmask 753344   ;;  %vm117_vm12 = vcmask 720544   ;;  %vm127_vm13 = vcmask 687744   ;;  %vm137_vm14 = vcmask 654944  }
  0x1e   :  { %vm147_vm15 = vcmask 622144   ;;  %vm157_vm0 = vcmask 589344   ;;  %vm167_vm1 = vcmask 556544  }
  0x20   :  { %155 = vrot.lane.b32.xlu0 %v154_v48, %s439_s9  ;;  %165 = vrot.lane.b32.xlu1 %v164_v50, %s440_s10  ;;  %s445_s10 = smov 44  }
  0x24   :  { %175 = vrot.lane.b32.xlu0 %v174_v55, %s441_s19  ;;  %185 = vrot.lane.b32.xlu1 %v184_v56, %s442_s20  ;;  %s447_s20 = smov 36  }
  0x28   :  { %195 = vrot.lane.b32.xlu0 %v194_v61, %s443_s29  ;;  %205 = vrot.lane.b32.xlu1 %v204_v62, %s444_s30  ;;  %s449_s30 = smov 28  }
  0x2c   :  { %215 = vrot.lane.b32.xlu0 %v214_v3, %s445_s10  ;;  %225 = vrot.lane.b32.xlu1 %v224_v4, %s446_s11  ;;  %s451_s11 = smov 20  }
  0x30   :  { %235 = vrot.lane.b32.xlu0 %v234_v9, %s447_s20  ;;  %245 = vrot.lane.b32.xlu1 %v244_v10, %s448_s21 }
  0x34   :  { %255 = vrot.lane.b32.xlu0 %v254_v15, %s449_s30  ;;  %265 = vrot.lane.b32.xlu1 %v264_v16, %s450_s2 }
  0x38   :  { %275 = vrot.lane.b32.xlu0 %v274_v21, %s451_s11  ;;  %285 = vrot.lane.b32.xlu1 %v284_v22, %s452_s12 }
  0x3c   :  { %295 = vrot.lane.b32.xlu0 %v294_v27, %s453_s0  ;;  %305 = vrot.lane.b32.xlu1 %v304_v28, %s454_s17 }
  0x40   :  { %315 = vrot.lane.b32.xlu0 %v314_v31, %s455_s18 }
  0x76   :  { %v16_v32 = vpop.permute.xlu0 %15   ;;  %v36_v33 = vpop.permute.xlu1 %35  }
  0x77   :  { %18 = vst.msk [vmem:[#allocation0] ss:$8 sm:$0x3] %vm17_vm2, %v16_v32   ;;  %vm177_vm2 = vcmask 523744  }
  0x7a   :  { %v26_v34 = vpop.permute.xlu0 %25   ;;  %v46_v35 = vpop.permute.xlu1 %45  }
  0x7b   :  { %28 = vst.msk [vmem:[#allocation0] ss:$8 sm:$0x3] %vm27_vm3, %v26_v34   ;;  %vm187_vm3 = vcmask 490944  }
  0x7c   :  { %38 = vst.msk [vmem:[#allocation0] ss:$8 sm:$0x3] %vm37_vm4, %v36_v33   ;;  %vm197_vm4 = vcmask 458144  }
  0x7d   :  { %48 = vst.msk [vmem:[#allocation0] ss:$8 sm:$0x3] %vm47_vm5, %v46_v35   ;;  %vm207_vm5 = vcmask 425344  }
  0x7e   :  { %v56_v36 = vpop.permute.xlu0 %55   ;;  %v66_v37 = vpop.permute.xlu1 %65  }
  0x7f   :  { %58 = vst.msk [vmem:[#allocation0] ss:$8 sm:$0x3] %vm57_vm6, %v56_v36   ;;  %vm217_vm6 = vcmask 392544  }
  0x80   :  { %68 = vst.msk [vmem:[#allocation0] ss:$8 sm:$0x3] %vm67_vm7, %v66_v37   ;;  %vm227_vm7 = vcmask 359744  }
  0x82   :  { %v76_v38 = vpop.permute.xlu0 %75   ;;  %v86_v39 = vpop.permute.xlu1 %85  }
  0x83   :  { %78 = vst.msk [vmem:[#allocation0] ss:$8 sm:$0x3] %vm77_vm8, %v76_v38   ;;  %vm237_vm8 = vcmask 326944  }
  0x84   :  { %88 = vst.msk [vmem:[#allocation0] ss:$8 sm:$0x3] %vm87_vm9, %v86_v39   ;;  %vm247_vm9 = vcmask 294144  }
  0x86   :  { %v96_v40 = vpop.permute.xlu0 %95   ;;  %v106_v41 = vpop.permute.xlu1 %105  }
  0x87   :  { %98 = vst.msk [vmem:[#allocation0] ss:$8 sm:$0x3] %vm97_vm10, %v96_v40   ;;  %vm257_vm10 = vcmask 261344  }
  0x88   :  { %108 = vst.msk [vmem:[#allocation0] ss:$8 sm:$0x3] %vm107_vm11, %v106_v41   ;;  %vm267_vm11 = vcmask 228544  }
  0x8a   :  { %v116_v42 = vpop.permute.xlu0 %115   ;;  %v126_v43 = vpop.permute.xlu1 %125  }
  0x8b   :  { %118 = vst.msk [vmem:[#allocation0] ss:$8 sm:$0x3] %vm117_vm12, %v116_v42   ;;  %vm277_vm12 = vcmask 195744  }
  0x8c   :  { %128 = vst.msk [vmem:[#allocation0] ss:$8 sm:$0x3] %vm127_vm13, %v126_v43   ;;  %vm287_vm13 = vcmask 162944  }
  0x8e   :  { %v136_v44 = vpop.permute.xlu0 %135   ;;  %v146_v45 = vpop.permute.xlu1 %145  }
  0x8f   :  { %138 = vst.msk [vmem:[#allocation0] ss:$8 sm:$0x3] %vm137_vm14, %v136_v44   ;;  %vm297_vm14 = vcmask 130144  }
  0x90   :  { %148 = vst.msk [vmem:[#allocation0] ss:$8 sm:$0x3] %vm147_vm15, %v146_v45   ;;  %vm307_vm15 = vcmask 97344  }
  0x92   :  { %v156_v46 = vpop.permute.xlu0 %155   ;;  %v166_v47 = vpop.permute.xlu1 %165  }
  0x93   :  { %158 = vst.msk [vmem:[#allocation0] ss:$8 sm:$0x3] %vm157_vm0, %v156_v46   ;;  %vm317_vm0 = vcmask 64544  }
  0x94   :  { %168 = vst.msk [vmem:[#allocation0] ss:$8 sm:$0x3] %vm167_vm1, %v166_v47  }
  0x96   :  { %v176_v48 = vpop.permute.xlu0 %175   ;;  %v186_v49 = vpop.permute.xlu1 %185  }
  0x97   :  { %178 = vst.msk [vmem:[#allocation0] ss:$8 sm:$0x3] %vm177_vm2, %v176_v48  }
  0x98   :  { %188 = vst.msk [vmem:[#allocation0] ss:$8 sm:$0x3] %vm187_vm3, %v186_v49  }
  0x9a   :  { %v196_v50 = vpop.permute.xlu0 %195   ;;  %v206_v51 = vpop.permute.xlu1 %205  }
  0x9b   :  { %198 = vst.msk [vmem:[#allocation0] ss:$8 sm:$0x3] %vm197_vm4, %v196_v50  }
  0x9c   :  { %208 = vst.msk [vmem:[#allocation0] ss:$8 sm:$0x3] %vm207_vm5, %v206_v51  }
  0x9e   :  { %v216_v52 = vpop.permute.xlu0 %215   ;;  %v226_v53 = vpop.permute.xlu1 %225  }
  0x9f   :  { %218 = vst.msk [vmem:[#allocation0] ss:$8 sm:$0x3] %vm217_vm6, %v216_v52  }
  0xa0   :  { %228 = vst.msk [vmem:[#allocation0] ss:$8 sm:$0x3] %vm227_vm7, %v226_v53  }
  0xa2   :  { %v236_v54 = vpop.permute.xlu0 %235   ;;  %v246_v55 = vpop.permute.xlu1 %245  }
  0xa3   :  { %238 = vst.msk [vmem:[#allocation0] ss:$8 sm:$0x3] %vm237_vm8, %v236_v54  }
  0xa4   :  { %248 = vst.msk [vmem:[#allocation0] ss:$8 sm:$0x3] %vm247_vm9, %v246_v55  }
  0xa6   :  { %v256_v56 = vpop.permute.xlu0 %255   ;;  %v266_v57 = vpop.permute.xlu1 %265  }
  0xa7   :  { %258 = vst.msk [vmem:[#allocation0] ss:$8 sm:$0x3] %vm257_vm10, %v256_v56  }
  0xa8   :  { %268 = vst.msk [vmem:[#allocation0] ss:$8 sm:$0x3] %vm267_vm11, %v266_v57  }
  0xaa   :  { %v276_v58 = vpop.permute.xlu0 %275   ;;  %v286_v59 = vpop.permute.xlu1 %285  }
  0xab   :  { %278 = vst.msk [vmem:[#allocation0] ss:$8 sm:$0x3] %vm277_vm12, %v276_v58  }
  0xac   :  { %288 = vst.msk [vmem:[#allocation0] ss:$8 sm:$0x3] %vm287_vm13, %v286_v59  }
  0xae   :  { %v296_v60 = vpop.permute.xlu0 %295   ;;  %v306_v61 = vpop.permute.xlu1 %305  }
  0xaf   :  { %298 = vst.msk [vmem:[#allocation0] ss:$8 sm:$0x3] %vm297_vm14, %v296_v60  }
  0xb0   :  { %308 = vst.msk [vmem:[#allocation0] ss:$8 sm:$0x3] %vm307_vm15, %v306_v61  }
  0xb2   :  { %v316_v62 = vpop.permute.xlu0 %315  }
  0xb3   :  { %318 = vst.msk [vmem:[#allocation0] ss:$8 sm:$0x3] %vm317_vm0, %v316_v62  }
  0xba   :  { %v322_v63 = vld [vmem:[#allocation0] sm:$0x1]  ;;  %v326_v0 = vld [vmem:[#allocation0 + $0x8] sm:$0x1] }
  0xbb   :  { %324 = vst [vmem:[%s697_s1] sm:$0x1] %v322_v63  ;;  %393 = vst [vmem:[%s697_s1 + $0x1] sm:$0x1] %v326_v0 }

// kernel: mul.4
= control target key start
LH: loop header
LB: loop body
LE: loop exit
PB: predicated region body
PF: predicated region fallthrough
CT: control target
= control target key end

     0   :  { %vm322_vm0 = vcmask 1047556   ;;  %s806_s10 = smov 24   ;;  %vm324_vm1 = vcmask 64512   ;;  %s808_s28 = smov 8   ;;  %vm397_vm2 = vcmask 261312   ;;  %vm484_vm3 = vcmask 195712   ;;  %s1195_s0 = inlined_call_operand.vmem [shape: f32[16,4,4,8], index: 0, kind: input, shape index: {}]   ;;  %s1196_s1 = inlined_call_operand.vmem [shape: f32[64,32], index: 1, kind: output, shape index: {}]  }
   0x1   :  { %v768_v0 = vld [vmem:[%s1195_s0 + $0x1c] sm:$0xf]  ;;  %v769_v1 = vld [vmem:[%s1195_s0 + $0x18] sm:$0xf]  ;;  %v770_v2 = vld [vmem:[%s1195_s0 + $0x14] sm:$0xf] }
   0x2   :  { %288 = vst [vmem:[#allocation0 + $0x38] sm:$0xf] %v768_v0  ;;  %293 = vst [vmem:[#allocation0 + $0x30] sm:$0xf] %v769_v1  ;;  %v771_v3 = vld [vmem:[%s1195_s0 + $0x10] sm:$0xf] }
   0x3   :  { %298 = vst [vmem:[#allocation0 + $0x28] sm:$0xf] %v770_v2  ;;  %v772_v4 = vld [vmem:[%s1195_s0 + $0xc] sm:$0xf]  ;;  %v773_v5 = vld [vmem:[%s1195_s0 + $0x8] sm:$0xf] }
   0x4   :  { %303 = vst [vmem:[#allocation0 + $0x20] sm:$0xf] %v771_v3  ;;  %308 = vst [vmem:[#allocation0 + $0x18] sm:$0xf] %v772_v4  ;;  %v774_v6 = vld [vmem:[%s1195_s0 + $0x4] sm:$0xf] }
   0x5   :  { %313 = vst [vmem:[#allocation0 + $0x10] sm:$0xf] %v773_v5  ;;  %v318_v7 = vld [vmem:[%s1195_s0] sm:$0xf]  ;;  %317 = vst [vmem:[#allocation0 + $0x8] sm:$0xf] %v774_v6 }
   0x6   :  { %319 = vst [vmem:[#allocation0] sm:$0xf] %v318_v7  ;;  %v760_v8 = vld [vmem:[%s1195_s0 + $0x3c] sm:$0xf]  ;;  %v761_v9 = vld [vmem:[%s1195_s0 + $0x38] sm:$0xf] }
   0x7   :  { %v762_v10 = vld [vmem:[%s1195_s0 + $0x34] sm:$0xf]  ;;  %248 = vst [vmem:[#allocation0 + $0x78] sm:$0xf] %v760_v8  ;;  %253 = vst [vmem:[#allocation0 + $0x70] sm:$0xf] %v761_v9 }
   0x8   :  { %258 = vst [vmem:[#allocation0 + $0x68] sm:$0xf] %v762_v10  ;;  %v763_v11 = vld [vmem:[%s1195_s0 + $0x30] sm:$0xf]  ;;  %v764_v12 = vld [vmem:[%s1195_s0 + $0x2c] sm:$0xf] }
   0x9   :  { %v765_v13 = vld [vmem:[%s1195_s0 + $0x28] sm:$0xf]  ;;  %263 = vst [vmem:[#allocation0 + $0x60] sm:$0xf] %v763_v11  ;;  %268 = vst [vmem:[#allocation0 + $0x58] sm:$0xf] %v764_v12 }
   0xa   :  { %273 = vst [vmem:[#allocation0 + $0x50] sm:$0xf] %v765_v13  ;;  %v766_v14 = vld [vmem:[%s1195_s0 + $0x24] sm:$0xf]  ;;  %v767_v15 = vld [vmem:[%s1195_s0 + $0x20] sm:$0xf] }
   0xb   :  { %v736_v16 = vld [vmem:[%s1195_s0 + $0x9c] sm:$0xf]  ;;  %278 = vst [vmem:[#allocation0 + $0x48] sm:$0xf] %v766_v14  ;;  %283 = vst [vmem:[#allocation0 + $0x40] sm:$0xf] %v767_v15 }
   0xc   :  { %128 = vst [vmem:[#allocation0 + $0x138] sm:$0xf] %v736_v16  ;;  %v737_v17 = vld [vmem:[%s1195_s0 + $0x98] sm:$0xf]  ;;  %v738_v18 = vld [vmem:[%s1195_s0 + $0x94] sm:$0xf] }
   0xd   :  { %v739_v19 = vld [vmem:[%s1195_s0 + $0x90] sm:$0xf]  ;;  %133 = vst [vmem:[#allocation0 + $0x130] sm:$0xf] %v737_v17  ;;  %138 = vst [vmem:[#allocation0 + $0x128] sm:$0xf] %v738_v18 }
   0xe   :  { %143 = vst [vmem:[#allocation0 + $0x120] sm:$0xf] %v739_v19  ;;  %v740_v20 = vld [vmem:[%s1195_s0 + $0x8c] sm:$0xf]  ;;  %v741_v21 = vld [vmem:[%s1195_s0 + $0x88] sm:$0xf] }
   0xf   :  { %v742_v22 = vld [vmem:[%s1195_s0 + $0x84] sm:$0xf]  ;;  %148 = vst [vmem:[#allocation0 + $0x118] sm:$0xf] %v740_v20  ;;  %153 = vst [vmem:[#allocation0 + $0x110] sm:$0xf] %v741_v21 }
  0x10   :  { %158 = vst [vmem:[#allocation0 + $0x108] sm:$0xf] %v742_v22  ;;  %v743_v23 = vld [vmem:[%s1195_s0 + $0x80] sm:$0xf]  ;;  %v728_v24 = vld [vmem:[%s1195_s0 + $0xbc] sm:$0xf] }
  0x11   :  { %v729_v25 = vld [vmem:[%s1195_s0 + $0xb8] sm:$0xf]  ;;  %163 = vst [vmem:[#allocation0 + $0x100] sm:$0xf] %v743_v23  ;;  %88 = vst [vmem:[#allocation0 + $0x178] sm:$0xf] %v728_v24 }
  0x12   :  { %v392_v26 = vld [vmem:[#allocation0 + $0x3] ss:$8 sm:$0xf0]   ;;  %93 = vst [vmem:[#allocation0 + $0x170] sm:$0xf] %v729_v25  ;;  %vm571_vm4 = vcmask 130112  }
  0x13   :  { %v730_v27 = vld [vmem:[%s1195_s0 + $0xb4] sm:$0xf]  ;;  %v390_v28 = vld [vmem:[#allocation0 + $0x3] ss:$8 sm:$0xf]  }
  0x14   :  { %98 = vst [vmem:[#allocation0 + $0x168] sm:$0xf] %v730_v27  ;;  %v731_v29 = vld [vmem:[%s1195_s0 + $0xb0] sm:$0xf]  ;;  %v394_v30 = vsel %vm322_vm0, %v392_v26, %v390_v28  ;;  %v732_v31 = vld [vmem:[%s1195_s0 + $0xac] sm:$0xf] }
  0x15   :  { %103 = vst [vmem:[#allocation0 + $0x160] sm:$0xf] %v731_v29  ;;  %v733_v32 = vld [vmem:[%s1195_s0 + $0xa8] sm:$0xf]  ;;  %v734_v33 = vld [vmem:[%s1195_s0 + $0xa4] sm:$0xf]  ;;  %395 = vrot.lane.b32.xlu0 %v394_v30, %s806_s10 }
  0x16   :  { %v413_v34 = vld [vmem:[#allocation0 + $0x43] ss:$8 sm:$0xf0]   ;;  %108 = vst [vmem:[#allocation0 + $0x158] sm:$0xf] %v732_v31 }
  0x17   :  { %113 = vst [vmem:[#allocation0 + $0x150] sm:$0xf] %v733_v32  ;;  %118 = vst [vmem:[#allocation0 + $0x148] sm:$0xf] %v734_v33  ;;  %v735_v35 = vld [vmem:[%s1195_s0 + $0xa0] sm:$0xf] }
  0x18   :  { %v411_v36 = vld [vmem:[#allocation0 + $0x43] ss:$8 sm:$0xf]   ;;  %123 = vst [vmem:[#allocation0 + $0x140] sm:$0xf] %v735_v35 }
  0x19   :  { %v752_v37 = vld [vmem:[%s1195_s0 + $0x5c] sm:$0xf]  ;;  %v415_v38 = vsel %vm322_vm0, %v413_v34, %v411_v36  ;;  %v402_v39 = vld [vmem:[#allocation0 + $0x103] ss:$8 sm:$0xf0]  }
  0x1a   :  { %208 = vst [vmem:[#allocation0 + $0xb8] sm:$0xf] %v752_v37  ;;  %v753_v40 = vld [vmem:[%s1195_s0 + $0x58] sm:$0xf]  ;;  %416 = vrot.lane.b32.xlu1 %v415_v38, %s806_s10  ;;  %v754_v41 = vld [vmem:[%s1195_s0 + $0x54] sm:$0xf] }
  0x1b   :  { %213 = vst [vmem:[#allocation0 + $0xb0] sm:$0xf] %v753_v40  ;;  %v755_v42 = vld [vmem:[%s1195_s0 + $0x50] sm:$0xf]  ;;  %v756_v43 = vld [vmem:[%s1195_s0 + $0x4c] sm:$0xf] }
  0x1c   :  { %v400_v44 = vld [vmem:[#allocation0 + $0x103] ss:$8 sm:$0xf]   ;;  %218 = vst [vmem:[#allocation0 + $0xa8] sm:$0xf] %v754_v41 }
  0x1d   :  { %223 = vst [vmem:[#allocation0 + $0xa0] sm:$0xf] %v755_v42  ;;  %228 = vst [vmem:[#allocation0 + $0x98] sm:$0xf] %v756_v43  ;;  %v757_v45 = vld [vmem:[%s1195_s0 + $0x48] sm:$0xf]  ;;  %v404_v46 = vsel %vm322_vm0, %v402_v39, %v400_v44 }
  0x1e   :  { %233 = vst [vmem:[#allocation0 + $0x90] sm:$0xf] %v757_v45  ;;  %v758_v47 = vld [vmem:[%s1195_s0 + $0x44] sm:$0xf]  ;;  %v759_v48 = vld [vmem:[%s1195_s0 + $0x40] sm:$0xf]  ;;  %405 = vrot.lane.b32.xlu0 %v404_v46, %s806_s10 }
  0x1f   :  { %v720_v49 = vld [vmem:[%s1195_s0 + $0xdc] sm:$0xf]  ;;  %v424_v50 = vld [vmem:[#allocation0 + $0x143] ss:$8 sm:$0xf0]  }
  0x20   :  { %238 = vst [vmem:[#allocation0 + $0x88] sm:$0xf] %v758_v47  ;;  %243 = vst [vmem:[#allocation0 + $0x80] sm:$0xf] %v759_v48  ;;  %v721_v51 = vld [vmem:[%s1195_s0 + $0xd8] sm:$0xf] }
  0x21   :  { %48 = vst [vmem:[#allocation0 + $0x1b8] sm:$0xf] %v720_v49  ;;  %53 = vst [vmem:[#allocation0 + $0x1b0] sm:$0xf] %v721_v51  ;;  %v722_v52 = vld [vmem:[%s1195_s0 + $0xd4] sm:$0xf] }
  0x22   :  { %v723_v53 = vld [vmem:[%s1195_s0 + $0xd0] sm:$0xf]  ;;  %v724_v54 = vld [vmem:[%s1195_s0 + $0xcc] sm:$0xf]  ;;  %58 = vst [vmem:[#allocation0 + $0x1a8] sm:$0xf] %v722_v52 }
  0x23   :  { %v422_v55 = vld [vmem:[#allocation0 + $0x143] ss:$8 sm:$0xf]   ;;  %63 = vst [vmem:[#allocation0 + $0x1a0] sm:$0xf] %v723_v53 }
  0x24   :  { %68 = vst [vmem:[#allocation0 + $0x198] sm:$0xf] %v724_v54  ;;  %v725_v56 = vld [vmem:[%s1195_s0 + $0xc8] sm:$0xf]  ;;  %v426_v57 = vsel %vm322_vm0, %v424_v50, %v422_v55  ;;  %v726_v58 = vld [vmem:[%s1195_s0 + $0xc4] sm:$0xf] }
  0x25   :  { %73 = vst [vmem:[#allocation0 + $0x190] sm:$0xf] %v725_v56  ;;  %v727_v59 = vld [vmem:[%s1195_s0 + $0xc0] sm:$0xf]  ;;  %v744_v60 = vld [vmem:[%s1195_s0 + $0x7c] sm:$0xf]  ;;  %427 = vrot.lane.b32.xlu1 %v426_v57, %s806_s10 }
  0x26   :  { %78 = vst [vmem:[#allocation0 + $0x188] sm:$0xf] %v726_v58  ;;  %83 = vst [vmem:[#allocation0 + $0x180] sm:$0xf] %v727_v59  ;;  %v745_v61 = vld [vmem:[%s1195_s0 + $0x78] sm:$0xf] }
  0x27   :  { %168 = vst [vmem:[#allocation0 + $0xf8] sm:$0xf] %v744_v60  ;;  %v746_v62 = vld [vmem:[%s1195_s0 + $0x74] sm:$0xf]  ;;  %v747_v63 = vld [vmem:[%s1195_s0 + $0x70] sm:$0xf] }
  0x28   :  { %v435_v0 = vld [vmem:[#allocation0 + $0x83] ss:$8 sm:$0xf0]   ;;  %173 = vst [vmem:[#allocation0 + $0xf0] sm:$0xf] %v745_v61 }
  0x29   :  { %178 = vst [vmem:[#allocation0 + $0xe8] sm:$0xf] %v746_v62  ;;  %183 = vst [vmem:[#allocation0 + $0xe0] sm:$0xf] %v747_v63  ;;  %v748_v1 = vld [vmem:[%s1195_s0 + $0x6c] sm:$0xf] }
  0x2a   :  { %188 = vst [vmem:[#allocation0 + $0xd8] sm:$0xf] %v748_v1  ;;  %v749_v2 = vld [vmem:[%s1195_s0 + $0x68] sm:$0xf]  ;;  %v750_v3 = vld [vmem:[%s1195_s0 + $0x64] sm:$0xf] }
  0x2b   :  { %v751_v4 = vld [vmem:[%s1195_s0 + $0x60] sm:$0xf]  ;;  %193 = vst [vmem:[#allocation0 + $0xd0] sm:$0xf] %v749_v2  ;;  %198 = vst [vmem:[#allocation0 + $0xc8] sm:$0xf] %v750_v3 }
  0x2c   :  { %v433_v5 = vld [vmem:[#allocation0 + $0x83] ss:$8 sm:$0xf]   ;;  %203 = vst [vmem:[#allocation0 + $0xc0] sm:$0xf] %v751_v4 }
  0x2d   :  { %v712_v6 = vld [vmem:[%s1195_s0 + $0xfc] sm:$0xf]  ;;  %v437_v7 = vsel %vm322_vm0, %v435_v0, %v433_v5  ;;  %v713_v8 = vld [vmem:[%s1195_s0 + $0xf8] sm:$0xf]  ;;  %v714_v9 = vld [vmem:[%s1195_s0 + $0xf4] sm:$0xf] }
  0x2e   :  { %8 = vst [vmem:[#allocation0 + $0x1f8] sm:$0xf] %v712_v6  ;;  %v715_v10 = vld [vmem:[%s1195_s0 + $0xf0] sm:$0xf]  ;;  %438 = vrot.lane.b32.xlu0 %v437_v7, %s806_s10  ;;  %13 = vst [vmem:[#allocation0 + $0x1f0] sm:$0xf] %v713_v8 }
  0x2f   :  { %v446_v11 = vld [vmem:[#allocation0 + $0x183] ss:$8 sm:$0xf0]   ;;  %18 = vst [vmem:[#allocation0 + $0x1e8] sm:$0xf] %v714_v9 }
  0x30   :  { %23 = vst [vmem:[#allocation0 + $0x1e0] sm:$0xf] %v715_v10  ;;  %v716_v12 = vld [vmem:[%s1195_s0 + $0xec] sm:$0xf]  ;;  %v717_v13 = vld [vmem:[%s1195_s0 + $0xe8] sm:$0xf] }
  0x31   :  { %28 = vst [vmem:[#allocation0 + $0x1d8] sm:$0xf] %v716_v12  ;;  %v718_v14 = vld [vmem:[%s1195_s0 + $0xe4] sm:$0xf]  ;;  %v719_v15 = vld [vmem:[%s1195_s0 + $0xe0] sm:$0xf] }
  0x32   :  { %v444_v16 = vld [vmem:[#allocation0 + $0x183] ss:$8 sm:$0xf]   ;;  %33 = vst [vmem:[#allocation0 + $0x1d0] sm:$0xf] %v717_v13  ;;  %s807_s0 = smov 16  }
  0x33   :  { %38 = vst [vmem:[#allocation0 + $0x1c8] sm:$0xf] %v718_v14  ;;  %43 = vst [vmem:[#allocation0 + $0x1c0] sm:$0xf] %v719_v15  ;;  %v448_v17 = vsel %vm322_vm0, %v446_v11, %v444_v16 }
  0x34   :  { %v457_v18 = vld [vmem:[#allocation0 + $0xc3] ss:$8 sm:$0xf0]   ;;  %449 = vrot.lane.b32.xlu1 %v448_v17, %s806_s10  ;;  %v477_v19 = vld [vmem:[#allocation0 + $0x2] ss:$8 sm:$0xf]  }
  0x35   :  { %v455_v20 = vld [vmem:[#allocation0 + $0xc3] ss:$8 sm:$0xf]   ;;  %v479_v21 = vld [vmem:[#allocation0 + $0x2] ss:$8 sm:$0xf0]  }
  0x36   :  { %v459_v22 = vsel %vm322_vm0, %v457_v18, %v455_v20  ;;  %v487_v24 = vld [vmem:[#allocation0 + $0x102] ss:$8 sm:$0xf]   ;;  %v481_v25 = vsel %vm322_vm0, %v479_v21, %v477_v19  ;;  %v564_v45 = vld [vmem:[#allocation0 + $0x1] ss:$8 sm:$0xf]  }
  0x37   :  { %460 = vrot.lane.b32.xlu0 %v459_v22, %s806_s10  ;;  %v468_v23 = vld [vmem:[#allocation0 + $0x1c3] ss:$8 sm:$0xf0]   ;;  %v489_v26 = vld [vmem:[#allocation0 + $0x102] ss:$8 sm:$0xf0]  }
  0x38   :  { %v498_v27 = vld [vmem:[#allocation0 + $0x42] ss:$8 sm:$0xf]   ;;  %v491_v31 = vsel %vm322_vm0, %v489_v26, %v487_v24  ;;  %v566_v48 = vld [vmem:[#allocation0 + $0x1] ss:$8 sm:$0xf0]  }
  0x39   :  { %v500_v29 = vld [vmem:[#allocation0 + $0x42] ss:$8 sm:$0xf0]   ;;  %v320_v49 = vld [vmem:[#allocation0] ss:$8 sm:$0xf]   ;;  %v568_v63 = vsel %vm322_vm0, %v566_v48, %v564_v45 }
  0x3a   :  { %v466_v28 = vld [vmem:[#allocation0 + $0x1c3] ss:$8 sm:$0xf]   ;;  %v502_v32 = vsel %vm322_vm0, %v500_v29, %v498_v27  ;;  %v509_v33 = vld [vmem:[#allocation0 + $0x142] ss:$8 sm:$0xf]  }
  0x3b   :  { %v470_v30 = vsel %vm322_vm0, %v468_v23, %v466_v28  ;;  %482 = vrot.lane.b32.xlu0 %v481_v25, %s807_s0  ;;  %v511_v34 = vld [vmem:[#allocation0 + $0x142] ss:$8 sm:$0xf0]   ;;  %v321_v50 = vld [vmem:[#allocation0] ss:$8 sm:$0xf0]  }
  0x3c   :  { %471 = vrot.lane.b32.xlu1 %v470_v30, %s806_s10  ;;  %v520_v35 = vld [vmem:[#allocation0 + $0x82] ss:$8 sm:$0xf]   ;;  %v513_v37 = vsel %vm322_vm0, %v511_v34, %v509_v33  ;;  %v327_v51 = vld [vmem:[#allocation0 + $0x40] ss:$8 sm:$0xf]   ;;  %v323_v52 = vsel %vm322_vm0, %v321_v50, %v320_v49 }
  0x3d   :  { %v522_v36 = vld [vmem:[#allocation0 + $0x82] ss:$8 sm:$0xf0]   ;;  %v329_v53 = vld [vmem:[#allocation0 + $0x40] ss:$8 sm:$0xf0]  }
  0x3e   :  { %v524_v38 = vsel %vm322_vm0, %v522_v36, %v520_v35  ;;  %v531_v39 = vld [vmem:[#allocation0 + $0x182] ss:$8 sm:$0xf]   ;;  %v354_v54 = vld [vmem:[#allocation0 + $0x100] ss:$8 sm:$0xf]   ;;  %v331_v59 = vsel %vm322_vm0, %v329_v53, %v327_v51 }
  0x3f   :  { %503 = vrot.lane.b32.xlu0 %v502_v32, %s807_s0  ;;  %v533_v40 = vld [vmem:[#allocation0 + $0x182] ss:$8 sm:$0xf0]   ;;  %v574_v55 = vld [vmem:[#allocation0 + $0x101] ss:$8 sm:$0xf]  }
  0x40   :  { %492 = vrot.lane.b32.xlu1 %v491_v31, %s807_s0  ;;  %v542_v41 = vld [vmem:[#allocation0 + $0xc2] ss:$8 sm:$0xf]   ;;  %v535_v46 = vsel %vm322_vm0, %v533_v40, %v531_v39  ;;  %v576_v56 = vld [vmem:[#allocation0 + $0x101] ss:$8 sm:$0xf0]  }
  0x41   :  { %v544_v42 = vld [vmem:[#allocation0 + $0xc2] ss:$8 sm:$0xf0]   ;;  %v585_v57 = vld [vmem:[#allocation0 + $0x41] ss:$8 sm:$0xf]   ;;  %v578_v13 = vsel %vm322_vm0, %v576_v56, %v574_v55 }
  0x42   :  { %v553_v43 = vld [vmem:[#allocation0 + $0x1c2] ss:$8 sm:$0xf]   ;;  %v546_v47 = vsel %vm322_vm0, %v544_v42, %v542_v41  ;;  %v587_v58 = vld [vmem:[#allocation0 + $0x41] ss:$8 sm:$0xf0]  }
  0x43   :  { %525 = vrot.lane.b32.xlu0 %v524_v38, %s807_s0  ;;  %v555_v44 = vld [vmem:[#allocation0 + $0x1c2] ss:$8 sm:$0xf0]   ;;  %325 = vst.msk [vmem:[%s1196_s1] sm:$0xff] %vm324_vm1, %v323_v52   ;;  %775 = vst.msk [vmem:[%s1196_s1 + $0x8] sm:$0xff] %vm324_vm1, %v331_v59   ;;  %v589_v14 = vsel %vm322_vm0, %v587_v58, %v585_v57 }
  0x44   :  { %514 = vrot.lane.b32.xlu1 %v513_v37, %s807_s0  ;;  %v356_v60 = vld [vmem:[#allocation0 + $0x100] ss:$8 sm:$0xf0]   ;;  %v557_v62 = vsel %vm322_vm0, %v555_v44, %v553_v43  ;;  %v596_v9 = vld [vmem:[#allocation0 + $0x141] ss:$8 sm:$0xf]  }
  0x45   :  { %v363_v61 = vld [vmem:[#allocation0 + $0x140] ss:$8 sm:$0xf]   ;;  %v358_v0 = vsel %vm322_vm0, %v356_v60, %v354_v54  ;;  %v598_v15 = vld [vmem:[#allocation0 + $0x141] ss:$8 sm:$0xf0]  }
  0x46   :  { %v365_v1 = vld [vmem:[#allocation0 + $0x140] ss:$8 sm:$0xf0]   ;;  %778 = vst.msk [vmem:[%s1196_s1 + $0x20] sm:$0xff] %vm324_vm1, %v358_v0   ;;  %v600_v21 = vsel %vm322_vm0, %v598_v15, %v596_v9 }
  0x47   :  { %547 = vrot.lane.b32.xlu0 %v546_v47, %s807_s0  ;;  %v336_v2 = vld [vmem:[#allocation0 + $0x80] ss:$8 sm:$0xf]   ;;  %v367_v3 = vsel %vm322_vm0, %v365_v1, %v363_v61  ;;  %v607_v18 = vld [vmem:[#allocation0 + $0x81] ss:$8 sm:$0xf]  }
  0x48   :  { %536 = vrot.lane.b32.xlu1 %v535_v46, %s807_s0  ;;  %v338_v4 = vld [vmem:[#allocation0 + $0x80] ss:$8 sm:$0xf0]   ;;  %779 = vst.msk [vmem:[%s1196_s1 + $0x28] sm:$0xff] %vm324_vm1, %v367_v3  }
  0x49   :  { %v372_v5 = vld [vmem:[#allocation0 + $0x180] ss:$8 sm:$0xf]   ;;  %v340_v6 = vsel %vm322_vm0, %v338_v4, %v336_v2  ;;  %v609_v19 = vld [vmem:[#allocation0 + $0x81] ss:$8 sm:$0xf0]  }
  0x4a   :  { %v374_v7 = vld [vmem:[#allocation0 + $0x180] ss:$8 sm:$0xf0]   ;;  %776 = vst.msk [vmem:[%s1196_s1 + $0x10] sm:$0xff] %vm324_vm1, %v340_v6   ;;  %v611_v22 = vsel %vm322_vm0, %v609_v19, %v607_v18 }
  0x4b   :  { %v345_v8 = vld [vmem:[#allocation0 + $0xc0] ss:$8 sm:$0xf]   ;;  %569 = vrot.lane.b32.xlu0 %v568_v63, %s808_s28  ;;  %v376_v10 = vsel %vm322_vm0, %v374_v7, %v372_v5  ;;  %v618_v23 = vld [vmem:[#allocation0 + $0x181] ss:$8 sm:$0xf]  }
  0x4c   :  { %558 = vrot.lane.b32.xlu1 %v557_v62, %s807_s0  ;;  %v347_v11 = vld [vmem:[#allocation0 + $0xc0] ss:$8 sm:$0xf0]   ;;  %780 = vst.msk [vmem:[%s1196_s1 + $0x30] sm:$0xff] %vm324_vm1, %v376_v10  }
  0x4d   :  { %v381_v12 = vld [vmem:[#allocation0 + $0x1c0] ss:$8 sm:$0xf]   ;;  %v349_v16 = vsel %vm322_vm0, %v347_v11, %v345_v8  ;;  %v620_v24 = vld [vmem:[#allocation0 + $0x181] ss:$8 sm:$0xf0]  }
  0x4e   :  { %v383_v17 = vld [vmem:[#allocation0 + $0x1c0] ss:$8 sm:$0xf0]   ;;  %777 = vst.msk [vmem:[%s1196_s1 + $0x18] sm:$0xff] %vm324_vm1, %v349_v16   ;;  %v622_v27 = vsel %vm322_vm0, %v620_v24, %v618_v23 }
  0x4f   :  { %v385_v20 = vsel %vm322_vm0, %v383_v17, %v381_v12  ;;  %590 = vrot.lane.b32.xlu0 %v589_v14, %s808_s28  ;;  %v629_v25 = vld [vmem:[#allocation0 + $0xc1] ss:$8 sm:$0xf]  }
  0x50   :  { %781 = vst.msk [vmem:[%s1196_s1 + $0x38] sm:$0xff] %vm324_vm1, %v385_v20   ;;  %579 = vrot.lane.b32.xlu1 %v578_v13, %s808_s28  ;;  %v631_v26 = vld [vmem:[#allocation0 + $0xc1] ss:$8 sm:$0xf0]  }
  0x51   :  { %v633_v28 = vsel %vm322_vm0, %v631_v26, %v629_v25  ;;  %v640_v29 = vld [vmem:[#allocation0 + $0x1c1] ss:$8 sm:$0xf]  }
  0x52   :  { %v642_v30 = vld [vmem:[#allocation0 + $0x1c1] ss:$8 sm:$0xf0]  }
  0x53   :  { %612 = vrot.lane.b32.xlu0 %v611_v22, %s808_s28  ;;  %v644_v31 = vsel %vm322_vm0, %v642_v30, %v640_v29 }
  0x54   :  { %601 = vrot.lane.b32.xlu1 %v600_v21, %s808_s28 }
  0x57   :  { %634 = vrot.lane.b32.xlu0 %v633_v28, %s808_s28 }
  0x58   :  { %623 = vrot.lane.b32.xlu1 %v622_v27, %s808_s28 }
  0x5c   :  { %645 = vrot.lane.b32.xlu1 %v644_v31, %s808_s28 }
  0x87   :  { %v396_v32 = vpop.permute.xlu0 %395  }
  0x88   :  { %398 = vst.msk [vmem:[%s1196_s1] sm:$0xff] %vm397_vm2, %v396_v32  }
  0x8c   :  { %v417_v33 = vpop.permute.xlu1 %416  }
  0x8d   :  { %783 = vst.msk [vmem:[%s1196_s1 + $0x8] sm:$0xff] %vm397_vm2, %v417_v33  }
  0x90   :  { %v406_v34 = vpop.permute.xlu0 %405  }
  0x91   :  { %782 = vst.msk [vmem:[%s1196_s1 + $0x20] sm:$0xff] %vm397_vm2, %v406_v34  }
  0x97   :  { %v428_v35 = vpop.permute.xlu1 %427  }
  0x98   :  { %784 = vst.msk [vmem:[%s1196_s1 + $0x28] sm:$0xff] %vm397_vm2, %v428_v35  }
  0xa0   :  { %v439_v36 = vpop.permute.xlu0 %438  }
  0xa1   :  { %785 = vst.msk [vmem:[%s1196_s1 + $0x10] sm:$0xff] %vm397_vm2, %v439_v36  }
  0xa6   :  { %v450_v37 = vpop.permute.xlu1 %449  }
  0xa7   :  { %786 = vst.msk [vmem:[%s1196_s1 + $0x30] sm:$0xff] %vm397_vm2, %v450_v37  }
  0xa9   :  { %v461_v38 = vpop.permute.xlu0 %460  }
  0xaa   :  { %787 = vst.msk [vmem:[%s1196_s1 + $0x18] sm:$0xff] %vm397_vm2, %v461_v38  }
  0xad   :  { %v483_v40 = vpop.permute.xlu0 %482  }
  0xae   :  { %v472_v39 = vpop.permute.xlu1 %471   ;;  %485 = vst.msk [vmem:[%s1196_s1] sm:$0xff] %vm484_vm3, %v483_v40  }
  0xaf   :  { %788 = vst.msk [vmem:[%s1196_s1 + $0x38] sm:$0xff] %vm397_vm2, %v472_v39  }
  0xb1   :  { %v504_v42 = vpop.permute.xlu0 %503  }
  0xb2   :  { %v493_v41 = vpop.permute.xlu1 %492   ;;  %790 = vst.msk [vmem:[%s1196_s1 + $0x8] sm:$0xff] %vm484_vm3, %v504_v42  }
  0xb3   :  { %789 = vst.msk [vmem:[%s1196_s1 + $0x20] sm:$0xff] %vm484_vm3, %v493_v41  }
  0xb5   :  { %v526_v44 = vpop.permute.xlu0 %525  }
  0xb6   :  { %v515_v43 = vpop.permute.xlu1 %514   ;;  %792 = vst.msk [vmem:[%s1196_s1 + $0x10] sm:$0xff] %vm484_vm3, %v526_v44  }
  0xb7   :  { %791 = vst.msk [vmem:[%s1196_s1 + $0x28] sm:$0xff] %vm484_vm3, %v515_v43  }
  0xb9   :  { %v548_v46 = vpop.permute.xlu0 %547  }
  0xba   :  { %v537_v45 = vpop.permute.xlu1 %536   ;;  %794 = vst.msk [vmem:[%s1196_s1 + $0x18] sm:$0xff] %vm484_vm3, %v548_v46  }
  0xbb   :  { %793 = vst.msk [vmem:[%s1196_s1 + $0x30] sm:$0xff] %vm484_vm3, %v537_v45  }
  0xbd   :  { %v570_v48 = vpop.permute.xlu0 %569  }
  0xbe   :  { %v559_v47 = vpop.permute.xlu1 %558   ;;  %572 = vst.msk [vmem:[%s1196_s1] sm:$0xff] %vm571_vm4, %v570_v48  }
  0xbf   :  { %795 = vst.msk [vmem:[%s1196_s1 + $0x38] sm:$0xff] %vm484_vm3, %v559_v47  }
  0xc1   :  { %v591_v50 = vpop.permute.xlu0 %590  }
  0xc2   :  { %v580_v49 = vpop.permute.xlu1 %579   ;;  %797 = vst.msk [vmem:[%s1196_s1 + $0x8] sm:$0xff] %vm571_vm4, %v591_v50  }
  0xc3   :  { %796 = vst.msk [vmem:[%s1196_s1 + $0x20] sm:$0xff] %vm571_vm4, %v580_v49  }
  0xc5   :  { %v613_v52 = vpop.permute.xlu0 %612  }
  0xc6   :  { %v602_v51 = vpop.permute.xlu1 %601   ;;  %799 = vst.msk [vmem:[%s1196_s1 + $0x10] sm:$0xff] %vm571_vm4, %v613_v52  }
  0xc7   :  { %798 = vst.msk [vmem:[%s1196_s1 + $0x28] sm:$0xff] %vm571_vm4, %v602_v51  }
  0xc9   :  { %v635_v54 = vpop.permute.xlu0 %634  }
  0xca   :  { %v624_v53 = vpop.permute.xlu1 %623   ;;  %801 = vst.msk [vmem:[%s1196_s1 + $0x18] sm:$0xff] %vm571_vm4, %v635_v54  }
  0xcb   :  { %800 = vst.msk [vmem:[%s1196_s1 + $0x30] sm:$0xff] %vm571_vm4, %v624_v53  }
  0xce   :  { %v646_v55 = vpop.permute.xlu1 %645  }
  0xcf   :  { %802 = vst.msk [vmem:[%s1196_s1 + $0x38] sm:$0xff] %vm571_vm4, %v646_v55  }

// kernel: mul.74
= control target key start
LH: loop header
LB: loop body
LE: loop exit
PB: predicated region body
PF: predicated region fallthrough
CT: control target
= control target key end

     0   :  { %vm322_vm0 = vcmask 1047556   ;;  %s806_s10 = smov 24   ;;  %vm324_vm1 = vcmask 64512   ;;  %s808_s28 = smov 8   ;;  %vm397_vm2 = vcmask 261312   ;;  %vm484_vm3 = vcmask 195712   ;;  %s1195_s0 = inlined_call_operand.vmem [shape: f32[4,8,16,4], index: 0, kind: input, shape index: {}]   ;;  %s1196_s1 = inlined_call_operand.vmem [shape: f32[32,64], index: 1, kind: output, shape index: {}]  }
   0x1   :  { %v768_v0 = vld [vmem:[%s1195_s0 + $0x1c] sm:$0xf]  ;;  %v769_v1 = vld [vmem:[%s1195_s0 + $0x18] sm:$0xf]  ;;  %v770_v2 = vld [vmem:[%s1195_s0 + $0x14] sm:$0xf] }
   0x2   :  { %288 = vst [vmem:[#allocation0 + $0x38] sm:$0xf] %v768_v0  ;;  %293 = vst [vmem:[#allocation0 + $0x30] sm:$0xf] %v769_v1  ;;  %v771_v3 = vld [vmem:[%s1195_s0 + $0x10] sm:$0xf] }
   0x3   :  { %298 = vst [vmem:[#allocation0 + $0x28] sm:$0xf] %v770_v2  ;;  %v772_v4 = vld [vmem:[%s1195_s0 + $0xc] sm:$0xf]  ;;  %v773_v5 = vld [vmem:[%s1195_s0 + $0x8] sm:$0xf] }
   0x4   :  { %303 = vst [vmem:[#allocation0 + $0x20] sm:$0xf] %v771_v3  ;;  %308 = vst [vmem:[#allocation0 + $0x18] sm:$0xf] %v772_v4  ;;  %v774_v6 = vld [vmem:[%s1195_s0 + $0x4] sm:$0xf] }
   0x5   :  { %313 = vst [vmem:[#allocation0 + $0x10] sm:$0xf] %v773_v5  ;;  %v318_v7 = vld [vmem:[%s1195_s0] sm:$0xf]  ;;  %317 = vst [vmem:[#allocation0 + $0x8] sm:$0xf] %v774_v6 }
   0x6   :  { %319 = vst [vmem:[#allocation0] sm:$0xf] %v318_v7  ;;  %v760_v8 = vld [vmem:[%s1195_s0 + $0x3c] sm:$0xf]  ;;  %v761_v9 = vld [vmem:[%s1195_s0 + $0x38] sm:$0xf] }
   0x7   :  { %v762_v10 = vld [vmem:[%s1195_s0 + $0x34] sm:$0xf]  ;;  %248 = vst [vmem:[#allocation0 + $0x78] sm:$0xf] %v760_v8  ;;  %253 = vst [vmem:[#allocation0 + $0x70] sm:$0xf] %v761_v9 }
   0x8   :  { %258 = vst [vmem:[#allocation0 + $0x68] sm:$0xf] %v762_v10  ;;  %v763_v11 = vld [vmem:[%s1195_s0 + $0x30] sm:$0xf]  ;;  %v764_v12 = vld [vmem:[%s1195_s0 + $0x2c] sm:$0xf] }
   0x9   :  { %v765_v13 = vld [vmem:[%s1195_s0 + $0x28] sm:$0xf]  ;;  %263 = vst [vmem:[#allocation0 + $0x60] sm:$0xf] %v763_v11  ;;  %268 = vst [vmem:[#allocation0 + $0x58] sm:$0xf] %v764_v12 }
   0xa   :  { %273 = vst [vmem:[#allocation0 + $0x50] sm:$0xf] %v765_v13  ;;  %v766_v14 = vld [vmem:[%s1195_s0 + $0x24] sm:$0xf]  ;;  %v767_v15 = vld [vmem:[%s1195_s0 + $0x20] sm:$0xf] }
   0xb   :  { %v736_v16 = vld [vmem:[%s1195_s0 + $0x9c] sm:$0xf]  ;;  %278 = vst [vmem:[#allocation0 + $0x48] sm:$0xf] %v766_v14  ;;  %283 = vst [vmem:[#allocation0 + $0x40] sm:$0xf] %v767_v15 }
   0xc   :  { %128 = vst [vmem:[#allocation0 + $0x138] sm:$0xf] %v736_v16  ;;  %v737_v17 = vld [vmem:[%s1195_s0 + $0x98] sm:$0xf]  ;;  %v738_v18 = vld [vmem:[%s1195_s0 + $0x94] sm:$0xf] }
   0xd   :  { %v739_v19 = vld [vmem:[%s1195_s0 + $0x90] sm:$0xf]  ;;  %133 = vst [vmem:[#allocation0 + $0x130] sm:$0xf] %v737_v17  ;;  %138 = vst [vmem:[#allocation0 + $0x128] sm:$0xf] %v738_v18 }
   0xe   :  { %143 = vst [vmem:[#allocation0 + $0x120] sm:$0xf] %v739_v19  ;;  %v740_v20 = vld [vmem:[%s1195_s0 + $0x8c] sm:$0xf]  ;;  %v741_v21 = vld [vmem:[%s1195_s0 + $0x88] sm:$0xf] }
   0xf   :  { %v742_v22 = vld [vmem:[%s1195_s0 + $0x84] sm:$0xf]  ;;  %148 = vst [vmem:[#allocation0 + $0x118] sm:$0xf] %v740_v20  ;;  %153 = vst [vmem:[#allocation0 + $0x110] sm:$0xf] %v741_v21 }
  0x10   :  { %158 = vst [vmem:[#allocation0 + $0x108] sm:$0xf] %v742_v22  ;;  %v743_v23 = vld [vmem:[%s1195_s0 + $0x80] sm:$0xf]  ;;  %v728_v24 = vld [vmem:[%s1195_s0 + $0xbc] sm:$0xf] }
  0x11   :  { %v729_v25 = vld [vmem:[%s1195_s0 + $0xb8] sm:$0xf]  ;;  %163 = vst [vmem:[#allocation0 + $0x100] sm:$0xf] %v743_v23  ;;  %88 = vst [vmem:[#allocation0 + $0x178] sm:$0xf] %v728_v24 }
  0x12   :  { %v392_v26 = vld [vmem:[#allocation0 + $0x3] ss:$8 sm:$0xf0]   ;;  %93 = vst [vmem:[#allocation0 + $0x170] sm:$0xf] %v729_v25  ;;  %vm571_vm4 = vcmask 130112  }
  0x13   :  { %v730_v27 = vld [vmem:[%s1195_s0 + $0xb4] sm:$0xf]  ;;  %v390_v28 = vld [vmem:[#allocation0 + $0x3] ss:$8 sm:$0xf]  }
  0x14   :  { %98 = vst [vmem:[#allocation0 + $0x168] sm:$0xf] %v730_v27  ;;  %v731_v29 = vld [vmem:[%s1195_s0 + $0xb0] sm:$0xf]  ;;  %v394_v30 = vsel %vm322_vm0, %v392_v26, %v390_v28  ;;  %v732_v31 = vld [vmem:[%s1195_s0 + $0xac] sm:$0xf] }
  0x15   :  { %103 = vst [vmem:[#allocation0 + $0x160] sm:$0xf] %v731_v29  ;;  %v733_v32 = vld [vmem:[%s1195_s0 + $0xa8] sm:$0xf]  ;;  %v734_v33 = vld [vmem:[%s1195_s0 + $0xa4] sm:$0xf]  ;;  %395 = vrot.lane.b32.xlu0 %v394_v30, %s806_s10 }
  0x16   :  { %v413_v34 = vld [vmem:[#allocation0 + $0x43] ss:$8 sm:$0xf0]   ;;  %108 = vst [vmem:[#allocation0 + $0x158] sm:$0xf] %v732_v31 }
  0x17   :  { %113 = vst [vmem:[#allocation0 + $0x150] sm:$0xf] %v733_v32  ;;  %118 = vst [vmem:[#allocation0 + $0x148] sm:$0xf] %v734_v33  ;;  %v735_v35 = vld [vmem:[%s1195_s0 + $0xa0] sm:$0xf] }
  0x18   :  { %v411_v36 = vld [vmem:[#allocation0 + $0x43] ss:$8 sm:$0xf]   ;;  %123 = vst [vmem:[#allocation0 + $0x140] sm:$0xf] %v735_v35 }
  0x19   :  { %v752_v37 = vld [vmem:[%s1195_s0 + $0x5c] sm:$0xf]  ;;  %v415_v38 = vsel %vm322_vm0, %v413_v34, %v411_v36  ;;  %v402_v39 = vld [vmem:[#allocation0 + $0x103] ss:$8 sm:$0xf0]  }
  0x1a   :  { %208 = vst [vmem:[#allocation0 + $0xb8] sm:$0xf] %v752_v37  ;;  %v753_v40 = vld [vmem:[%s1195_s0 + $0x58] sm:$0xf]  ;;  %416 = vrot.lane.b32.xlu1 %v415_v38, %s806_s10  ;;  %v754_v41 = vld [vmem:[%s1195_s0 + $0x54] sm:$0xf] }
  0x1b   :  { %213 = vst [vmem:[#allocation0 + $0xb0] sm:$0xf] %v753_v40  ;;  %v755_v42 = vld [vmem:[%s1195_s0 + $0x50] sm:$0xf]  ;;  %v756_v43 = vld [vmem:[%s1195_s0 + $0x4c] sm:$0xf] }
  0x1c   :  { %v400_v44 = vld [vmem:[#allocation0 + $0x103] ss:$8 sm:$0xf]   ;;  %218 = vst [vmem:[#allocation0 + $0xa8] sm:$0xf] %v754_v41 }
  0x1d   :  { %223 = vst [vmem:[#allocation0 + $0xa0] sm:$0xf] %v755_v42  ;;  %228 = vst [vmem:[#allocation0 + $0x98] sm:$0xf] %v756_v43  ;;  %v757_v45 = vld [vmem:[%s1195_s0 + $0x48] sm:$0xf]  ;;  %v404_v46 = vsel %vm322_vm0, %v402_v39, %v400_v44 }
  0x1e   :  { %233 = vst [vmem:[#allocation0 + $0x90] sm:$0xf] %v757_v45  ;;  %v758_v47 = vld [vmem:[%s1195_s0 + $0x44] sm:$0xf]  ;;  %v759_v48 = vld [vmem:[%s1195_s0 + $0x40] sm:$0xf]  ;;  %405 = vrot.lane.b32.xlu0 %v404_v46, %s806_s10 }
  0x1f   :  { %v720_v49 = vld [vmem:[%s1195_s0 + $0xdc] sm:$0xf]  ;;  %v424_v50 = vld [vmem:[#allocation0 + $0x143] ss:$8 sm:$0xf0]  }
  0x20   :  { %238 = vst [vmem:[#allocation0 + $0x88] sm:$0xf] %v758_v47  ;;  %243 = vst [vmem:[#allocation0 + $0x80] sm:$0xf] %v759_v48  ;;  %v721_v51 = vld [vmem:[%s1195_s0 + $0xd8] sm:$0xf] }
  0x21   :  { %48 = vst [vmem:[#allocation0 + $0x1b8] sm:$0xf] %v720_v49  ;;  %53 = vst [vmem:[#allocation0 + $0x1b0] sm:$0xf] %v721_v51  ;;  %v722_v52 = vld [vmem:[%s1195_s0 + $0xd4] sm:$0xf] }
  0x22   :  { %v723_v53 = vld [vmem:[%s1195_s0 + $0xd0] sm:$0xf]  ;;  %v724_v54 = vld [vmem:[%s1195_s0 + $0xcc] sm:$0xf]  ;;  %58 = vst [vmem:[#allocation0 + $0x1a8] sm:$0xf] %v722_v52 }
  0x23   :  { %v422_v55 = vld [vmem:[#allocation0 + $0x143] ss:$8 sm:$0xf]   ;;  %63 = vst [vmem:[#allocation0 + $0x1a0] sm:$0xf] %v723_v53 }
  0x24   :  { %68 = vst [vmem:[#allocation0 + $0x198] sm:$0xf] %v724_v54  ;;  %v725_v56 = vld [vmem:[%s1195_s0 + $0xc8] sm:$0xf]  ;;  %v426_v57 = vsel %vm322_vm0, %v424_v50, %v422_v55  ;;  %v726_v58 = vld [vmem:[%s1195_s0 + $0xc4] sm:$0xf] }
  0x25   :  { %73 = vst [vmem:[#allocation0 + $0x190] sm:$0xf] %v725_v56  ;;  %v727_v59 = vld [vmem:[%s1195_s0 + $0xc0] sm:$0xf]  ;;  %v744_v60 = vld [vmem:[%s1195_s0 + $0x7c] sm:$0xf]  ;;  %427 = vrot.lane.b32.xlu1 %v426_v57, %s806_s10 }
  0x26   :  { %78 = vst [vmem:[#allocation0 + $0x188] sm:$0xf] %v726_v58  ;;  %83 = vst [vmem:[#allocation0 + $0x180] sm:$0xf] %v727_v59  ;;  %v745_v61 = vld [vmem:[%s1195_s0 + $0x78] sm:$0xf] }
  0x27   :  { %168 = vst [vmem:[#allocation0 + $0xf8] sm:$0xf] %v744_v60  ;;  %v746_v62 = vld [vmem:[%s1195_s0 + $0x74] sm:$0xf]  ;;  %v747_v63 = vld [vmem:[%s1195_s0 + $0x70] sm:$0xf] }
  0x28   :  { %v435_v0 = vld [vmem:[#allocation0 + $0x83] ss:$8 sm:$0xf0]   ;;  %173 = vst [vmem:[#allocation0 + $0xf0] sm:$0xf] %v745_v61 }
  0x29   :  { %178 = vst [vmem:[#allocation0 + $0xe8] sm:$0xf] %v746_v62  ;;  %183 = vst [vmem:[#allocation0 + $0xe0] sm:$0xf] %v747_v63  ;;  %v748_v1 = vld [vmem:[%s1195_s0 + $0x6c] sm:$0xf] }
  0x2a   :  { %188 = vst [vmem:[#allocation0 + $0xd8] sm:$0xf] %v748_v1  ;;  %v749_v2 = vld [vmem:[%s1195_s0 + $0x68] sm:$0xf]  ;;  %v750_v3 = vld [vmem:[%s1195_s0 + $0x64] sm:$0xf] }
  0x2b   :  { %v751_v4 = vld [vmem:[%s1195_s0 + $0x60] sm:$0xf]  ;;  %193 = vst [vmem:[#allocation0 + $0xd0] sm:$0xf] %v749_v2  ;;  %198 = vst [vmem:[#allocation0 + $0xc8] sm:$0xf] %v750_v3 }
  0x2c   :  { %v433_v5 = vld [vmem:[#allocation0 + $0x83] ss:$8 sm:$0xf]   ;;  %203 = vst [vmem:[#allocation0 + $0xc0] sm:$0xf] %v751_v4 }
  0x2d   :  { %v712_v6 = vld [vmem:[%s1195_s0 + $0xfc] sm:$0xf]  ;;  %v437_v7 = vsel %vm322_vm0, %v435_v0, %v433_v5  ;;  %v713_v8 = vld [vmem:[%s1195_s0 + $0xf8] sm:$0xf]  ;;  %v714_v9 = vld [vmem:[%s1195_s0 + $0xf4] sm:$0xf] }
  0x2e   :  { %8 = vst [vmem:[#allocation0 + $0x1f8] sm:$0xf] %v712_v6  ;;  %v715_v10 = vld [vmem:[%s1195_s0 + $0xf0] sm:$0xf]  ;;  %438 = vrot.lane.b32.xlu0 %v437_v7, %s806_s10  ;;  %13 = vst [vmem:[#allocation0 + $0x1f0] sm:$0xf] %v713_v8 }
  0x2f   :  { %v446_v11 = vld [vmem:[#allocation0 + $0x183] ss:$8 sm:$0xf0]   ;;  %18 = vst [vmem:[#allocation0 + $0x1e8] sm:$0xf] %v714_v9 }
  0x30   :  { %23 = vst [vmem:[#allocation0 + $0x1e0] sm:$0xf] %v715_v10  ;;  %v716_v12 = vld [vmem:[%s1195_s0 + $0xec] sm:$0xf]  ;;  %v717_v13 = vld [vmem:[%s1195_s0 + $0xe8] sm:$0xf] }
  0x31   :  { %28 = vst [vmem:[#allocation0 + $0x1d8] sm:$0xf] %v716_v12  ;;  %v718_v14 = vld [vmem:[%s1195_s0 + $0xe4] sm:$0xf]  ;;  %v719_v15 = vld [vmem:[%s1195_s0 + $0xe0] sm:$0xf] }
  0x32   :  { %v444_v16 = vld [vmem:[#allocation0 + $0x183] ss:$8 sm:$0xf]   ;;  %33 = vst [vmem:[#allocation0 + $0x1d0] sm:$0xf] %v717_v13  ;;  %s807_s0 = smov 16  }
  0x33   :  { %38 = vst [vmem:[#allocation0 + $0x1c8] sm:$0xf] %v718_v14  ;;  %43 = vst [vmem:[#allocation0 + $0x1c0] sm:$0xf] %v719_v15  ;;  %v448_v17 = vsel %vm322_vm0, %v446_v11, %v444_v16 }
  0x34   :  { %v457_v18 = vld [vmem:[#allocation0 + $0xc3] ss:$8 sm:$0xf0]   ;;  %449 = vrot.lane.b32.xlu1 %v448_v17, %s806_s10  ;;  %v477_v19 = vld [vmem:[#allocation0 + $0x2] ss:$8 sm:$0xf]  }
  0x35   :  { %v455_v20 = vld [vmem:[#allocation0 + $0xc3] ss:$8 sm:$0xf]   ;;  %v479_v21 = vld [vmem:[#allocation0 + $0x2] ss:$8 sm:$0xf0]  }
  0x36   :  { %v459_v22 = vsel %vm322_vm0, %v457_v18, %v455_v20  ;;  %v487_v24 = vld [vmem:[#allocation0 + $0x102] ss:$8 sm:$0xf]   ;;  %v481_v25 = vsel %vm322_vm0, %v479_v21, %v477_v19  ;;  %v564_v45 = vld [vmem:[#allocation0 + $0x1] ss:$8 sm:$0xf]  }
  0x37   :  { %460 = vrot.lane.b32.xlu0 %v459_v22, %s806_s10  ;;  %v468_v23 = vld [vmem:[#allocation0 + $0x1c3] ss:$8 sm:$0xf0]   ;;  %v489_v26 = vld [vmem:[#allocation0 + $0x102] ss:$8 sm:$0xf0]  }
  0x38   :  { %v498_v27 = vld [vmem:[#allocation0 + $0x42] ss:$8 sm:$0xf]   ;;  %v491_v31 = vsel %vm322_vm0, %v489_v26, %v487_v24  ;;  %v566_v48 = vld [vmem:[#allocation0 + $0x1] ss:$8 sm:$0xf0]  }
  0x39   :  { %v500_v29 = vld [vmem:[#allocation0 + $0x42] ss:$8 sm:$0xf0]   ;;  %v320_v49 = vld [vmem:[#allocation0] ss:$8 sm:$0xf]   ;;  %v568_v63 = vsel %vm322_vm0, %v566_v48, %v564_v45 }
  0x3a   :  { %v466_v28 = vld [vmem:[#allocation0 + $0x1c3] ss:$8 sm:$0xf]   ;;  %v502_v32 = vsel %vm322_vm0, %v500_v29, %v498_v27  ;;  %v509_v33 = vld [vmem:[#allocation0 + $0x142] ss:$8 sm:$0xf]  }
  0x3b   :  { %v470_v30 = vsel %vm322_vm0, %v468_v23, %v466_v28  ;;  %482 = vrot.lane.b32.xlu0 %v481_v25, %s807_s0  ;;  %v511_v34 = vld [vmem:[#allocation0 + $0x142] ss:$8 sm:$0xf0]   ;;  %v321_v50 = vld [vmem:[#allocation0] ss:$8 sm:$0xf0]  }
  0x3c   :  { %471 = vrot.lane.b32.xlu1 %v470_v30, %s806_s10  ;;  %v520_v35 = vld [vmem:[#allocation0 + $0x82] ss:$8 sm:$0xf]   ;;  %v513_v37 = vsel %vm322_vm0, %v511_v34, %v509_v33  ;;  %v327_v51 = vld [vmem:[#allocation0 + $0x40] ss:$8 sm:$0xf]   ;;  %v323_v52 = vsel %vm322_vm0, %v321_v50, %v320_v49 }
  0x3d   :  { %v522_v36 = vld [vmem:[#allocation0 + $0x82] ss:$8 sm:$0xf0]   ;;  %v329_v53 = vld [vmem:[#allocation0 + $0x40] ss:$8 sm:$0xf0]  }
  0x3e   :  { %v524_v38 = vsel %vm322_vm0, %v522_v36, %v520_v35  ;;  %v531_v39 = vld [vmem:[#allocation0 + $0x182] ss:$8 sm:$0xf]   ;;  %v354_v54 = vld [vmem:[#allocation0 + $0x100] ss:$8 sm:$0xf]   ;;  %v331_v59 = vsel %vm322_vm0, %v329_v53, %v327_v51 }
  0x3f   :  { %503 = vrot.lane.b32.xlu0 %v502_v32, %s807_s0  ;;  %v533_v40 = vld [vmem:[#allocation0 + $0x182] ss:$8 sm:$0xf0]   ;;  %v574_v55 = vld [vmem:[#allocation0 + $0x101] ss:$8 sm:$0xf]  }
  0x40   :  { %492 = vrot.lane.b32.xlu1 %v491_v31, %s807_s0  ;;  %v542_v41 = vld [vmem:[#allocation0 + $0xc2] ss:$8 sm:$0xf]   ;;  %v535_v46 = vsel %vm322_vm0, %v533_v40, %v531_v39  ;;  %v576_v56 = vld [vmem:[#allocation0 + $0x101] ss:$8 sm:$0xf0]  }
  0x41   :  { %v544_v42 = vld [vmem:[#allocation0 + $0xc2] ss:$8 sm:$0xf0]   ;;  %v585_v57 = vld [vmem:[#allocation0 + $0x41] ss:$8 sm:$0xf]   ;;  %v578_v13 = vsel %vm322_vm0, %v576_v56, %v574_v55 }
  0x42   :  { %v553_v43 = vld [vmem:[#allocation0 + $0x1c2] ss:$8 sm:$0xf]   ;;  %v546_v47 = vsel %vm322_vm0, %v544_v42, %v542_v41  ;;  %v587_v58 = vld [vmem:[#allocation0 + $0x41] ss:$8 sm:$0xf0]  }
  0x43   :  { %525 = vrot.lane.b32.xlu0 %v524_v38, %s807_s0  ;;  %v555_v44 = vld [vmem:[#allocation0 + $0x1c2] ss:$8 sm:$0xf0]   ;;  %325 = vst.msk [vmem:[%s1196_s1] sm:$0xff] %vm324_vm1, %v323_v52   ;;  %775 = vst.msk [vmem:[%s1196_s1 + $0x8] sm:$0xff] %vm324_vm1, %v331_v59   ;;  %v589_v14 = vsel %vm322_vm0, %v587_v58, %v585_v57 }
  0x44   :  { %514 = vrot.lane.b32.xlu1 %v513_v37, %s807_s0  ;;  %v356_v60 = vld [vmem:[#allocation0 + $0x100] ss:$8 sm:$0xf0]   ;;  %v557_v62 = vsel %vm322_vm0, %v555_v44, %v553_v43  ;;  %v596_v9 = vld [vmem:[#allocation0 + $0x141] ss:$8 sm:$0xf]  }
  0x45   :  { %v363_v61 = vld [vmem:[#allocation0 + $0x140] ss:$8 sm:$0xf]   ;;  %v358_v0 = vsel %vm322_vm0, %v356_v60, %v354_v54  ;;  %v598_v15 = vld [vmem:[#allocation0 + $0x141] ss:$8 sm:$0xf0]  }
  0x46   :  { %v365_v1 = vld [vmem:[#allocation0 + $0x140] ss:$8 sm:$0xf0]   ;;  %778 = vst.msk [vmem:[%s1196_s1 + $0x20] sm:$0xff] %vm324_vm1, %v358_v0   ;;  %v600_v21 = vsel %vm322_vm0, %v598_v15, %v596_v9 }
  0x47   :  { %547 = vrot.lane.b32.xlu0 %v546_v47, %s807_s0  ;;  %v336_v2 = vld [vmem:[#allocation0 + $0x80] ss:$8 sm:$0xf]   ;;  %v367_v3 = vsel %vm322_vm0, %v365_v1, %v363_v61  ;;  %v607_v18 = vld [vmem:[#allocation0 + $0x81] ss:$8 sm:$0xf]  }
  0x48   :  { %536 = vrot.lane.b32.xlu1 %v535_v46, %s807_s0  ;;  %v338_v4 = vld [vmem:[#allocation0 + $0x80] ss:$8 sm:$0xf0]   ;;  %779 = vst.msk [vmem:[%s1196_s1 + $0x28] sm:$0xff] %vm324_vm1, %v367_v3  }
  0x49   :  { %v372_v5 = vld [vmem:[#allocation0 + $0x180] ss:$8 sm:$0xf]   ;;  %v340_v6 = vsel %vm322_vm0, %v338_v4, %v336_v2  ;;  %v609_v19 = vld [vmem:[#allocation0 + $0x81] ss:$8 sm:$0xf0]  }
  0x4a   :  { %v374_v7 = vld [vmem:[#allocation0 + $0x180] ss:$8 sm:$0xf0]   ;;  %776 = vst.msk [vmem:[%s1196_s1 + $0x10] sm:$0xff] %vm324_vm1, %v340_v6   ;;  %v611_v22 = vsel %vm322_vm0, %v609_v19, %v607_v18 }
  0x4b   :  { %v345_v8 = vld [vmem:[#allocation0 + $0xc0] ss:$8 sm:$0xf]   ;;  %569 = vrot.lane.b32.xlu0 %v568_v63, %s808_s28  ;;  %v376_v10 = vsel %vm322_vm0, %v374_v7, %v372_v5  ;;  %v618_v23 = vld [vmem:[#allocation0 + $0x181] ss:$8 sm:$0xf]  }
  0x4c   :  { %558 = vrot.lane.b32.xlu1 %v557_v62, %s807_s0  ;;  %v347_v11 = vld [vmem:[#allocation0 + $0xc0] ss:$8 sm:$0xf0]   ;;  %780 = vst.msk [vmem:[%s1196_s1 + $0x30] sm:$0xff] %vm324_vm1, %v376_v10  }
  0x4d   :  { %v381_v12 = vld [vmem:[#allocation0 + $0x1c0] ss:$8 sm:$0xf]   ;;  %v349_v16 = vsel %vm322_vm0, %v347_v11, %v345_v8  ;;  %v620_v24 = vld [vmem:[#allocation0 + $0x181] ss:$8 sm:$0xf0]  }
  0x4e   :  { %v383_v17 = vld [vmem:[#allocation0 + $0x1c0] ss:$8 sm:$0xf0]   ;;  %777 = vst.msk [vmem:[%s1196_s1 + $0x18] sm:$0xff] %vm324_vm1, %v349_v16   ;;  %v622_v27 = vsel %vm322_vm0, %v620_v24, %v618_v23 }
  0x4f   :  { %v385_v20 = vsel %vm322_vm0, %v383_v17, %v381_v12  ;;  %590 = vrot.lane.b32.xlu0 %v589_v14, %s808_s28  ;;  %v629_v25 = vld [vmem:[#allocation0 + $0xc1] ss:$8 sm:$0xf]  }
  0x50   :  { %781 = vst.msk [vmem:[%s1196_s1 + $0x38] sm:$0xff] %vm324_vm1, %v385_v20   ;;  %579 = vrot.lane.b32.xlu1 %v578_v13, %s808_s28  ;;  %v631_v26 = vld [vmem:[#allocation0 + $0xc1] ss:$8 sm:$0xf0]  }
  0x51   :  { %v633_v28 = vsel %vm322_vm0, %v631_v26, %v629_v25  ;;  %v640_v29 = vld [vmem:[#allocation0 + $0x1c1] ss:$8 sm:$0xf]  }
  0x52   :  { %v642_v30 = vld [vmem:[#allocation0 + $0x1c1] ss:$8 sm:$0xf0]  }
  0x53   :  { %612 = vrot.lane.b32.xlu0 %v611_v22, %s808_s28  ;;  %v644_v31 = vsel %vm322_vm0, %v642_v30, %v640_v29 }
  0x54   :  { %601 = vrot.lane.b32.xlu1 %v600_v21, %s808_s28 }
  0x57   :  { %634 = vrot.lane.b32.xlu0 %v633_v28, %s808_s28 }
  0x58   :  { %623 = vrot.lane.b32.xlu1 %v622_v27, %s808_s28 }
  0x5c   :  { %645 = vrot.lane.b32.xlu1 %v644_v31, %s808_s28 }
  0x87   :  { %v396_v32 = vpop.permute.xlu0 %395  }
  0x88   :  { %398 = vst.msk [vmem:[%s1196_s1] sm:$0xff] %vm397_vm2, %v396_v32  }
  0x8c   :  { %v417_v33 = vpop.permute.xlu1 %416  }
  0x8d   :  { %783 = vst.msk [vmem:[%s1196_s1 + $0x8] sm:$0xff] %vm397_vm2, %v417_v33  }
  0x90   :  { %v406_v34 = vpop.permute.xlu0 %405  }
  0x91   :  { %782 = vst.msk [vmem:[%s1196_s1 + $0x20] sm:$0xff] %vm397_vm2, %v406_v34  }
  0x97   :  { %v428_v35 = vpop.permute.xlu1 %427  }
  0x98   :  { %784 = vst.msk [vmem:[%s1196_s1 + $0x28] sm:$0xff] %vm397_vm2, %v428_v35  }
  0xa0   :  { %v439_v36 = vpop.permute.xlu0 %438  }
  0xa1   :  { %785 = vst.msk [vmem:[%s1196_s1 + $0x10] sm:$0xff] %vm397_vm2, %v439_v36  }
  0xa6   :  { %v450_v37 = vpop.permute.xlu1 %449  }
  0xa7   :  { %786 = vst.msk [vmem:[%s1196_s1 + $0x30] sm:$0xff] %vm397_vm2, %v450_v37  }
  0xa9   :  { %v461_v38 = vpop.permute.xlu0 %460  }
  0xaa   :  { %787 = vst.msk [vmem:[%s1196_s1 + $0x18] sm:$0xff] %vm397_vm2, %v461_v38  }
  0xad   :  { %v483_v40 = vpop.permute.xlu0 %482  }
  0xae   :  { %v472_v39 = vpop.permute.xlu1 %471   ;;  %485 = vst.msk [vmem:[%s1196_s1] sm:$0xff] %vm484_vm3, %v483_v40  }
  0xaf   :  { %788 = vst.msk [vmem:[%s1196_s1 + $0x38] sm:$0xff] %vm397_vm2, %v472_v39  }
  0xb1   :  { %v504_v42 = vpop.permute.xlu0 %503  }
  0xb2   :  { %v493_v41 = vpop.permute.xlu1 %492   ;;  %790 = vst.msk [vmem:[%s1196_s1 + $0x8] sm:$0xff] %vm484_vm3, %v504_v42  }
  0xb3   :  { %789 = vst.msk [vmem:[%s1196_s1 + $0x20] sm:$0xff] %vm484_vm3, %v493_v41  }
  0xb5   :  { %v526_v44 = vpop.permute.xlu0 %525  }
  0xb6   :  { %v515_v43 = vpop.permute.xlu1 %514   ;;  %792 = vst.msk [vmem:[%s1196_s1 + $0x10] sm:$0xff] %vm484_vm3, %v526_v44  }
  0xb7   :  { %791 = vst.msk [vmem:[%s1196_s1 + $0x28] sm:$0xff] %vm484_vm3, %v515_v43  }
  0xb9   :  { %v548_v46 = vpop.permute.xlu0 %547  }
  0xba   :  { %v537_v45 = vpop.permute.xlu1 %536   ;;  %794 = vst.msk [vmem:[%s1196_s1 + $0x18] sm:$0xff] %vm484_vm3, %v548_v46  }
  0xbb   :  { %793 = vst.msk [vmem:[%s1196_s1 + $0x30] sm:$0xff] %vm484_vm3, %v537_v45  }
  0xbd   :  { %v570_v48 = vpop.permute.xlu0 %569  }
  0xbe   :  { %v559_v47 = vpop.permute.xlu1 %558   ;;  %572 = vst.msk [vmem:[%s1196_s1] sm:$0xff] %vm571_vm4, %v570_v48  }
  0xbf   :  { %795 = vst.msk [vmem:[%s1196_s1 + $0x38] sm:$0xff] %vm484_vm3, %v559_v47  }
  0xc1   :  { %v591_v50 = vpop.permute.xlu0 %590  }
  0xc2   :  { %v580_v49 = vpop.permute.xlu1 %579   ;;  %797 = vst.msk [vmem:[%s1196_s1 + $0x8] sm:$0xff] %vm571_vm4, %v591_v50  }
  0xc3   :  { %796 = vst.msk [vmem:[%s1196_s1 + $0x20] sm:$0xff] %vm571_vm4, %v580_v49  }
  0xc5   :  { %v613_v52 = vpop.permute.xlu0 %612  }
  0xc6   :  { %v602_v51 = vpop.permute.xlu1 %601   ;;  %799 = vst.msk [vmem:[%s1196_s1 + $0x10] sm:$0xff] %vm571_vm4, %v613_v52  }
  0xc7   :  { %798 = vst.msk [vmem:[%s1196_s1 + $0x28] sm:$0xff] %vm571_vm4, %v602_v51  }
  0xc9   :  { %v635_v54 = vpop.permute.xlu0 %634  }
  0xca   :  { %v624_v53 = vpop.permute.xlu1 %623   ;;  %801 = vst.msk [vmem:[%s1196_s1 + $0x18] sm:$0xff] %vm571_vm4, %v635_v54  }
  0xcb   :  { %800 = vst.msk [vmem:[%s1196_s1 + $0x30] sm:$0xff] %vm571_vm4, %v624_v53  }
  0xce   :  { %v646_v55 = vpop.permute.xlu1 %645  }
  0xcf   :  { %802 = vst.msk [vmem:[%s1196_s1 + $0x38] sm:$0xff] %vm571_vm4, %v646_v55  }

// kernel: unet2d_forward.1
= control target key start
LH: loop header
LB: loop body
LE: loop exit
PB: predicated region body
PF: predicated region fallthrough
CT: control target
= control target key end

     0   :  { %v2359_v1 = vmov 0.0|0.0   ;;  %vm2360_vm0 = vmmov 0   ;;  %v2361_v44 = vmov 0.0   ;;  %v332_v59 = vlaneseq  ;;  %s3160_s1 = inlined_call_operand.vmem [shape: bf16[256,128], index: 1, kind: input, shape index: {}]   ;;  %s3161_s0 = inlined_call_operand.vmem [shape: bf16[8,256], index: 0, kind: input, shape index: {}]   ;;  %s3162_s15 = inlined_call_operand.vmem [shape: f32[128,128], index: 15, kind: input, shape index: {}]   ;;  %s3163_s4 = inlined_call_operand.vmem [shape: bf16[128,64], index: 4, kind: input, shape index: {}]   ;;  %s3164_s2 = inlined_call_operand.vmem [shape: f32[1,128], index: 2, kind: input, shape index: {}]   ;;  %s3165_s3 = inlined_call_operand.vmem [shape: f32[1,128], index: 3, kind: input, shape index: {}]   ;;  %s3166_s16 = inlined_call_operand.vmem [shape: f32[64,64], index: 16, kind: input, shape index: {}]   ;;  %s3167_s7 = inlined_call_operand.vmem [shape: bf16[64,64], index: 7, kind: input, shape index: {}]   ;;  %s3168_s9 = inlined_call_operand.vmem [shape: bf16[64,128], index: 9, kind: input, shape index: {}]   ;;  %s3169_s5 = inlined_call_operand.vmem [shape: f32[1,64], index: 5, kind: input, shape index: {}]   ;;  %s3170_s6 = inlined_call_operand.vmem [shape: f32[1,64], index: 6, kind: input, shape index: {}]   ;;  %s3171_s8 = inlined_call_operand.vmem [shape: f32[1,64], index: 8, kind: input, shape index: {}]   ;;  %s3172_s12 = inlined_call_operand.vmem [shape: bf16[256,256], index: 12, kind: input, shape index: {}]   ;;  %s3173_s17 = inlined_call_operand.vmem [shape: f32[256,256], index: 17, kind: input, shape index: {}]   ;;  %s3174_s10 = inlined_call_operand.vmem [shape: f32[1,128], index: 10, kind: input, shape index: {}]   ;;  %s3175_s11 = inlined_call_operand.vmem [shape: f32[1,128], index: 11, kind: input, shape index: {}]   ;;  %s3176_s13 = inlined_call_operand.vmem [shape: f32[1,256], index: 13, kind: input, shape index: {}]   ;;  %s3177_s14 = inlined_call_operand.vmem [shape: f32[1,256], index: 14, kind: input, shape index: {}]   ;;  %s3178_s18 = inlined_call_operand.vmem [shape: f32[8,256], index: 18, kind: output, shape index: {}]  }
   0x1   :  { %3181 = sst [smem:[#allocation2_spill]] %s3160_s1  ;;  %2040 = vmatprep.subr.bf16.mxu0 %v2359_v1  ;;  %1861 = vmatprep.mubr.msk.f32.mxu0 %vm2360_vm0, %v2361_v44  ;;  %v2285_v57 = vld [vmem:[%s3163_s4] sm:$0xff]   ;;  %v2286_v58 = vld [vmem:[%s3163_s4 + $0x8] sm:$0xff]   ;;  %vm545_vm1 = vcmask 523264  }
   0x2   :  { %3182 = sst [smem:[#allocation3_spill]] %s3161_s0  ;;  %s3184_s29 = sld [smem:[#allocation2_spill]]  ;;  %v2620_v60 = vshrl.u32 %v332_v59, 7 }
   0x3   :  { %3183 = sst [smem:[#allocation4_spill]] %s3162_s15  ;;  %s3185_s23 = sld [smem:[#allocation3_spill]] }
   0x4   :  { %s3186_s26 = sld [smem:[#allocation4_spill]]  ;;  %v2623_v61 = vsub.s32 0, %v2620_v60 }
   0x8   :  { %v2267_v0 = vld [vmem:[%s3184_s29 + $0x40] sm:$0xff]   ;;  %v2269_v3 = vld [vmem:[%s3184_s29 + $0x48] sm:$0xff]   ;;  %v2271_v5 = vld [vmem:[%s3184_s29 + $0x50] sm:$0xff]  }
   0x9   :  { %v2268_v2 = vld [vmem:[%s3184_s29] sm:$0xff]   ;;  %1667 = vmatprep.subr.bf16.mxu1 %v2267_v0  ;;  %v2270_v4 = vld [vmem:[%s3184_s29 + $0x8] sm:$0xff]   ;;  %v2272_v6 = vld [vmem:[%s3184_s29 + $0x10] sm:$0xff]  }
   0xa   :  { %1668 = vmatpush3.bf16.msra.mxu1 %v2268_v2  ;;  %v2273_v7 = vld [vmem:[%s3184_s29 + $0x58] sm:$0xff]   ;;  %v2275_v9 = vld [vmem:[%s3184_s29 + $0x60] sm:$0xff]   ;;  %v2277_v11 = vld [vmem:[%s3184_s29 + $0x68] sm:$0xff]  }
   0xb   :  { %1669 = vmatprep.subr.bf16.mxu1 %v2269_v3  ;;  %v2274_v8 = vld [vmem:[%s3184_s29 + $0x18] sm:$0xff]   ;;  %v2276_v10 = vld [vmem:[%s3184_s29 + $0x20] sm:$0xff]   ;;  %v62_v14 = vld [vmem:[%s3186_s26 + $0x8] sm:$0xff] }
   0xc   :  { %v60_v12 = vld [vmem:[%s3185_s23] sm:$0xff]  ;;  %v2278_v17 = vld [vmem:[%s3184_s29 + $0x28] sm:$0xff]   ;;  %v63_v18 = vld [vmem:[%s3186_s26 + $0x10] sm:$0xff] }
   0xd   :  { %v61_v13 = vld [vmem:[%s3186_s26] sm:$0xff]  ;;  %v1594_v15 = vcombine.high %v60_v12, %v60_v12  ;;  %v64_v19 = vld [vmem:[%s3186_s26 + $0x18] sm:$0xff]  ;;  %v2279_v20 = vld [vmem:[%s3184_s29 + $0x70] sm:$0xff]   ;;  %v1593_v30 = vcombine.low %v60_v12, %v60_v12 }
   0xe   :  { %1670 = vmatpush3.bf16.msra.mxu1 %v2270_v4  ;;  %v2500_v16 = vpack.c.bf16 %v62_v14, %v61_v13  ;;  %v2516_v21 = vpack.c.bf16 %v64_v19, %v63_v18  ;;  %v2280_v22 = vld [vmem:[%s3184_s29 + $0x30] sm:$0xff]   ;;  %v65_v23 = vld [vmem:[%s3186_s26 + $0x20] sm:$0xff]  ;;  %v66_v24 = vld [vmem:[%s3186_s26 + $0x28] sm:$0xff] }
   0xf   :  { %1671 = vmatprep.subr.bf16.mxu1 %v2271_v5  ;;  %244 = vmatprep.mubr.bf16.mxu1 %v1594_v15  ;;  %v2281_v25 = vld [vmem:[%s3184_s29 + $0x78] sm:$0xff]   ;;  %v2532_v26 = vpack.c.bf16 %v66_v24, %v65_v23  ;;  %v67_v28 = vld [vmem:[%s3186_s26 + $0x30] sm:$0xff]  ;;  %v69_v32 = vld [vmem:[%s3186_s26 + $0x40] sm:$0xff] }
  0x10   :  { %2042 = vmatpush3.bf16.msra.mxu0 %v2500_v16  ;;  %v2282_v27 = vld [vmem:[%s3184_s29 + $0x38] sm:$0xff]   ;;  %v70_v33 = vld [vmem:[%s3186_s26 + $0x48] sm:$0xff]  ;;  %v71_v35 = vld [vmem:[%s3186_s26 + $0x50] sm:$0xff] }
  0x11   :  { %2043 = vmatprep.subr.bf16.mxu0 %v2359_v1  ;;  %v68_v29 = vld [vmem:[%s3186_s26 + $0x38] sm:$0xff]  ;;  %v2564_v34 = vpack.c.bf16 %v70_v33, %v69_v32  ;;  %v73_v38 = vld [vmem:[%s3186_s26 + $0x60] sm:$0xff]  ;;  %v74_v39 = vld [vmem:[%s3186_s26 + $0x68] sm:$0xff] }
  0x12   :  { %1672 = vmatpush3.bf16.msra.mxu1 %v2272_v6  ;;  %v2545_v31 = vpack.c.bf16 %v68_v29, %v67_v28  ;;  %v72_v36 = vld [vmem:[%s3186_s26 + $0x58] sm:$0xff]  ;;  %v2588_v40 = vpack.c.bf16 %v74_v39, %v73_v38  ;;  %v75_v41 = vld [vmem:[%s3186_s26 + $0x70] sm:$0xff]  ;;  %v2289_v13 = vld [vmem:[%s3163_s4 + $0x20] sm:$0xff]  }
  0x13   :  { %1673 = vmatprep.subr.bf16.mxu1 %v2273_v7  ;;  %v2576_v37 = vpack.c.bf16 %v72_v36, %v71_v35  ;;  %v76_v42 = vld [vmem:[%s3186_s26 + $0x78] sm:$0xff]  ;;  %v2290_v14 = vld [vmem:[%s3163_s4 + $0x28] sm:$0xff]   ;;  %v2291_v15 = vld [vmem:[%s3163_s4 + $0x30] sm:$0xff]  }
  0x14   :  { %2045 = vmatpush3.bf16.msra.mxu0 %v2516_v21  ;;  %v2600_v43 = vpack.c.bf16 %v76_v42, %v75_v41  ;;  %v2288_v12 = vld [vmem:[%s3163_s4 + $0x18] sm:$0xff]   ;;  %v537_v33 = vld [vmem:[%s3166_s16] sm:$0xff]  ;;  %v538_v35 = vld [vmem:[%s3166_s16 + $0x8] sm:$0xff] }
  0x15   :  { %2046 = vmatprep.subr.bf16.mxu0 %v2359_v1  ;;  %v2065_v36 = vpack.c.bf16 %v538_v35, %v537_v33  ;;  %v539_v38 = vld [vmem:[%s3166_s16 + $0x10] sm:$0xff]  ;;  %v540_v39 = vld [vmem:[%s3166_s16 + $0x18] sm:$0xff]  ;;  %v541_v42 = vld [vmem:[%s3166_s16 + $0x20] sm:$0xff] }
  0x16   :  { %1674 = vmatpush3.bf16.msra.mxu1 %v2274_v8  ;;  %v2068_v41 = vpack.c.bf16 %v540_v39, %v539_v38  ;;  %v1622_v33 = vld [vmem:[%s3170_s6] ss:$0 sm:$0xff] }
  0x17   :  { %1675 = vmatprep.subr.bf16.mxu1 %v2275_v9 }
  0x18   :  { %2048 = vmatpush3.bf16.msra.mxu0 %v2532_v26 }
  0x19   :  { %2049 = vmatprep.subr.bf16.mxu0 %v2359_v1 }
  0x1a   :  { %1676 = vmatpush3.bf16.msra.mxu1 %v2276_v10 }
  0x1b   :  { %1677 = vmatprep.subr.bf16.mxu1 %v2277_v11  ;;  %v2287_v11 = vld [vmem:[%s3163_s4 + $0x10] sm:$0xff]  }
  0x1c   :  { %2051 = vmatpush3.bf16.msra.mxu0 %v2545_v31 }
  0x1d   :  { %2052 = vmatprep.subr.bf16.mxu0 %v2359_v1 }
  0x1e   :  { %1678 = vmatpush3.bf16.msra.mxu1 %v2278_v17  ;;  %v2292_v17 = vld [vmem:[%s3163_s4 + $0x38] sm:$0xff]  }
  0x1f   :  { %1679 = vmatprep.subr.bf16.mxu1 %v2279_v20 }
  0x20   :  { %2054 = vmatpush3.bf16.msra.mxu0 %v2564_v34 }
  0x21   :  { %2055 = vmatprep.subr.bf16.mxu0 %v2359_v1 }
  0x22   :  { %1680 = vmatpush3.bf16.msra.mxu1 %v2280_v22  ;;  %v252_v22 = vld [vmem:[%s3164_s2] sm:$0x1] }
  0x23   :  { %1681 = vmatprep.subr.bf16.mxu1 %v2281_v25 }
  0x24   :  { %2057 = vmatpush3.bf16.msra.mxu0 %v2576_v37 }
  0x25   :  { %2058 = vmatprep.subr.bf16.mxu0 %v2359_v1 }
  0x26   :  { %1682 = vmatpush3.bf16.msra.mxu1 %v2282_v27  ;;  %v1611_v27 = vld [vmem:[%s3165_s3] ss:$0 sm:$0xff] }
  0x27   :  { %2016 = vmatprep.subr.bf16.mxu1 %v2359_v1 }
  0x28   :  { %2060 = vmatpush3.bf16.msra.mxu0 %v2588_v40 }
  0x29   :  { %245 = vmatmul.mubr.bf16.vlgmr.msra.gmra.mrb[0].mxu1 %v1593_v30  ;;  %2061 = vmatprep.subr.bf16.mxu0 %v2359_v1 }
  0x2a   :  { %2018 = vmatpush3.bf16.msra.mxu1 %v2500_v16  ;;  %1826 = vmatprep.mubr.msk.f32.mxu1 %vm2360_vm0, %v2361_v44 }
  0x2b   :  { %2019 = vmatprep.subr.bf16.mxu1 %v2359_v1 }
  0x2c   :  { %2063 = vmatpush3.bf16.msra.mxu0 %v2600_v43 }
  0x2d   :  { %2064 = vmatprep.subr.bf16.mxu0 %v2359_v1 }
  0x2e   :  { %2021 = vmatpush3.bf16.msra.mxu1 %v2516_v21 }
  0x2f   :  { %2022 = vmatprep.subr.bf16.mxu1 %v2359_v1 }
  0x32   :  { %2024 = vmatpush3.bf16.msra.mxu1 %v2532_v26 }
  0x33   :  { %2025 = vmatprep.subr.bf16.mxu1 %v2359_v1 }
  0x36   :  { %2027 = vmatpush3.bf16.msra.mxu1 %v2545_v31 }
  0x37   :  { %2028 = vmatprep.subr.bf16.mxu1 %v2359_v1 }
  0x3a   :  { %2030 = vmatpush3.bf16.msra.mxu1 %v2564_v34 }
  0x3b   :  { %2031 = vmatprep.subr.bf16.mxu1 %v2359_v1 }
  0x3e   :  { %2033 = vmatpush3.bf16.msra.mxu1 %v2576_v37 }
  0x3f   :  { %2034 = vmatprep.subr.bf16.mxu1 %v2359_v1 }
  0x42   :  { %2036 = vmatpush3.bf16.msra.mxu1 %v2588_v40 }
  0x43   :  { %2037 = vmatprep.subr.bf16.mxu1 %v2359_v1 }
  0x46   :  { %2039 = vmatpush3.bf16.msra.mxu1 %v2600_v43 }
  0x47   :  { %1864 = vmatprep.subr.bf16.mxu1 %v2361_v44 }
  0xfc   :  { %v1683_v45 = vpop.f32.mrb[0].mxu1 }
  0xfd   :  { %v1684_v46 = vpop.f32.mrb[1].mxu1 }
  0xfe   :  { %v1685_v47 = vadd.f32 %v1684_v46, %v1683_v45  ;;  %v1686_v48 = vpop.f32.mrb[2].mxu1  ;;  %v542_v45 = vld [vmem:[%s3166_s16 + $0x28] sm:$0xff] }
  0xff   :  { %v1687_v49 = vpop.f32.mrb[3].mxu1  ;;  %v2071_v46 = vpack.c.bf16 %v542_v45, %v541_v42  ;;  %v544_v48 = vld [vmem:[%s3166_s16 + $0x38] sm:$0xff]  ;;  %v1623_v42 = vld [vmem:[%s3171_s8] ss:$0 sm:$0xff] }
 0x100   :  { %v254_v50 = vrot.slane %v1685_v47, 4 }
 0x102   :  { %v255_v51 = vadd.f32 %v1685_v47, %v254_v50 }
 0x104   :  { %v256_v52 = vrot.slane %v255_v51, 2 }
 0x106   :  { %v257_v53 = vadd.f32 %v256_v52, %v255_v51 }
 0x108   :  { %v258_v54 = vrot.slane %v257_v53, 1 }
 0x10a   :  { %v259_v55 = vadd.f32 %v258_v54, %v257_v53 }
 0x10c   :  { %v261_v56 = vmul.f32 0.125, %v259_v55 }
 0x10e   :  { %1827 = vmatmul.mubr.f32.vlgmr.msra.gmra.mrb[4].mxu1 %v261_v56 }
 0x10f   :  { %1880 = vmatprep.mubr.msk.bf16.mxu1 %vm2360_vm0, %v2361_v44  ;;  %1865 = vmatpush3.bf16.msra.mxu1 %v2285_v57 }
 0x110   :  { %1866 = vmatprep.subr.bf16.mxu1 %v2361_v44 }
 0x113   :  { %1867 = vmatpush3.bf16.msra.mxu1 %v2286_v58 }
 0x114   :  { %1868 = vmatprep.subr.bf16.mxu1 %v2361_v44 }
 0x117   :  { %1869 = vmatpush3.bf16.msra.mxu1 %v2287_v11 }
 0x118   :  { %1870 = vmatprep.subr.bf16.mxu1 %v2361_v44 }
 0x11b   :  { %1871 = vmatpush3.bf16.msra.mxu1 %v2288_v12 }
 0x11c   :  { %1872 = vmatprep.subr.bf16.mxu1 %v2361_v44 }
 0x11f   :  { %1873 = vmatpush3.bf16.msra.mxu1 %v2289_v13 }
 0x120   :  { %1874 = vmatprep.subr.bf16.mxu1 %v2361_v44 }
 0x123   :  { %1875 = vmatpush3.bf16.msra.mxu1 %v2290_v14  ;;  %v2293_v14 = vld [vmem:[%s3167_s7] sm:$0xff]  }
 0x124   :  { %1876 = vmatprep.subr.bf16.mxu1 %v2361_v44 }
 0x127   :  { %1877 = vmatpush3.bf16.msra.mxu1 %v2291_v15  ;;  %v2294_v15 = vld [vmem:[%s3167_s7 + $0x8] sm:$0xff]  }
 0x128   :  { %1878 = vmatprep.subr.bf16.mxu1 %v2361_v44 }
 0x12b   :  { %1879 = vmatpush3.bf16.msra.mxu1 %v2292_v17  ;;  %v2295_v17 = vld [vmem:[%s3167_s7 + $0x10] sm:$0xff]  }
 0x12c   :  { %2076 = vmatprep.subr.bf16.mxu1 %v2359_v1 }
 0x1e1   :  { %v328_v62 = vpop.f32.mrb[4].mxu1 }
 0x1e2   :  { %v335_v63 = vrot.slane %v328_v62, %v2623_v61  ;;  %v1828_v0 = vpop.f32.mrb[5].mxu1 }
 0x1e4   :  { %v336_v2 = vsub.f32 %v1685_v47, %v335_v63  ;;  %v543_v47 = vld [vmem:[%s3166_s16 + $0x30] sm:$0xff] }
 0x1e5   :  { %v2074_v49 = vpack.c.bf16 %v544_v48, %v543_v47 }
 0x1e6   :  { %v337_v3 = vmul.f32 %v336_v2, %v336_v2 }
 0x1e8   :  { %v338_v4 = vrot.slane %v337_v3, 4 }
 0x1ea   :  { %v339_v5 = vadd.f32 %v338_v4, %v337_v3 }
 0x1ec   :  { %v340_v6 = vrot.slane %v339_v5, 2 }
 0x1ee   :  { %v341_v7 = vadd.f32 %v340_v6, %v339_v5 }
 0x1f0   :  { %v342_v8 = vrot.slane %v341_v7, 1 }
 0x1f2   :  { %v343_v9 = vadd.f32 %v342_v8, %v341_v7 }
 0x1f4   :  { %v344_v10 = vmul.f32 0.125, %v343_v9 }
 0x1f6   :  { %1862 = vmatmul.mubr.f32.vlgmr.msra.gmra.mrb[0].mxu0 %v344_v10 }
 0x1f7   :  { %1900 = vmatprep.mubr.msk.f32.mxu0 %vm2360_vm0, %v2361_v44  ;;  %2066 = vmatpush3.bf16.msra.mxu0 %v2065_v36 }
 0x1f8   :  { %2067 = vmatprep.subr.bf16.mxu0 %v2359_v1 }
 0x1fb   :  { %2069 = vmatpush3.bf16.msra.mxu0 %v2068_v41 }
 0x1fc   :  { %2070 = vmatprep.subr.bf16.mxu0 %v2359_v1 }
 0x1ff   :  { %2072 = vmatpush3.bf16.msra.mxu0 %v2071_v46 }
 0x200   :  { %2073 = vmatprep.subr.bf16.mxu0 %v2359_v1 }
 0x203   :  { %2075 = vmatpush3.bf16.msra.mxu0 %v2074_v49 }
 0x204   :  { %1922 = vmatprep.subr.bf16.mxu0 %v2361_v44 }
 0x2c9   :  { %v411_v18 = vpop.f32.mrb[0].mxu0 }
 0x2ca   :  { %v412_v19 = vadd.f32 1e-05, %v411_v18  ;;  %v1863_v20 = vpop.f32.mrb[1].mxu0  ;;  %v2296_v18 = vld [vmem:[%s3167_s7 + $0x18] sm:$0xff]  }
 0x2cb   :  { %v2298_v20 = vld [vmem:[%s3168_s9 + $0x8] sm:$0xff]  }
 0x2cc   :  { %2349 = vrsqrt.f32 %v412_v19  ;;  %v2297_v19 = vld [vmem:[%s3168_s9] sm:$0xff]  }
 0x2d6   :  { %v2350_v23 = vpop.eup %2349 }
 0x2d7   :  { %v416_v24 = vmul.f32 %v2350_v23, %v252_v22  ;;  %v2299_v22 = vld [vmem:[%s3168_s9 + $0x10] sm:$0xff]  }
 0x2d9   :  { %v420_v25 = vrot.slane %v416_v24, %v2623_v61 }
 0x2db   :  { %v421_v28 = vmul.f32 %v420_v25, %v336_v2 }
 0x2dd   :  { %v428_v29 = vadd.f32 %v1611_v27, %v421_v28  ;;  %v535_v27 = vld [vmem:[%s3169_s5] sm:$0x1] }
 0x2df   :  { %v429_v30 = vmax.f32 %v428_v29, 0.0 }
 0x2e1   :  { %v2659_v32 = vpack.c.bf16 %v429_v30, %v429_v30 }
 0x2e3   :  { %1881 = vmatmul.mubr.bf16.vlgmr.msra.gmra.mrb[8].mxu1 %v2659_v32 }
 0x2e4   :  { %1919 = vmatprep.mubr.msk.f32.mxu1 %vm2360_vm0, %v2361_v44  ;;  %2078 = vmatpush3.bf16.msra.mxu1 %v2065_v36 }
 0x2e5   :  { %2079 = vmatprep.subr.bf16.mxu1 %v2359_v1 }
 0x2e8   :  { %2081 = vmatpush3.bf16.msra.mxu1 %v2068_v41  ;;  %v2300_v41 = vld [vmem:[%s3168_s9 + $0x18] sm:$0xff]  }
 0x2e9   :  { %2082 = vmatprep.subr.bf16.mxu1 %v2359_v1 }
 0x2ec   :  { %2084 = vmatpush3.bf16.msra.mxu1 %v2071_v46 }
 0x2ed   :  { %2085 = vmatprep.subr.bf16.mxu1 %v2359_v1 }
 0x2f0   :  { %2087 = vmatpush3.bf16.msra.mxu1 %v2074_v49 }
 0x2f1   :  { %1934 = vmatprep.subr.bf16.mxu1 %v2361_v44 }
 0x3b6   :  { %v529_v50 = vpop.f32.mrb[8].mxu1 }
 0x3b7   :  { %v546_v51 = vsel %vm545_vm1, %v529_v50, 0.0  ;;  %v1882_v52 = vpop.f32.mrb[9].mxu1 }
 0x3b8   :  { %v547_v53 = vrot.slane %v546_v51, 4  ;;  %v532_v54 = vpop.f32.mrb[10].mxu1 }
 0x3b9   :  { %v1883_v55 = vpop.f32.mrb[11].mxu1 }
 0x3ba   :  { %v548_v56 = vadd.f32 %v547_v53, %v546_v51 }
 0x3bc   :  { %v549_v57 = vrot.slane %v548_v56, 2 }
 0x3be   :  { %v550_v58 = vadd.f32 %v549_v57, %v548_v56  ;;  %v2307_v56 = vld [vmem:[%s3172_s12 + $0x20] ss:$8 sps:$4 sm:$0xff]   ;;  %v2312_v57 = vld [vmem:[%s3172_s12 + $0x34] ss:$8 sps:$4 sm:$0xff]  }
 0x3c0   :  { %v551_v59 = vrot.slane %v550_v58, 1 }
 0x3c2   :  { %v552_v62 = vadd.f32 %v551_v59, %v550_v58  ;;  %v2310_v58 = vld [vmem:[%s3172_s12 + $0x30] ss:$8 sps:$4 sm:$0xff]   ;;  %v2315_v59 = vld [vmem:[%s3172_s12 + $0x44] ss:$8 sps:$4 sm:$0xff]  }
 0x3c4   :  { %v553_v63 = vmul.f32 0.125, %v552_v62  ;;  %v2313_v62 = vld [vmem:[%s3172_s12 + $0x40] ss:$8 sps:$4 sm:$0xff]  }
 0x3c6   :  { %1901 = vmatmul.mubr.msk.f32.vlgmr.msra.gmra.mrb[2].mxu0 %vm545_vm1, %v553_v63  ;;  %v2318_v63 = vld [vmem:[%s3172_s12 + $0x54] ss:$8 sps:$4 sm:$0xff]  }
 0x3c7   :  { %1930 = vmatprep.mubr.msk.bf16.mxu0 %vm2360_vm0, %v2361_v44  ;;  %1923 = vmatpush3.bf16.msra.mxu0 %v2293_v14 }
 0x3c8   :  { %1924 = vmatprep.subr.bf16.mxu0 %v2361_v44 }
 0x3cb   :  { %1925 = vmatpush3.bf16.msra.mxu0 %v2294_v15 }
 0x3cc   :  { %1926 = vmatprep.subr.bf16.mxu0 %v2361_v44 }
 0x3cf   :  { %1927 = vmatpush3.bf16.msra.mxu0 %v2295_v17 }
 0x3d0   :  { %1928 = vmatprep.subr.bf16.mxu0 %v2361_v44 }
 0x3d3   :  { %1929 = vmatpush3.bf16.msra.mxu0 %v2296_v18 }
 0x3d4   :  { %2088 = vmatprep.subr.bf16.mxu0 %v2359_v1 }
 0x499   :  { %v623_v0 = vpop.f32.mrb[2].mxu0 }
 0x49a   :  { %v630_v2 = vrot.slane %v623_v0, %v2623_v61  ;;  %v1902_v3 = vpop.f32.mrb[3].mxu0  ;;  %v2316_v0 = vld [vmem:[%s3172_s12 + $0x50] ss:$8 sps:$4 sm:$0xff]  }
 0x49b   :  { %v2319_v3 = vld [vmem:[%s3172_s12 + $0x60] ss:$8 sps:$4 sm:$0xff]  }
 0x49c   :  { %v631_v4 = vsub.f32 %v529_v50, %v630_v2  ;;  %v2321_v2 = vld [vmem:[%s3172_s12 + $0x64] ss:$8 sps:$4 sm:$0xff]  }
 0x49e   :  { %v632_v5 = vmul.f32 %v631_v4, %v631_v4 }
 0x4a0   :  { %v633_v6 = vsel %vm545_vm1, %v632_v5, 0.0  ;;  %v2322_v5 = vld [vmem:[%s3172_s12 + $0x70] ss:$8 sps:$4 sm:$0xff]  }
 0x4a1   :  { %v634_v7 = vrot.slane %v633_v6, 4 }
 0x4a3   :  { %v635_v8 = vadd.f32 %v634_v7, %v633_v6  ;;  %v2327_v6 = vld [vmem:[%s3172_s12 + $0x84] ss:$8 sps:$4 sm:$0xff]   ;;  %v2325_v7 = vld [vmem:[%s3172_s12 + $0x80] ss:$8 sps:$4 sm:$0xff]  }
 0x4a5   :  { %v636_v9 = vrot.slane %v635_v8, 2 }
 0x4a7   :  { %v637_v10 = vadd.f32 %v636_v9, %v635_v8  ;;  %v2330_v8 = vld [vmem:[%s3172_s12 + $0x94] ss:$8 sps:$4 sm:$0xff]   ;;  %v2328_v9 = vld [vmem:[%s3172_s12 + $0x90] ss:$8 sps:$4 sm:$0xff]  }
 0x4a9   :  { %v638_v11 = vrot.slane %v637_v10, 1 }
 0x4ab   :  { %v639_v12 = vadd.f32 %v638_v11, %v637_v10 }
 0x4ad   :  { %v640_v13 = vmul.f32 0.125, %v639_v12 }
 0x4af   :  { %1920 = vmatmul.mubr.msk.f32.vlgmr.msra.gmra.mrb[6].mxu1 %vm545_vm1, %v640_v13 }
 0x4b0   :  { %1942 = vmatprep.mubr.msk.bf16.mxu1 %vm2360_vm0, %v2361_v44  ;;  %1935 = vmatpush3.bf16.msra.mxu1 %v2297_v19 }
 0x4b1   :  { %1936 = vmatprep.subr.bf16.mxu1 %v2361_v44 }
 0x4b4   :  { %1937 = vmatpush3.bf16.msra.mxu1 %v2298_v20 }
 0x4b5   :  { %1938 = vmatprep.subr.bf16.mxu1 %v2361_v44 }
 0x4b8   :  { %1939 = vmatpush3.bf16.msra.mxu1 %v2299_v22 }
 0x4b9   :  { %1940 = vmatprep.subr.bf16.mxu1 %v2361_v44 }
 0x4bc   :  { %1941 = vmatpush3.bf16.msra.mxu1 %v2300_v41  ;;  %v2346_v41 = vld [vmem:[%s3172_s12 + $0xf0] ss:$8 sps:$4 sm:$0xff]  }
 0x4bd   :  { %2112 = vmatprep.subr.bf16.mxu1 %v2359_v1 }
 0x582   :  { %v710_v23 = vpop.f32.mrb[6].mxu1 }
 0x583   :  { %v711_v24 = vadd.f32 1e-05, %v710_v23  ;;  %v1921_v25 = vpop.f32.mrb[7].mxu1 }
 0x584   :  { %v2331_v25 = vld [vmem:[%s3172_s12 + $0xa0] ss:$8 sps:$4 sm:$0xff]  }
 0x585   :  { %2351 = vrsqrt.f32 %v711_v24  ;;  %v2333_v24 = vld [vmem:[%s3172_s12 + $0xa4] ss:$8 sps:$4 sm:$0xff]  }
 0x58f   :  { %v2352_v28 = vpop.eup %2351 }
 0x590   :  { %v715_v29 = vmul.f32 %v2352_v28, %v535_v27  ;;  %v2336_v27 = vld [vmem:[%s3172_s12 + $0xb4] ss:$8 sps:$4 sm:$0xff]   ;;  %v2334_v28 = vld [vmem:[%s3172_s12 + $0xb0] ss:$8 sps:$4 sm:$0xff]  }
 0x592   :  { %v719_v30 = vrot.slane %v715_v29, %v2623_v61  ;;  %v2339_v29 = vld [vmem:[%s3172_s12 + $0xc4] ss:$8 sps:$4 sm:$0xff]  }
 0x594   :  { %v720_v35 = vmul.f32 %v719_v30, %v631_v4  ;;  %v2324_v4 = vld [vmem:[%s3172_s12 + $0x74] ss:$8 sps:$4 sm:$0xff]   ;;  %v2337_v30 = vld [vmem:[%s3172_s12 + $0xc0] ss:$8 sps:$4 sm:$0xff]  }
 0x596   :  { %v727_v36 = vadd.f32 %v1622_v33, %v720_v35  ;;  %v2342_v33 = vld [vmem:[%s3172_s12 + $0xd4] ss:$8 sps:$4 sm:$0xff]   ;;  %v2340_v35 = vld [vmem:[%s3172_s12 + $0xd0] ss:$8 sps:$4 sm:$0xff]  }
 0x598   :  { %v728_v38 = vmax.f32 %v727_v36, 0.0  ;;  %v2345_v36 = vld [vmem:[%s3172_s12 + $0xe4] ss:$8 sps:$4 sm:$0xff]  }
 0x59a   :  { %v729_v39 = vpack.c.bf16 %v728_v38, %v728_v38  ;;  %v2343_v38 = vld [vmem:[%s3172_s12 + $0xe0] ss:$8 sps:$4 sm:$0xff]  }
 0x59c   :  { %1931 = vmatmul.mubr.msk.bf16.vlgmr.msra.gmra.mrb[4].mxu0 %vm545_vm1, %v729_v39  ;;  %v2348_v39 = vld [vmem:[%s3172_s12 + $0xf4] ss:$8 sps:$4 sm:$0xff]  }
 0x59d   :  { %2090 = vmatpush3.bf16.msra.mxu0 %v2500_v16  ;;  %1978 = vmatprep.mubr.msk.f32.mxu0 %vm2360_vm0, %v2361_v44 }
 0x59e   :  { %2091 = vmatprep.subr.bf16.mxu0 %v2359_v1 }
 0x5a1   :  { %2093 = vmatpush3.bf16.msra.mxu0 %v2516_v21 }
 0x5a2   :  { %2094 = vmatprep.subr.bf16.mxu0 %v2359_v1 }
 0x5a5   :  { %2096 = vmatpush3.bf16.msra.mxu0 %v2532_v26 }
 0x5a6   :  { %2097 = vmatprep.subr.bf16.mxu0 %v2359_v1 }
 0x5a9   :  { %2099 = vmatpush3.bf16.msra.mxu0 %v2545_v31 }
 0x5aa   :  { %2100 = vmatprep.subr.bf16.mxu0 %v2359_v1 }
 0x5ad   :  { %2102 = vmatpush3.bf16.msra.mxu0 %v2564_v34 }
 0x5ae   :  { %2103 = vmatprep.subr.bf16.mxu0 %v2359_v1 }
 0x5b1   :  { %2105 = vmatpush3.bf16.msra.mxu0 %v2576_v37 }
 0x5b2   :  { %2106 = vmatprep.subr.bf16.mxu0 %v2359_v1 }
 0x5b5   :  { %2108 = vmatpush3.bf16.msra.mxu0 %v2588_v40 }
 0x5b6   :  { %2109 = vmatprep.subr.bf16.mxu0 %v2359_v1 }
 0x5b9   :  { %2111 = vmatpush3.bf16.msra.mxu0 %v2600_v43 }
 0x66f   :  { %v806_v45 = vpop.f32.mrb[4].mxu0 }
 0x670   :  { %v807_v46 = vadd.f32 %v1623_v42, %v806_v45  ;;  %v1932_v47 = vpop.f32.mrb[5].mxu0  ;;  %v1302_v42 = vld [vmem:[%s3173_s17 + $0x8] sm:$0xff]  ;;  %v1304_v45 = vld [vmem:[%s3173_s17 + $0x18] sm:$0xff] }
 0x671   :  { %v809_v48 = vpop.f32.mrb[6].mxu0  ;;  %v2136_v47 = vpack.c.bf16 %v1304_v45, %v1302_v42 }
 0x672   :  { %v812_v49 = vpack.c.bf16 %v807_v46, %v807_v46  ;;  %v1933_v50 = vpop.f32.mrb[7].mxu0  ;;  %v1301_v46 = vld [vmem:[%s3173_s17] sm:$0xff]  ;;  %v1303_v48 = vld [vmem:[%s3173_s17 + $0x10] sm:$0xff] }
 0x673   :  { %v1308_v50 = vld [vmem:[%s3173_s17 + $0x38] sm:$0xff] }
 0x674   :  { %1943 = vmatmul.mubr.msk.bf16.vlgmr.msra.gmra.mrb[12].mxu1 %vm545_vm1, %v812_v49  ;;  %v1306_v49 = vld [vmem:[%s3173_s17 + $0x28] sm:$0xff] }
 0x675   :  { %2114 = vmatpush3.bf16.msra.mxu1 %v2500_v16  ;;  %2013 = vmatprep.mubr.msk.f32.mxu1 %vm2360_vm0, %v2361_v44 }
 0x676   :  { %2115 = vmatprep.subr.bf16.mxu1 %v2359_v1 }
 0x679   :  { %2117 = vmatpush3.bf16.msra.mxu1 %v2516_v21 }
 0x67a   :  { %2118 = vmatprep.subr.bf16.mxu1 %v2359_v1 }
 0x67d   :  { %2120 = vmatpush3.bf16.msra.mxu1 %v2532_v26 }
 0x67e   :  { %2121 = vmatprep.subr.bf16.mxu1 %v2359_v1 }
 0x681   :  { %2123 = vmatpush3.bf16.msra.mxu1 %v2545_v31 }
 0x682   :  { %2124 = vmatprep.subr.bf16.mxu1 %v2359_v1 }
 0x685   :  { %2126 = vmatpush3.bf16.msra.mxu1 %v2564_v34 }
 0x686   :  { %2127 = vmatprep.subr.bf16.mxu1 %v2359_v1 }
 0x689   :  { %2129 = vmatpush3.bf16.msra.mxu1 %v2576_v37  ;;  %v2303_v37 = vld [vmem:[%s3172_s12 + $0x4] ss:$8 sps:$4 sm:$0xff]  }
 0x68a   :  { %2130 = vmatprep.subr.bf16.mxu1 %v2359_v1  ;;  %1258 = vmatprep.subr.bf16.mxu0 %v2303_v37 }
 0x68d   :  { %2132 = vmatpush3.bf16.msra.mxu1 %v2588_v40  ;;  %v2306_v40 = vld [vmem:[%s3172_s12 + $0x14] ss:$8 sps:$4 sm:$0xff]  }
 0x68e   :  { %2133 = vmatprep.subr.bf16.mxu1 %v2359_v1  ;;  %v2301_v1 = vld [vmem:[%s3172_s12] ss:$8 sps:$4 sm:$0xff]  }
 0x691   :  { %2135 = vmatpush3.bf16.msra.mxu1 %v2600_v43  ;;  %v2304_v43 = vld [vmem:[%s3172_s12 + $0x10] ss:$8 sps:$4 sm:$0xff]  }
 0x692   :  { %2137 = vmatprep.subr.bf16.mxu1 %v2136_v47 }
 0x747   :  { %v882_v16 = vpop.f32.mrb[12].mxu1 }
 0x748   :  { %v890_v21 = vrot.slane %v882_v16, 4  ;;  %v1944_v26 = vpop.f32.mrb[13].mxu1 }
 0x749   :  { %v885_v31 = vpop.f32.mrb[14].mxu1  ;;  %v1305_v26 = vld [vmem:[%s3173_s17 + $0x20] sm:$0xff] }
 0x74a   :  { %v891_v44 = vadd.f32 %v890_v21, %v882_v16  ;;  %v1945_v51 = vpop.f32.mrb[15].mxu1  ;;  %v2905_v21 = vpack.c.bf16 %v1308_v50, %v1306_v49  ;;  %v1307_v31 = vld [vmem:[%s3173_s17 + $0x30] sm:$0xff]  ;;  %v1348_v49 = vld [vmem:[%s3173_s17 + $0x178] sm:$0xff] }
 0x74b   :  { %v1312_v51 = vld [vmem:[%s3173_s17 + $0x58] sm:$0xff] }
 0x74c   :  { %v892_v52 = vrot.slane %v891_v44, 2 }
 0x74e   :  { %v893_v34 = vadd.f32 %v892_v52, %v891_v44  ;;  %v1310_v44 = vld [vmem:[%s3173_s17 + $0x48] sm:$0xff]  ;;  %v2920_v52 = vpack.c.bf16 %v1307_v31, %v1305_v26  ;;  %v1345_v31 = vld [vmem:[%s3173_s17 + $0x160] sm:$0xff] }
 0x750   :  { %v894_v53 = vrot.slane %v893_v34, 1 }
 0x752   :  { %v895_v54 = vadd.f32 %v894_v53, %v893_v34  ;;  %v2923_v34 = vpack.c.bf16 %v1312_v51, %v1310_v44  ;;  %v1309_v53 = vld [vmem:[%s3173_s17 + $0x40] sm:$0xff]  ;;  %v1347_v44 = vld [vmem:[%s3173_s17 + $0x170] sm:$0xff] }
 0x753   :  { %v2182_v51 = vpack.c.bf16 %v1347_v44, %v1345_v31 }
 0x754   :  { %v896_v55 = vmul.f32 0.125, %v895_v54  ;;  %v1311_v54 = vld [vmem:[%s3173_s17 + $0x50] sm:$0xff] }
 0x755   :  { %v2938_v37 = vpack.c.bf16 %v1311_v54, %v1309_v53 }
 0x756   :  { %1979 = vmatmul.mubr.f32.vlgmr.msra.gmra.mrb[8].mxu0 %v896_v55  ;;  %v1314_v55 = vld [vmem:[%s3173_s17 + $0x68] sm:$0xff] }
 0x757   :  { %1290 = vmatprep.mubr.bf16.mxu0 %v2659_v32  ;;  %1259 = vmatpush1.bf16.msra.mxu0 %v2301_v1  ;;  %v2309_v32 = vld [vmem:[%s3172_s12 + $0x24] ss:$8 sps:$4 sm:$0xff]   ;;  %v1316_v1 = vld [vmem:[%s3173_s17 + $0x78] sm:$0xff] }
 0x758   :  { %1260 = vmatprep.subr.bf16.mxu0 %v2306_v40  ;;  %v2941_v40 = vpack.c.bf16 %v1316_v1, %v1314_v55  ;;  %v888_v1 = vld [vmem:[%s3174_s10] sm:$0x1] }
 0x75b   :  { %1261 = vmatpush1.bf16.msra.mxu0 %v2304_v43  ;;  %v1313_v43 = vld [vmem:[%s3173_s17 + $0x60] sm:$0xff] }
 0x75c   :  { %1262 = vmatprep.subr.bf16.mxu0 %v2309_v32  ;;  %v1315_v32 = vld [vmem:[%s3173_s17 + $0x70] sm:$0xff] }
 0x75f   :  { %1263 = vmatpush1.bf16.msra.mxu0 %v2307_v56  ;;  %v1318_v56 = vld [vmem:[%s3173_s17 + $0x88] sm:$0xff] }
 0x760   :  { %1264 = vmatprep.subr.bf16.mxu0 %v2312_v57  ;;  %v1320_v57 = vld [vmem:[%s3173_s17 + $0x98] sm:$0xff] }
 0x763   :  { %1265 = vmatpush1.bf16.msra.mxu0 %v2310_v58  ;;  %v2956_v58 = vpack.c.bf16 %v1315_v32, %v1313_v43 }
 0x764   :  { %1266 = vmatprep.subr.bf16.mxu0 %v2315_v59  ;;  %v2959_v59 = vpack.c.bf16 %v1320_v57, %v1318_v56  ;;  %v1634_v57 = vld [vmem:[%s3175_s11] ss:$0 sm:$0xff] }
 0x767   :  { %1267 = vmatpush1.bf16.msra.mxu0 %v2313_v62  ;;  %v1317_v62 = vld [vmem:[%s3173_s17 + $0x80] sm:$0xff] }
 0x768   :  { %1268 = vmatprep.subr.bf16.mxu0 %v2318_v63  ;;  %v1319_v63 = vld [vmem:[%s3173_s17 + $0x90] sm:$0xff] }
 0x76b   :  { %1269 = vmatpush1.bf16.msra.mxu0 %v2316_v0  ;;  %v1322_v0 = vld [vmem:[%s3173_s17 + $0xa8] sm:$0xff] }
 0x76c   :  { %1270 = vmatprep.subr.bf16.mxu0 %v2321_v2  ;;  %v1324_v2 = vld [vmem:[%s3173_s17 + $0xb8] sm:$0xff] }
 0x76f   :  { %1271 = vmatpush1.bf16.msra.mxu0 %v2319_v3  ;;  %v2974_v3 = vpack.c.bf16 %v1319_v63, %v1317_v62 }
 0x770   :  { %1272 = vmatprep.subr.bf16.mxu0 %v2324_v4  ;;  %v2977_v4 = vpack.c.bf16 %v1324_v2, %v1322_v0 }
 0x773   :  { %1273 = vmatpush1.bf16.msra.mxu0 %v2322_v5  ;;  %v1321_v5 = vld [vmem:[%s3173_s17 + $0xa0] sm:$0xff] }
 0x774   :  { %1274 = vmatprep.subr.bf16.mxu0 %v2327_v6  ;;  %v1323_v6 = vld [vmem:[%s3173_s17 + $0xb0] sm:$0xff] }
 0x777   :  { %1275 = vmatpush1.bf16.msra.mxu0 %v2325_v7  ;;  %v1326_v7 = vld [vmem:[%s3173_s17 + $0xc8] sm:$0xff] }
 0x778   :  { %1276 = vmatprep.subr.bf16.mxu0 %v2330_v8  ;;  %v1328_v8 = vld [vmem:[%s3173_s17 + $0xd8] sm:$0xff] }
 0x77b   :  { %1277 = vmatpush1.bf16.msra.mxu0 %v2328_v9  ;;  %v2992_v9 = vpack.c.bf16 %v1323_v6, %v1321_v5  ;;  %v1358_v6 = vld [vmem:[%s3173_s17 + $0x1c8] sm:$0xff] }
 0x77c   :  { %1278 = vmatprep.subr.bf16.mxu0 %v2333_v24 }
 0x77f   :  { %1279 = vmatpush1.bf16.msra.mxu0 %v2331_v25 }
 0x780   :  { %1280 = vmatprep.subr.bf16.mxu0 %v2336_v27  ;;  %v1333_v27 = vld [vmem:[%s3173_s17 + $0x100] sm:$0xff] }
 0x783   :  { %1281 = vmatpush1.bf16.msra.mxu0 %v2334_v28  ;;  %v1335_v28 = vld [vmem:[%s3173_s17 + $0x110] sm:$0xff] }
 0x784   :  { %1282 = vmatprep.subr.bf16.mxu0 %v2339_v29  ;;  %v1338_v29 = vld [vmem:[%s3173_s17 + $0x128] sm:$0xff] }
 0x787   :  { %1283 = vmatpush1.bf16.msra.mxu0 %v2337_v30  ;;  %v1340_v30 = vld [vmem:[%s3173_s17 + $0x138] sm:$0xff] }
 0x788   :  { %1284 = vmatprep.subr.bf16.mxu0 %v2342_v33  ;;  %v2170_v33 = vpack.c.bf16 %v1335_v28, %v1333_v27 }
 0x78b   :  { %1285 = vmatpush1.bf16.msra.mxu0 %v2340_v35  ;;  %v2172_v35 = vpack.c.bf16 %v1340_v30, %v1338_v29 }
 0x78c   :  { %1286 = vmatprep.subr.bf16.mxu0 %v2345_v36  ;;  %v1337_v36 = vld [vmem:[%s3173_s17 + $0x120] sm:$0xff] }
 0x78f   :  { %1287 = vmatpush1.bf16.msra.mxu0 %v2343_v38  ;;  %v1339_v38 = vld [vmem:[%s3173_s17 + $0x130] sm:$0xff] }
 0x790   :  { %1288 = vmatprep.subr.bf16.mxu0 %v2348_v39  ;;  %v1342_v39 = vld [vmem:[%s3173_s17 + $0x148] sm:$0xff]  ;;  %v2174_v42 = vpack.c.bf16 %v1339_v38, %v1337_v36 }
 0x793   :  { %1289 = vmatpush1.bf16.msra.mxu0 %v2346_v41  ;;  %v1344_v41 = vld [vmem:[%s3173_s17 + $0x158] sm:$0xff] }
 0x794   :  { %2201 = vmatprep.subr.bf16.mxu0 %v2136_v47  ;;  %v2176_v45 = vpack.c.bf16 %v1344_v41, %v1342_v39  ;;  %v1343_v47 = vld [vmem:[%s3173_s17 + $0x150] sm:$0xff] }
 0x829   :  { %v963_v10 = vpop.f32.mrb[8].mxu0 }
 0x82a   :  { %v970_v11 = vrot.slane %v963_v10, %v2623_v61  ;;  %v1980_v12 = vpop.f32.mrb[9].mxu0  ;;  %v2995_v10 = vpack.c.bf16 %v1328_v8, %v1326_v7  ;;  %v1360_v7 = vld [vmem:[%s3173_s17 + $0x1d8] sm:$0xff] }
 0x82b   :  { %v1327_v12 = vld [vmem:[%s3173_s17 + $0xd0] sm:$0xff]  ;;  %v2192_v8 = vpack.c.bf16 %v1360_v7, %v1358_v6 }
 0x82c   :  { %v2845_v13 = vsub.f32 %v882_v16, %v970_v11  ;;  %v2903_v16 = vpack.c.bf16 %v1303_v48, %v1301_v46  ;;  %v1325_v11 = vld [vmem:[%s3173_s17 + $0xc0] sm:$0xff]  ;;  %v1346_v48 = vld [vmem:[%s3173_s17 + $0x168] sm:$0xff] }
 0x82d   :  { %v1341_v46 = vld [vmem:[%s3173_s17 + $0x140] sm:$0xff]  ;;  %v2180_v26 = vpack.c.bf16 %v1348_v49, %v1346_v48 }
 0x82e   :  { %v972_v14 = vmul.f32 %v2845_v13, %v2845_v13  ;;  %v2178_v50 = vpack.c.bf16 %v1343_v47, %v1341_v46 }
 0x830   :  { %v973_v15 = vrot.slane %v972_v14, 4 }
 0x832   :  { %v974_v17 = vadd.f32 %v973_v15, %v972_v14  ;;  %v1330_v14 = vld [vmem:[%s3173_s17 + $0xe8] sm:$0xff]  ;;  %v1332_v15 = vld [vmem:[%s3173_s17 + $0xf8] sm:$0xff] }
 0x834   :  { %v975_v18 = vrot.slane %v974_v17, 2 }
 0x836   :  { %v976_v19 = vadd.f32 %v975_v18, %v974_v17  ;;  %v3010_v17 = vpack.c.bf16 %v1327_v12, %v1325_v11  ;;  %v3013_v18 = vpack.c.bf16 %v1332_v15, %v1330_v14  ;;  %v1362_v12 = vld [vmem:[%s3173_s17 + $0x1e8] sm:$0xff]  ;;  %v1364_v14 = vld [vmem:[%s3173_s17 + $0x1f8] sm:$0xff] }
 0x837   :  { %v2196_v15 = vpack.c.bf16 %v1364_v14, %v1362_v12 }
 0x838   :  { %v977_v20 = vrot.slane %v976_v19, 1 }
 0x83a   :  { %v978_v22 = vadd.f32 %v977_v20, %v976_v19  ;;  %v1329_v19 = vld [vmem:[%s3173_s17 + $0xe0] sm:$0xff]  ;;  %v1331_v20 = vld [vmem:[%s3173_s17 + $0xf0] sm:$0xff] }
 0x83b   :  { %v2166_v24 = vpack.c.bf16 %v1331_v20, %v1329_v19 }
 0x83c   :  { %v979_v23 = vmul.f32 0.125, %v978_v22  ;;  %v1334_v22 = vld [vmem:[%s3173_s17 + $0x108] sm:$0xff] }
 0x83e   :  { %2014 = vmatmul.mubr.f32.vlgmr.msra.gmra.mrb[16].mxu1 %v979_v23  ;;  %v1336_v23 = vld [vmem:[%s3173_s17 + $0x118] sm:$0xff] }
 0x83f   :  { %2139 = vmatpush1.bf16.msra.mxu1 %v2903_v16  ;;  %v2168_v25 = vpack.c.bf16 %v1336_v23, %v1334_v22 }
 0x840   :  { %2141 = vmatprep.subr.bf16.mxu1 %v2905_v21 }
 0x843   :  { %2143 = vmatpush1.bf16.msra.mxu1 %v2920_v52 }
 0x844   :  { %2145 = vmatprep.subr.bf16.mxu1 %v2923_v34 }
 0x847   :  { %2147 = vmatpush1.bf16.msra.mxu1 %v2938_v37 }
 0x848   :  { %2149 = vmatprep.subr.bf16.mxu1 %v2941_v40 }
 0x84b   :  { %2151 = vmatpush1.bf16.msra.mxu1 %v2956_v58 }
 0x84c   :  { %2153 = vmatprep.subr.bf16.mxu1 %v2959_v59 }
 0x84f   :  { %2155 = vmatpush1.bf16.msra.mxu1 %v2974_v3 }
 0x850   :  { %2157 = vmatprep.subr.bf16.mxu1 %v2977_v4 }
 0x853   :  { %2159 = vmatpush1.bf16.msra.mxu1 %v2992_v9 }
 0x854   :  { %2161 = vmatprep.subr.bf16.mxu1 %v2995_v10 }
 0x857   :  { %2163 = vmatpush1.bf16.msra.mxu1 %v3010_v17 }
 0x858   :  { %2165 = vmatprep.subr.bf16.mxu1 %v3013_v18 }
 0x85b   :  { %2167 = vmatpush1.bf16.msra.mxu1 %v2166_v24 }
 0x85c   :  { %2169 = vmatprep.subr.bf16.mxu1 %v2168_v25 }
 0x85f   :  { %2171 = vmatpush1.bf16.msra.mxu1 %v2170_v33 }
 0x860   :  { %2173 = vmatprep.subr.bf16.mxu1 %v2172_v35 }
 0x863   :  { %2175 = vmatpush1.bf16.msra.mxu1 %v2174_v42 }
 0x864   :  { %2177 = vmatprep.subr.bf16.mxu1 %v2176_v45 }
 0x867   :  { %2179 = vmatpush1.bf16.msra.mxu1 %v2178_v50 }
 0x868   :  { %2181 = vmatprep.subr.bf16.mxu1 %v2180_v26 }
 0x86b   :  { %2183 = vmatpush1.bf16.msra.mxu1 %v2182_v51 }
 0x911   :  { %v1046_v53 = vpop.f32.mrb[16].mxu1 }
 0x912   :  { %v1047_v54 = vadd.f32 1e-05, %v1046_v53  ;;  %v2015_v55 = vpop.f32.mrb[17].mxu1 }
 0x914   :  { %2353 = vrsqrt.f32 %v1047_v54 }
 0x91e   :  { %v2354_v43 = vpop.eup %2353 }
 0x91f   :  { %v1051_v32 = vmul.f32 %v2354_v43, %v888_v1 }
 0x921   :  { %v1055_v56 = vrot.slane %v1051_v32, %v2623_v61 }
 0x923   :  { %v1056_v62 = vmul.f32 %v1055_v56, %v2845_v13  ;;  %v1350_v13 = vld [vmem:[%s3173_s17 + $0x188] sm:$0xff] }
 0x925   :  { %v1063_v63 = vadd.f32 %v1634_v57, %v1056_v62 }
 0x927   :  { %v1064_v0 = vmax.f32 %v1063_v63, 0.0 }
 0x929   :  { %v1065_v2 = vpack.c.bf16 %v1064_v0, %v1064_v0 }
 0x92b   :  { %1291 = vmatmul.mubr.bf16.vlgmr.msra.gmra.mrb[12].mxu0 %v1065_v2 }
 0x92c   :  { %2203 = vmatpush1.bf16.msra.mxu0 %v2903_v16  ;;  %v1352_v16 = vld [vmem:[%s3173_s17 + $0x198] sm:$0xff] }
 0x92d   :  { %2205 = vmatprep.subr.bf16.mxu0 %v2905_v21  ;;  %v2184_v21 = vpack.c.bf16 %v1352_v16, %v1350_v13 }
 0x92f   :  { %2185 = vmatprep.subr.bf16.mxu1 %v2184_v21 }
 0x930   :  { %2207 = vmatpush1.bf16.msra.mxu0 %v2920_v52  ;;  %v1349_v52 = vld [vmem:[%s3173_s17 + $0x180] sm:$0xff] }
 0x931   :  { %2209 = vmatprep.subr.bf16.mxu0 %v2923_v34  ;;  %v1351_v34 = vld [vmem:[%s3173_s17 + $0x190] sm:$0xff] }
 0x934   :  { %2211 = vmatpush1.bf16.msra.mxu0 %v2938_v37  ;;  %v2186_v37 = vpack.c.bf16 %v1351_v34, %v1349_v52 }
 0x935   :  { %2213 = vmatprep.subr.bf16.mxu0 %v2941_v40  ;;  %v1354_v40 = vld [vmem:[%s3173_s17 + $0x1a8] sm:$0xff] }
 0x936   :  { %2187 = vmatpush1.bf16.msra.mxu1 %v2186_v37 }
 0x938   :  { %2215 = vmatpush1.bf16.msra.mxu0 %v2956_v58  ;;  %v1356_v58 = vld [vmem:[%s3173_s17 + $0x1b8] sm:$0xff] }
 0x939   :  { %2217 = vmatprep.subr.bf16.mxu0 %v2959_v59  ;;  %v2188_v59 = vpack.c.bf16 %v1356_v58, %v1354_v40  ;;  %v1299_v40 = vld [vmem:[%s3176_s13] sm:$0x3]  ;;  %v1556_v58 = vsub.s32 1, %v2620_v60 }
 0x93b   :  { %2189 = vmatprep.subr.bf16.mxu1 %v2188_v59 }
 0x93c   :  { %2219 = vmatpush1.bf16.msra.mxu0 %v2974_v3  ;;  %v1353_v3 = vld [vmem:[%s3173_s17 + $0x1a0] sm:$0xff] }
 0x93d   :  { %2221 = vmatprep.subr.bf16.mxu0 %v2977_v4  ;;  %v1355_v4 = vld [vmem:[%s3173_s17 + $0x1b0] sm:$0xff] }
 0x93e   :  { %v2190_v5 = vpack.c.bf16 %v1355_v4, %v1353_v3  ;;  %v1557_v3 = vrot.slane %v1299_v40, %v1556_v58 }
 0x940   :  { %2223 = vmatpush1.bf16.msra.mxu0 %v2992_v9  ;;  %2191 = vmatpush1.bf16.msra.mxu1 %v2190_v5  ;;  %v1357_v9 = vld [vmem:[%s3173_s17 + $0x1c0] sm:$0xff] }
 0x941   :  { %2225 = vmatprep.subr.bf16.mxu0 %v2995_v10  ;;  %v1359_v10 = vld [vmem:[%s3173_s17 + $0x1d0] sm:$0xff]  ;;  %2193 = vmatprep.subr.bf16.mxu1 %v2192_v8 }
 0x942   :  { %v2194_v11 = vpack.c.bf16 %v1359_v10, %v1357_v9 }
 0x944   :  { %2227 = vmatpush1.bf16.msra.mxu0 %v3010_v17  ;;  %2195 = vmatpush1.bf16.msra.mxu1 %v2194_v11  ;;  %v1361_v17 = vld [vmem:[%s3173_s17 + $0x1e0] sm:$0xff] }
 0x945   :  { %2229 = vmatprep.subr.bf16.mxu0 %v3013_v18  ;;  %v1363_v18 = vld [vmem:[%s3173_s17 + $0x1f0] sm:$0xff]  ;;  %2197 = vmatprep.subr.bf16.mxu1 %v2196_v15 }
 0x946   :  { %v2198_v19 = vpack.c.bf16 %v1363_v18, %v1361_v17 }
 0x948   :  { %2231 = vmatpush1.bf16.msra.mxu0 %v2166_v24  ;;  %2199 = vmatpush1.bf16.msra.mxu1 %v2198_v19 }
 0x949   :  { %2233 = vmatprep.subr.bf16.mxu0 %v2168_v25 }
 0x94c   :  { %2235 = vmatpush1.bf16.msra.mxu0 %v2170_v33 }
 0x94d   :  { %2237 = vmatprep.subr.bf16.mxu0 %v2172_v35 }
 0x950   :  { %2239 = vmatpush1.bf16.msra.mxu0 %v2174_v42 }
 0x951   :  { %2241 = vmatprep.subr.bf16.mxu0 %v2176_v45 }
 0x954   :  { %2243 = vmatpush1.bf16.msra.mxu0 %v2178_v50 }
 0x955   :  { %2245 = vmatprep.subr.bf16.mxu0 %v2180_v26 }
 0x958   :  { %2247 = vmatpush1.bf16.msra.mxu0 %v2182_v51 }
 0x959   :  { %2249 = vmatprep.subr.bf16.mxu0 %v2184_v21 }
 0x95c   :  { %2251 = vmatpush1.bf16.msra.mxu0 %v2186_v37 }
 0x95d   :  { %2253 = vmatprep.subr.bf16.mxu0 %v2188_v59  ;;  %v1553_v59 = vrot.slane %v1299_v40, %v2623_v61 }
 0x960   :  { %2255 = vmatpush1.bf16.msra.mxu0 %v2190_v5  ;;  %v1300_v5 = vld [vmem:[%s3177_s14] sm:$0x3] }
 0x961   :  { %2257 = vmatprep.subr.bf16.mxu0 %v2192_v8  ;;  %v1576_v10 = vrot.slane %v1300_v5, %v2623_v61  ;;  %v1580_v12 = vrot.slane %v1300_v5, %v1556_v58 }
 0x964   :  { %2259 = vmatpush1.bf16.msra.mxu0 %v2194_v11 }
 0x965   :  { %2261 = vmatprep.subr.bf16.mxu0 %v2196_v15 }
 0x968   :  { %2263 = vmatpush1.bf16.msra.mxu0 %v2198_v19 }
 0x9fe   :  { %v1292_v20 = vpop.f32.mrb[12].mxu0 }
 0x9ff   :  { %v1365_v22 = vrot.slane %v1292_v20, 4  ;;  %v1294_v23 = vpop.f32.mrb[13].mxu0 }
 0xa00   :  { %v1371_v24 = vrot.slane %v1294_v23, 4  ;;  %v1296_v25 = vpop.f32.mrb[14].mxu0 }
 0xa01   :  { %v1366_v27 = vadd.f32 %v1365_v22, %v1292_v20  ;;  %v1297_v28 = vpop.f32.mrb[15].mxu0 }
 0xa02   :  { %v1372_v29 = vadd.f32 %v1371_v24, %v1294_v23 }
 0xa03   :  { %v1367_v30 = vrot.slane %v1366_v27, 2 }
 0xa04   :  { %v1373_v33 = vrot.slane %v1372_v29, 2 }
 0xa05   :  { %v1368_v35 = vadd.f32 %v1367_v30, %v1366_v27 }
 0xa06   :  { %v1374_v36 = vadd.f32 %v1373_v33, %v1372_v29 }
 0xa07   :  { %v1369_v38 = vrot.slane %v1368_v35, 1 }
 0xa08   :  { %v1375_v39 = vrot.slane %v1374_v36, 1 }
 0xa09   :  { %v1370_v41 = vadd.f32 %v1369_v38, %v1368_v35 }
 0xa0a   :  { %v1376_v42 = vadd.f32 %v1375_v39, %v1374_v36 }
 0xa0b   :  { %v1377_v46 = vmul.f32 0.125, %v1370_v41 }
 0xa0c   :  { %v1378_v45 = vmul.f32 0.125, %v1376_v42 }
 0xa0e   :  { %1443 = vmatprep.mubr.f32.mxu1 %v1378_v45 }
 0xa0f   :  { %1444 = vmatmul.mubr.f32.vlgmr.msra.gmra.mrb[18].mxu1 %v1377_v46 }
 0xae2   :  { %v1445_v47 = vpop.f32.mrb[18].mxu1 }
 0xae3   :  { %v1453_v48 = vrot.slane %v1445_v47, %v2623_v61  ;;  %v1447_v49 = vpop.f32.mrb[19].mxu1 }
 0xae4   :  { %v1457_v50 = vrot.slane %v1447_v49, %v2623_v61 }
 0xae5   :  { %v1458_v26 = vsub.f32 %v1292_v20, %v1453_v48 }
 0xae6   :  { %v1459_v31 = vsub.f32 %v1294_v23, %v1457_v50 }
 0xae7   :  { %v1460_v44 = vmul.f32 %v1458_v26, %v1458_v26 }
 0xae8   :  { %v1461_v51 = vmul.f32 %v1459_v31, %v1459_v31 }
 0xae9   :  { %v1462_v53 = vrot.slane %v1460_v44, 4 }
 0xaea   :  { %v1468_v54 = vrot.slane %v1461_v51, 4 }
 0xaeb   :  { %v1463_v55 = vadd.f32 %v1462_v53, %v1460_v44 }
 0xaec   :  { %v1469_v1 = vadd.f32 %v1468_v54, %v1461_v51 }
 0xaed   :  { %v1464_v43 = vrot.slane %v1463_v55, 2 }
 0xaee   :  { %v1470_v32 = vrot.slane %v1469_v1, 2 }
 0xaef   :  { %v1465_v56 = vadd.f32 %v1464_v43, %v1463_v55 }
 0xaf0   :  { %v1471_v57 = vadd.f32 %v1470_v32, %v1469_v1 }
 0xaf1   :  { %v1466_v62 = vrot.slane %v1465_v56, 1 }
 0xaf2   :  { %v1472_v63 = vrot.slane %v1471_v57, 1 }
 0xaf3   :  { %v1467_v0 = vadd.f32 %v1466_v62, %v1465_v56 }
 0xaf4   :  { %v1473_v2 = vadd.f32 %v1472_v63, %v1471_v57 }
 0xaf5   :  { %v1474_v16 = vmul.f32 0.125, %v1467_v0 }
 0xaf6   :  { %v1475_v13 = vmul.f32 0.125, %v1473_v2 }
 0xaf8   :  { %1540 = vmatprep.mubr.f32.mxu0 %v1475_v13 }
 0xaf9   :  { %1541 = vmatmul.mubr.f32.vlgmr.msra.gmra.mrb[10].mxu0 %v1474_v16 }
 0xbcc   :  { %v1542_v21 = vpop.f32.mrb[10].mxu0 }
 0xbcd   :  { %v1543_v52 = vadd.f32 1e-05, %v1542_v21  ;;  %v1544_v34 = vpop.f32.mrb[11].mxu0 }
 0xbce   :  { %v1545_v37 = vadd.f32 1e-05, %v1544_v34 }
 0xbcf   :  { %2355 = vrsqrt.f32 %v1543_v52 }
 0xbd0   :  { %2357 = vrsqrt.f32 %v1545_v37 }
 0xbd9   :  { %v2356_v4 = vpop.eup %2355 }
 0xbda   :  { %v2358_v6 = vpop.eup %2357  ;;  %v1560_v7 = vmul.f32 %v2356_v4, %v1553_v59 }
 0xbdb   :  { %v1561_v8 = vmul.f32 %v2358_v6, %v1557_v3 }
 0xbdc   :  { %v1565_v9 = vrot.slane %v1560_v7, %v2623_v61 }
 0xbdd   :  { %v1569_v11 = vrot.slane %v1561_v8, %v2623_v61 }
 0xbde   :  { %v1570_v14 = vmul.f32 %v1565_v9, %v1458_v26 }
 0xbdf   :  { %v1571_v60 = vmul.f32 %v1569_v11, %v1459_v31 }
 0xbe0   :  { %v1583_v15 = vadd.f32 %v1576_v10, %v1570_v14 }
 0xbe1   :  { %v1584_v17 = vadd.f32 %v1580_v12, %v1571_v60 }
 0xbe2   :  { %v1585_v18 = vmax.f32 %v1583_v15, 0.0 }
 0xbe3   :  { %v1586_v19 = vmax.f32 %v1584_v17, 0.0 }
 0xbe4   :  { %1587 = vst [vmem:[%s3178_s18] sm:$0xff] %v1585_v18 }
 0xbe5   :  { %1588 = vst [vmem:[%s3178_s18 + $0x8] sm:$0xff] %v1586_v19 }

</bundles_post_ra>
